<compile_context>
chip_gen: v7x
topology: tpu7x:2x2x1
jax: 0.10.0
libtpu: 0.0.40
codegen_flags: <defaults>
</compile_context>

<pallas_src>
import functools

import numpy as np
import jax
import jax.numpy as jnp
from jax import lax
from jax.experimental import pallas as pl
from jax.experimental.pallas import tpu as pltpu

# ---- static shape configuration (fc1 in_features=1216 = 64*19  =>  L_IN = 88) ----
LATENT_DIM = 16
B = 2
C_IN = 12
L_IN = 88
K = 5
C1 = 64
L1 = L_IN - K + 1   # 84
P1 = L1 // 2        # 42
C2 = 64
L2 = P1 - K + 1     # 38
P2 = L2 // 2        # 19
FLAT = C2 * P2      # 1216
H = 256


# --------------------------- single fused kernel ---------------------------
def _encoder_kernel(batch,
                    x_ref,      # (B, 88, 12)   input, length-major (NLC)
                    w1_ref,     # (60, 64)      conv1 weight, im2col order [k*12+i, c]
                    b1_ref,     # (1, 64)
                    w2_ref,     # (320, 64)     conv2 weight, im2col order [k*64+i, c]
                    b2_ref,     # (1, 64)
                    wf1_hbm,    # (1216, 256)   fc1 weight in HBM (pl.ANY), rows in t*64+c order
                    fb1_ref,    # (1, 256)
                    wf2_hbm,    # (256, 256)    fc2 weight in HBM (pl.ANY), already transposed
                    fb2_ref,    # (1, 256)
                    wf3_ref,    # (256, latent) fc3 weight (already transposed)
                    fb3_ref,    # (1, latent)
                    out_ref,    # (B, latent)
                    wf1_v,      # VMEM (1216, 256) landing buffer for wf1
                    wf2_v,      # VMEM (256, 256)  landing buffer for wf2
                    sems,       # DMA semaphores (2,)
                    lhs1_s,     # VMEM (B*84, 60)  conv1 im2col
                    y1_s,       # VMEM (B*84, 64)  conv1 post-relu (pool source)
                    lhs2_s,     # VMEM (B*38, 320) conv2 im2col
                    y2_s,       # VMEM (B*38, 64)  conv2 post-relu (pool source)
                    flat_s):    # VMEM (B, 1216)   flattened features
    # Kick off the big fc-weight DMAs immediately so they overlap the conv stage.
    cp_wf1 = pltpu.make_async_copy(wf1_hbm, wf1_v, sems.at[0])
    cp_wf2 = pltpu.make_async_copy(wf2_hbm, wf2_v, sems.at[1])
    cp_wf1.start()
    cp_wf2.start()

    # ---- conv1: im2col assembled via static scratch stores, batch stacked on sublanes ----
    for b in range(batch):
        xb = x_ref[b]                                           # (88, 12)
        for k in range(K):
            lhs1_s[b * L1:(b + 1) * L1, k * C_IN:(k + 1) * C_IN] = xb[k:k + L1, :]
    y1_s[...] = jnp.maximum(
        jnp.dot(lhs1_s[...], w1_ref[...], preferred_element_type=jnp.float32)
        + b1_ref[...], 0.0)                                     # (B*84, 64)

    # ---- pool1: even/odd sublane-strided loads + VPU max (no MXU) ----
    p1 = jnp.maximum(y1_s[pl.ds(0, batch * P1, stride=2), :],
                     y1_s[pl.ds(1, batch * P1, stride=2), :])   # (B*42, 64)

    # ---- conv2: im2col, single 320-deep contraction ----
    for b in range(batch):
        for k in range(K):
            lhs2_s[b * L2:(b + 1) * L2, k * C1:(k + 1) * C1] = \
                p1[b * P1 + k: b * P1 + k + L2, :]
    y2_s[...] = jnp.maximum(
        jnp.dot(lhs2_s[...], w2_ref[...], preferred_element_type=jnp.float32)
        + b2_ref[...], 0.0)                                     # (B*38, 64)

    # ---- pool2 ----
    p2 = jnp.maximum(y2_s[pl.ds(0, batch * P2, stride=2), :],
                     y2_s[pl.ds(1, batch * P2, stride=2), :])   # (B*19, 64)

    # ---- flatten (torch order c*19+t is matched by the pre-permuted wf1 rows t*64+c) ----
    for t in range(P2):
        rows = jnp.concatenate(
            [p2[b * P2 + t: b * P2 + t + 1, :] for b in range(batch)], axis=0)  # (B, 64)
        flat_s[:, t * C2:(t + 1) * C2] = rows

    # ---- MLP head; the overlapped weight DMAs complete here ----
    cp_wf1.wait()
    h1 = jnp.maximum(
        jnp.dot(flat_s[...], wf1_v[...], preferred_element_type=jnp.float32)
        + fb1_ref[...], 0.0)
    cp_wf2.wait()
    h2 = jnp.maximum(
        jnp.dot(h1, wf2_v[...], preferred_element_type=jnp.float32) + fb2_ref[...], 0.0)
    out_ref[...] = (jnp.dot(h2, wf3_ref[...], preferred_element_type=jnp.float32)
                    + fb3_ref[...])


def _fused_encoder(xt, prep):
    batch = xt.shape[0]
    latent = prep["wf3"].shape[1]
    vmem = lambda: pl.BlockSpec(memory_space=pltpu.MemorySpace.VMEM)
    hbm = lambda: pl.BlockSpec(memory_space=pl.ANY)

    flops = int(2 * (batch * L1 * (K * C_IN) * C1      # conv1
                     + batch * L2 * (K * C1) * C2      # conv2
                     + batch * FLAT * H                # fc1
                     + batch * H * H                   # fc2
                     + batch * H * latent))            # fc3
    bytes_accessed = int(4 * (xt.size
                              + K * C_IN * C1 + C1
                              + K * C1 * C2 + C2
                              + FLAT * H + H
                              + H * H + H
                              + H * latent + latent
                              + batch * latent))

    return pl.pallas_call(
        functools.partial(_encoder_kernel, batch),
        out_shape=jax.ShapeDtypeStruct((batch, latent), jnp.float32),
        in_specs=[vmem(), vmem(), vmem(), vmem(), vmem(),
                  hbm(), vmem(), hbm(), vmem(), vmem(), vmem()],
        out_specs=vmem(),
        scratch_shapes=[
            pltpu.VMEM((FLAT, H), jnp.float32),              # wf1 landing buffer
            pltpu.VMEM((H, H), jnp.float32),                 # wf2 landing buffer
            pltpu.SemaphoreType.DMA((2,)),
            pltpu.VMEM((batch * L1, K * C_IN), jnp.float32),  # conv1 im2col
            pltpu.VMEM((batch * L1, C1), jnp.float32),        # conv1 output (pool source)
            pltpu.VMEM((batch * L2, K * C1), jnp.float32),    # conv2 im2col
            pltpu.VMEM((batch * L2, C2), jnp.float32),        # conv2 output (pool source)
            pltpu.VMEM((batch, FLAT), jnp.float32),           # flattened features
        ],
        cost_estimate=pl.CostEstimate(flops=flops, transcendentals=0,
                                      bytes_accessed=bytes_accessed),
    )(xt, prep["w1c"], prep["b1"], prep["w2c"], prep["b2"],
      prep["wf1"], prep["fb1"], prep["wf2"], prep["fb2"], prep["wf3"], prep["fb3"])


# ------------------------------ forward + param prep ------------------------------
def prepare_params(p):
    """One-time layout preparation (hoisted out of the per-call hot path)."""
    return dict(
        # conv weights in im2col order: w1c[k*12+i, c] = conv1_w[c, i, k]
        w1c=jnp.transpose(p["conv1_w"], (2, 1, 0)).reshape(K * C_IN, C1),
        b1=p["conv1_b"].reshape(1, C1),
        w2c=jnp.transpose(p["conv2_w"], (2, 1, 0)).reshape(K * C1, C2),
        b2=p["conv2_b"].reshape(1, C2),
        # wf1[t*64+c, j] = fc1_w[j, c*19+t]  (matches torch.flatten order c*19+t)
        wf1=jnp.transpose(p["fc1_w"].reshape(H, C2, P2), (2, 1, 0)).reshape(P2 * C2, H),
        fb1=p["fc1_b"].reshape(1, H),
        wf2=p["fc2_w"].T,
        fb2=p["fc2_b"].reshape(1, H),
        wf3=p["fc3_w"].T,
        fb3=p["fc3_b"].reshape(1, -1),
    )


def motion_encoder_forward(x, prep):
    # NCL -> NLC (length on sublanes, channels on lanes); tiny (8 KB) one-op relayout kept
    # in the wrapper (an in-kernel unaligned (12,88) transpose buys ~nothing here).
    xt = jnp.transpose(x, (0, 2, 1))
    return _fused_encoder(xt, prep)


# ------------------------------ parameters & reference ------------------------------
def init_params(key, latent_dim):
    ks = jax.random.split(key, 10)

    def u(k, shape, fan_in):
        bound = 1.0 / np.sqrt(fan_in)
        return jax.random.uniform(k, shape, jnp.float32, -bound, bound)

    return dict(
        conv1_w=u(ks[0], (C1, C_IN, K), C_IN * K),
        conv1_b=u(ks[1], (C1,), C_IN * K),
        conv2_w=u(ks[2], (C2, C1, K), C1 * K),
        conv2_b=u(ks[3], (C2,), C1 * K),
        fc1_w=u(ks[4], (H, FLAT), FLAT),   # PyTorch Linear weight layout (out, in)
        fc1_b=u(ks[5], (H,), FLAT),
        fc2_w=u(ks[6], (H, H), H),
        fc2_b=u(ks[7], (H,), H),
        fc3_w=u(ks[8], (latent_dim, H), H),
        fc3_b=u(ks[9], (latent_dim,), H),
    )


def reference_forward(x, p):
    def conv1d(h, w, b):
        y = lax.conv_general_dilated(h, w, window_strides=(1,), padding="VALID",
                                     dimension_numbers=("NCH", "OIH", "NCH"))
        return y + b[None, :, None]

    def maxpool2(h):
        Lp = h.shape[-1] // 2
        return jnp.max(h[..., :2 * Lp].reshape(h.shape[0], h.shape[1], Lp, 2), axis=-1)

    h = maxpool2(jax.nn.relu(conv1d(x, p["conv1_w"], p["conv1_b"])))
    h = maxpool2(jax.nn.relu(conv1d(h, p["conv2_w"], p["conv2_b"])))
    h = h.reshape(h.shape[0], -1)
    h = jax.nn.relu(h @ p["fc1_w"].T + p["fc1_b"])
    h = jax.nn.relu(h @ p["fc2_w"].T + p["fc2_b"])
    return h @ p["fc3_w"].T + p["fc3_b"]


if __name__ == "__main__":
    key = jax.random.PRNGKey(0)
    pkey, xkey = jax.random.split(key)
    params = init_params(pkey, LATENT_DIM)
    prep = prepare_params(params)                 # one-time weight re-layout
    x = jax.random.normal(xkey, (B, C_IN, L_IN), jnp.float32)

    fwd = jax.jit(motion_encoder_forward)
    out = jax.block_until_ready(fwd(x, prep))
    assert out.shape == (B, LATENT_DIM)

    ref = reference_forward(x, params)
    np.testing.assert_allclose(np.asarray(out), np.asarray(ref), rtol=2e-3, atol=2e-3)

    print("KERNEL_OK")
</pallas_src>

<mosaic_0001>
module attributes {stable_mosaic.version = 11 : i64} {
  func.func @_encoder_kernel(%arg0: memref<2x88x12xf32, #tpu.memory_space<vmem>>, %arg1: memref<60x64xf32, #tpu.memory_space<vmem>>, %arg2: memref<1x64xf32, #tpu.memory_space<vmem>>, %arg3: memref<320x64xf32, #tpu.memory_space<vmem>>, %arg4: memref<1x64xf32, #tpu.memory_space<vmem>>, %arg5: memref<1216x256xf32, #tpu.memory_space<any>>, %arg6: memref<1x256xf32, #tpu.memory_space<vmem>>, %arg7: memref<256x256xf32, #tpu.memory_space<any>>, %arg8: memref<1x256xf32, #tpu.memory_space<vmem>>, %arg9: memref<256x16xf32, #tpu.memory_space<vmem>>, %arg10: memref<1x16xf32, #tpu.memory_space<vmem>>, %arg11: memref<2x16xf32, #tpu.memory_space<vmem>>, %arg12: memref<1216x256xf32, #tpu.memory_space<vmem>>, %arg13: memref<256x256xf32, #tpu.memory_space<vmem>>, %arg14: memref<2x!tpu.dma_semaphore, #tpu.memory_space<semaphore_mem>>, %arg15: memref<168x60xf32, #tpu.memory_space<vmem>>, %arg16: memref<168x64xf32, #tpu.memory_space<vmem>>, %arg17: memref<76x320xf32, #tpu.memory_space<vmem>>, %arg18: memref<76x64xf32, #tpu.memory_space<vmem>>, %arg19: memref<2x1216xf32, #tpu.memory_space<vmem>>) attributes {dimension_semantics = [], scalar_prefetch = 0 : i64, scratch_operands = 8 : i64, tpu.core_type = #tpu.core_type<tc>} {
    %c0_i32 = arith.constant 0 : i32
    %0 = tpu.memref_slice %arg14[%c0_i32] : memref<2x!tpu.dma_semaphore, #tpu.memory_space<semaphore_mem>> -> memref<1x!tpu.dma_semaphore, #tpu.memory_space<semaphore_mem>>
    %1 = tpu.memref_squeeze %0 : memref<1x!tpu.dma_semaphore, #tpu.memory_space<semaphore_mem>> -> memref<!tpu.dma_semaphore, #tpu.memory_space<semaphore_mem>>
    tpu.enqueue_dma source(%arg5 : memref<1216x256xf32, #tpu.memory_space<any>>) target(%arg12 : memref<1216x256xf32, #tpu.memory_space<vmem>>) target_semaphore(%1 : memref<!tpu.dma_semaphore, #tpu.memory_space<semaphore_mem>>)
    %c1_i32 = arith.constant 1 : i32
    %2 = tpu.memref_slice %arg14[%c1_i32] : memref<2x!tpu.dma_semaphore, #tpu.memory_space<semaphore_mem>> -> memref<1x!tpu.dma_semaphore, #tpu.memory_space<semaphore_mem>>
    %3 = tpu.memref_squeeze %2 : memref<1x!tpu.dma_semaphore, #tpu.memory_space<semaphore_mem>> -> memref<!tpu.dma_semaphore, #tpu.memory_space<semaphore_mem>>
    tpu.enqueue_dma source(%arg7 : memref<256x256xf32, #tpu.memory_space<any>>) target(%arg13 : memref<256x256xf32, #tpu.memory_space<vmem>>) target_semaphore(%3 : memref<!tpu.dma_semaphore, #tpu.memory_space<semaphore_mem>>)
    %c0 = arith.constant 0 : index
    %c0_0 = arith.constant 0 : index
    %c0_1 = arith.constant 0 : index
    %4 = vector.load %arg0[%c0, %c0_0, %c0_1] : memref<2x88x12xf32, #tpu.memory_space<vmem>>, vector<1x88x12xf32>
    %5 = vector.shape_cast %4 : vector<1x88x12xf32> to vector<88x12xf32>
    %6 = vector.extract_strided_slice %5 {offsets = [0, 0], sizes = [84, 12], strides = [1, 1]} : vector<88x12xf32> to vector<84x12xf32>
    %c0_2 = arith.constant 0 : index
    %c0_3 = arith.constant 0 : index
    %7 = vector.load %arg15[%c0_2, %c0_3] : memref<168x60xf32, #tpu.memory_space<vmem>>, vector<84x12xf32>
    tpu.vector_store %arg15[%c0_2, %c0_3], %6 {strides = array<i32>} : memref<168x60xf32, #tpu.memory_space<vmem>>, vector<84x12xf32>,
    %8 = vector.extract_strided_slice %5 {offsets = [1, 0], sizes = [84, 12], strides = [1, 1]} : vector<88x12xf32> to vector<84x12xf32>
    %c0_4 = arith.constant 0 : index
    %c12 = arith.constant 12 : index
    %9 = vector.load %arg15[%c0_4, %c12] : memref<168x60xf32, #tpu.memory_space<vmem>>, vector<84x12xf32>
    tpu.vector_store %arg15[%c0_4, %c12], %8 {strides = array<i32>} : memref<168x60xf32, #tpu.memory_space<vmem>>, vector<84x12xf32>,
    %10 = vector.extract_strided_slice %5 {offsets = [2, 0], sizes = [84, 12], strides = [1, 1]} : vector<88x12xf32> to vector<84x12xf32>
    %c0_5 = arith.constant 0 : index
    %c24 = arith.constant 24 : index
    %11 = vector.load %arg15[%c0_5, %c24] : memref<168x60xf32, #tpu.memory_space<vmem>>, vector<84x12xf32>
    tpu.vector_store %arg15[%c0_5, %c24], %10 {strides = array<i32>} : memref<168x60xf32, #tpu.memory_space<vmem>>, vector<84x12xf32>,
    %12 = vector.extract_strided_slice %5 {offsets = [3, 0], sizes = [84, 12], strides = [1, 1]} : vector<88x12xf32> to vector<84x12xf32>
    %c0_6 = arith.constant 0 : index
    %c36 = arith.constant 36 : index
    %13 = vector.load %arg15[%c0_6, %c36] : memref<168x60xf32, #tpu.memory_space<vmem>>, vector<84x12xf32>
    tpu.vector_store %arg15[%c0_6, %c36], %12 {strides = array<i32>} : memref<168x60xf32, #tpu.memory_space<vmem>>, vector<84x12xf32>,
    %14 = vector.extract_strided_slice %5 {offsets = [4, 0], sizes = [84, 12], strides = [1, 1]} : vector<88x12xf32> to vector<84x12xf32>
    %c0_7 = arith.constant 0 : index
    %c48 = arith.constant 48 : index
    %15 = vector.load %arg15[%c0_7, %c48] : memref<168x60xf32, #tpu.memory_space<vmem>>, vector<84x12xf32>
    tpu.vector_store %arg15[%c0_7, %c48], %14 {strides = array<i32>} : memref<168x60xf32, #tpu.memory_space<vmem>>, vector<84x12xf32>,
    %c1 = arith.constant 1 : index
    %c0_8 = arith.constant 0 : index
    %c0_9 = arith.constant 0 : index
    %16 = vector.load %arg0[%c1, %c0_8, %c0_9] : memref<2x88x12xf32, #tpu.memory_space<vmem>>, vector<1x88x12xf32>
    %17 = vector.shape_cast %16 : vector<1x88x12xf32> to vector<88x12xf32>
    %18 = vector.extract_strided_slice %17 {offsets = [0, 0], sizes = [84, 12], strides = [1, 1]} : vector<88x12xf32> to vector<84x12xf32>
    %c84 = arith.constant 84 : index
    %c0_10 = arith.constant 0 : index
    %19 = vector.load %arg15[%c84, %c0_10] : memref<168x60xf32, #tpu.memory_space<vmem>>, vector<84x12xf32>
    tpu.vector_store %arg15[%c84, %c0_10], %18 {strides = array<i32>} : memref<168x60xf32, #tpu.memory_space<vmem>>, vector<84x12xf32>,
    %20 = vector.extract_strided_slice %17 {offsets = [1, 0], sizes = [84, 12], strides = [1, 1]} : vector<88x12xf32> to vector<84x12xf32>
    %c84_11 = arith.constant 84 : index
    %c12_12 = arith.constant 12 : index
    %21 = vector.load %arg15[%c84_11, %c12_12] : memref<168x60xf32, #tpu.memory_space<vmem>>, vector<84x12xf32>
    tpu.vector_store %arg15[%c84_11, %c12_12], %20 {strides = array<i32>} : memref<168x60xf32, #tpu.memory_space<vmem>>, vector<84x12xf32>,
    %22 = vector.extract_strided_slice %17 {offsets = [2, 0], sizes = [84, 12], strides = [1, 1]} : vector<88x12xf32> to vector<84x12xf32>
    %c84_13 = arith.constant 84 : index
    %c24_14 = arith.constant 24 : index
    %23 = vector.load %arg15[%c84_13, %c24_14] : memref<168x60xf32, #tpu.memory_space<vmem>>, vector<84x12xf32>
    tpu.vector_store %arg15[%c84_13, %c24_14], %22 {strides = array<i32>} : memref<168x60xf32, #tpu.memory_space<vmem>>, vector<84x12xf32>,
    %24 = vector.extract_strided_slice %17 {offsets = [3, 0], sizes = [84, 12], strides = [1, 1]} : vector<88x12xf32> to vector<84x12xf32>
    %c84_15 = arith.constant 84 : index
    %c36_16 = arith.constant 36 : index
    %25 = vector.load %arg15[%c84_15, %c36_16] : memref<168x60xf32, #tpu.memory_space<vmem>>, vector<84x12xf32>
    tpu.vector_store %arg15[%c84_15, %c36_16], %24 {strides = array<i32>} : memref<168x60xf32, #tpu.memory_space<vmem>>, vector<84x12xf32>,
    %26 = vector.extract_strided_slice %17 {offsets = [4, 0], sizes = [84, 12], strides = [1, 1]} : vector<88x12xf32> to vector<84x12xf32>
    %c84_17 = arith.constant 84 : index
    %c48_18 = arith.constant 48 : index
    %27 = vector.load %arg15[%c84_17, %c48_18] : memref<168x60xf32, #tpu.memory_space<vmem>>, vector<84x12xf32>
    tpu.vector_store %arg15[%c84_17, %c48_18], %26 {strides = array<i32>} : memref<168x60xf32, #tpu.memory_space<vmem>>, vector<84x12xf32>,
    %c0_19 = arith.constant 0 : index
    %c0_20 = arith.constant 0 : index
    %28 = vector.load %arg15[%c0_19, %c0_20] : memref<168x60xf32, #tpu.memory_space<vmem>>, vector<168x60xf32>
    %c0_21 = arith.constant 0 : index
    %c0_22 = arith.constant 0 : index
    %29 = vector.load %arg1[%c0_21, %c0_22] : memref<60x64xf32, #tpu.memory_space<vmem>>, vector<60x64xf32>
    %cst = arith.constant dense<0.000000e+00> : vector<168x64xf32>
    %30 = tpu.matmul %28, %29, %cst {dimension_numbers = #tpu.dot_dimension_numbers<[1], [0], [0], [1], [0, 0, 1, 1], [], []>} : vector<168x60xf32>, vector<60x64xf32>, vector<168x64xf32> -> vector<168x64xf32>
    %c0_23 = arith.constant 0 : index
    %c0_24 = arith.constant 0 : index
    %31 = vector.load %arg2[%c0_23, %c0_24] : memref<1x64xf32, #tpu.memory_space<vmem>>, vector<1x64xf32>
    %32 = vector.broadcast %31 : vector<1x64xf32> to vector<168x64xf32>
    %33 = arith.addf %30, %32 : vector<168x64xf32>
    %cst_25 = arith.constant 0.000000e+00 : f32
    %34 = vector.broadcast %cst_25 : f32 to vector<168x64xf32>
    %35 = arith.maximumf %33, %34 : vector<168x64xf32>
    %c0_26 = arith.constant 0 : index
    %c0_27 = arith.constant 0 : index
    %36 = vector.load %arg16[%c0_26, %c0_27] : memref<168x64xf32, #tpu.memory_space<vmem>>, vector<168x64xf32>
    tpu.vector_store %arg16[%c0_26, %c0_27], %35 {strides = array<i32>} : memref<168x64xf32, #tpu.memory_space<vmem>>, vector<168x64xf32>,
    %c0_28 = arith.constant 0 : index
    %c0_29 = arith.constant 0 : index
    %37 = tpu.strided_load %arg16[%c0_28, %c0_29] {strides = array<i32: 2, 1>} : memref<168x64xf32, #tpu.memory_space<vmem>>, vector<84x64xf32>
    %c1_30 = arith.constant 1 : index
    %c0_31 = arith.constant 0 : index
    %38 = tpu.strided_load %arg16[%c1_30, %c0_31] {strides = array<i32: 2, 1>} : memref<168x64xf32, #tpu.memory_space<vmem>>, vector<84x64xf32>
    %39 = arith.maximumf %37, %38 : vector<84x64xf32>
    %40 = vector.extract_strided_slice %39 {offsets = [0, 0], sizes = [38, 64], strides = [1, 1]} : vector<84x64xf32> to vector<38x64xf32>
    %c0_32 = arith.constant 0 : index
    %c0_33 = arith.constant 0 : index
    %41 = vector.load %arg17[%c0_32, %c0_33] : memref<76x320xf32, #tpu.memory_space<vmem>>, vector<38x64xf32>
    tpu.vector_store %arg17[%c0_32, %c0_33], %40 {strides = array<i32>} : memref<76x320xf32, #tpu.memory_space<vmem>>, vector<38x64xf32>,
    %42 = vector.extract_strided_slice %39 {offsets = [1, 0], sizes = [38, 64], strides = [1, 1]} : vector<84x64xf32> to vector<38x64xf32>
    %c0_34 = arith.constant 0 : index
    %c64 = arith.constant 64 : index
    %43 = vector.load %arg17[%c0_34, %c64] : memref<76x320xf32, #tpu.memory_space<vmem>>, vector<38x64xf32>
    tpu.vector_store %arg17[%c0_34, %c64], %42 {strides = array<i32>} : memref<76x320xf32, #tpu.memory_space<vmem>>, vector<38x64xf32>,
    %44 = vector.extract_strided_slice %39 {offsets = [2, 0], sizes = [38, 64], strides = [1, 1]} : vector<84x64xf32> to vector<38x64xf32>
    %c0_35 = arith.constant 0 : index
    %c128 = arith.constant 128 : index
    %45 = vector.load %arg17[%c0_35, %c128] : memref<76x320xf32, #tpu.memory_space<vmem>>, vector<38x64xf32>
    tpu.vector_store %arg17[%c0_35, %c128], %44 {strides = array<i32>} : memref<76x320xf32, #tpu.memory_space<vmem>>, vector<38x64xf32>,
    %46 = vector.extract_strided_slice %39 {offsets = [3, 0], sizes = [38, 64], strides = [1, 1]} : vector<84x64xf32> to vector<38x64xf32>
    %c0_36 = arith.constant 0 : index
    %c192 = arith.constant 192 : index
    %47 = vector.load %arg17[%c0_36, %c192] : memref<76x320xf32, #tpu.memory_space<vmem>>, vector<38x64xf32>
    tpu.vector_store %arg17[%c0_36, %c192], %46 {strides = array<i32>} : memref<76x320xf32, #tpu.memory_space<vmem>>, vector<38x64xf32>,
    %48 = vector.extract_strided_slice %39 {offsets = [4, 0], sizes = [38, 64], strides = [1, 1]} : vector<84x64xf32> to vector<38x64xf32>
    %c0_37 = arith.constant 0 : index
    %c256 = arith.constant 256 : index
    %49 = vector.load %arg17[%c0_37, %c256] : memref<76x320xf32, #tpu.memory_space<vmem>>, vector<38x64xf32>
    tpu.vector_store %arg17[%c0_37, %c256], %48 {strides = array<i32>} : memref<76x320xf32, #tpu.memory_space<vmem>>, vector<38x64xf32>,
    %50 = vector.extract_strided_slice %39 {offsets = [42, 0], sizes = [38, 64], strides = [1, 1]} : vector<84x64xf32> to vector<38x64xf32>
    %c38 = arith.constant 38 : index
    %c0_38 = arith.constant 0 : index
    %51 = vector.load %arg17[%c38, %c0_38] : memref<76x320xf32, #tpu.memory_space<vmem>>, vector<38x64xf32>
    tpu.vector_store %arg17[%c38, %c0_38], %50 {strides = array<i32>} : memref<76x320xf32, #tpu.memory_space<vmem>>, vector<38x64xf32>,
    %52 = vector.extract_strided_slice %39 {offsets = [43, 0], sizes = [38, 64], strides = [1, 1]} : vector<84x64xf32> to vector<38x64xf32>
    %c38_39 = arith.constant 38 : index
    %c64_40 = arith.constant 64 : index
    %53 = vector.load %arg17[%c38_39, %c64_40] : memref<76x320xf32, #tpu.memory_space<vmem>>, vector<38x64xf32>
    tpu.vector_store %arg17[%c38_39, %c64_40], %52 {strides = array<i32>} : memref<76x320xf32, #tpu.memory_space<vmem>>, vector<38x64xf32>,
    %54 = vector.extract_strided_slice %39 {offsets = [44, 0], sizes = [38, 64], strides = [1, 1]} : vector<84x64xf32> to vector<38x64xf32>
    %c38_41 = arith.constant 38 : index
    %c128_42 = arith.constant 128 : index
    %55 = vector.load %arg17[%c38_41, %c128_42] : memref<76x320xf32, #tpu.memory_space<vmem>>, vector<38x64xf32>
    tpu.vector_store %arg17[%c38_41, %c128_42], %54 {strides = array<i32>} : memref<76x320xf32, #tpu.memory_space<vmem>>, vector<38x64xf32>,
    %56 = vector.extract_strided_slice %39 {offsets = [45, 0], sizes = [38, 64], strides = [1, 1]} : vector<84x64xf32> to vector<38x64xf32>
    %c38_43 = arith.constant 38 : index
    %c192_44 = arith.constant 192 : index
    %57 = vector.load %arg17[%c38_43, %c192_44] : memref<76x320xf32, #tpu.memory_space<vmem>>, vector<38x64xf32>
    tpu.vector_store %arg17[%c38_43, %c192_44], %56 {strides = array<i32>} : memref<76x320xf32, #tpu.memory_space<vmem>>, vector<38x64xf32>,
    %58 = vector.extract_strided_slice %39 {offsets = [46, 0], sizes = [38, 64], strides = [1, 1]} : vector<84x64xf32> to vector<38x64xf32>
    %c38_45 = arith.constant 38 : index
    %c256_46 = arith.constant 256 : index
    %59 = vector.load %arg17[%c38_45, %c256_46] : memref<76x320xf32, #tpu.memory_space<vmem>>, vector<38x64xf32>
    tpu.vector_store %arg17[%c38_45, %c256_46], %58 {strides = array<i32>} : memref<76x320xf32, #tpu.memory_space<vmem>>, vector<38x64xf32>,
    %c0_47 = arith.constant 0 : index
    %c0_48 = arith.constant 0 : index
    %60 = vector.load %arg17[%c0_47, %c0_48] : memref<76x320xf32, #tpu.memory_space<vmem>>, vector<76x320xf32>
    %c0_49 = arith.constant 0 : index
    %c0_50 = arith.constant 0 : index
    %61 = vector.load %arg3[%c0_49, %c0_50] : memref<320x64xf32, #tpu.memory_space<vmem>>, vector<320x64xf32>
    %cst_51 = arith.constant dense<0.000000e+00> : vector<76x64xf32>
    %62 = tpu.matmul %60, %61, %cst_51 {dimension_numbers = #tpu.dot_dimension_numbers<[1], [0], [0], [1], [0, 0, 1, 1], [], []>} : vector<76x320xf32>, vector<320x64xf32>, vector<76x64xf32> -> vector<76x64xf32>
    %c0_52 = arith.constant 0 : index
    %c0_53 = arith.constant 0 : index
    %63 = vector.load %arg4[%c0_52, %c0_53] : memref<1x64xf32, #tpu.memory_space<vmem>>, vector<1x64xf32>
    %64 = vector.broadcast %63 : vector<1x64xf32> to vector<76x64xf32>
    %65 = arith.addf %62, %64 : vector<76x64xf32>
    %cst_54 = arith.constant 0.000000e+00 : f32
    %66 = vector.broadcast %cst_54 : f32 to vector<76x64xf32>
    %67 = arith.maximumf %65, %66 : vector<76x64xf32>
    %c0_55 = arith.constant 0 : index
    %c0_56 = arith.constant 0 : index
    %68 = vector.load %arg18[%c0_55, %c0_56] : memref<76x64xf32, #tpu.memory_space<vmem>>, vector<76x64xf32>
    tpu.vector_store %arg18[%c0_55, %c0_56], %67 {strides = array<i32>} : memref<76x64xf32, #tpu.memory_space<vmem>>, vector<76x64xf32>,
    %c0_57 = arith.constant 0 : index
    %c0_58 = arith.constant 0 : index
    %69 = tpu.strided_load %arg18[%c0_57, %c0_58] {strides = array<i32: 2, 1>} : memref<76x64xf32, #tpu.memory_space<vmem>>, vector<38x64xf32>
    %c1_59 = arith.constant 1 : index
    %c0_60 = arith.constant 0 : index
    %70 = tpu.strided_load %arg18[%c1_59, %c0_60] {strides = array<i32: 2, 1>} : memref<76x64xf32, #tpu.memory_space<vmem>>, vector<38x64xf32>
    %71 = arith.maximumf %69, %70 : vector<38x64xf32>
    %72 = vector.extract_strided_slice %71 {offsets = [0, 0], sizes = [1, 64], strides = [1, 1]} : vector<38x64xf32> to vector<1x64xf32>
    %73 = vector.extract_strided_slice %71 {offsets = [19, 0], sizes = [1, 64], strides = [1, 1]} : vector<38x64xf32> to vector<1x64xf32>
    %74 = tpu.concatenate %72, %73 in 0 : vector<1x64xf32>, vector<1x64xf32> -> vector<2x64xf32>
    %c0_61 = arith.constant 0 : index
    %c0_62 = arith.constant 0 : index
    %75 = vector.load %arg19[%c0_61, %c0_62] : memref<2x1216xf32, #tpu.memory_space<vmem>>, vector<2x64xf32>
    tpu.vector_store %arg19[%c0_61, %c0_62], %74 {strides = array<i32>} : memref<2x1216xf32, #tpu.memory_space<vmem>>, vector<2x64xf32>,
    %76 = vector.extract_strided_slice %71 {offsets = [1, 0], sizes = [1, 64], strides = [1, 1]} : vector<38x64xf32> to vector<1x64xf32>
    %77 = vector.extract_strided_slice %71 {offsets = [20, 0], sizes = [1, 64], strides = [1, 1]} : vector<38x64xf32> to vector<1x64xf32>
    %78 = tpu.concatenate %76, %77 in 0 : vector<1x64xf32>, vector<1x64xf32> -> vector<2x64xf32>
    %c0_63 = arith.constant 0 : index
    %c64_64 = arith.constant 64 : index
    %79 = vector.load %arg19[%c0_63, %c64_64] : memref<2x1216xf32, #tpu.memory_space<vmem>>, vector<2x64xf32>
    tpu.vector_store %arg19[%c0_63, %c64_64], %78 {strides = array<i32>} : memref<2x1216xf32, #tpu.memory_space<vmem>>, vector<2x64xf32>,
    %80 = vector.extract_strided_slice %71 {offsets = [2, 0], sizes = [1, 64], strides = [1, 1]} : vector<38x64xf32> to vector<1x64xf32>
    %81 = vector.extract_strided_slice %71 {offsets = [21, 0], sizes = [1, 64], strides = [1, 1]} : vector<38x64xf32> to vector<1x64xf32>
    %82 = tpu.concatenate %80, %81 in 0 : vector<1x64xf32>, vector<1x64xf32> -> vector<2x64xf32>
    %c0_65 = arith.constant 0 : index
    %c128_66 = arith.constant 128 : index
    %83 = vector.load %arg19[%c0_65, %c128_66] : memref<2x1216xf32, #tpu.memory_space<vmem>>, vector<2x64xf32>
    tpu.vector_store %arg19[%c0_65, %c128_66], %82 {strides = array<i32>} : memref<2x1216xf32, #tpu.memory_space<vmem>>, vector<2x64xf32>,
    %84 = vector.extract_strided_slice %71 {offsets = [3, 0], sizes = [1, 64], strides = [1, 1]} : vector<38x64xf32> to vector<1x64xf32>
    %85 = vector.extract_strided_slice %71 {offsets = [22, 0], sizes = [1, 64], strides = [1, 1]} : vector<38x64xf32> to vector<1x64xf32>
    %86 = tpu.concatenate %84, %85 in 0 : vector<1x64xf32>, vector<1x64xf32> -> vector<2x64xf32>
    %c0_67 = arith.constant 0 : index
    %c192_68 = arith.constant 192 : index
    %87 = vector.load %arg19[%c0_67, %c192_68] : memref<2x1216xf32, #tpu.memory_space<vmem>>, vector<2x64xf32>
    tpu.vector_store %arg19[%c0_67, %c192_68], %86 {strides = array<i32>} : memref<2x1216xf32, #tpu.memory_space<vmem>>, vector<2x64xf32>,
    %88 = vector.extract_strided_slice %71 {offsets = [4, 0], sizes = [1, 64], strides = [1, 1]} : vector<38x64xf32> to vector<1x64xf32>
    %89 = vector.extract_strided_slice %71 {offsets = [23, 0], sizes = [1, 64], strides = [1, 1]} : vector<38x64xf32> to vector<1x64xf32>
    %90 = tpu.concatenate %88, %89 in 0 : vector<1x64xf32>, vector<1x64xf32> -> vector<2x64xf32>
    %c0_69 = arith.constant 0 : index
    %c256_70 = arith.constant 256 : index
    %91 = vector.load %arg19[%c0_69, %c256_70] : memref<2x1216xf32, #tpu.memory_space<vmem>>, vector<2x64xf32>
    tpu.vector_store %arg19[%c0_69, %c256_70], %90 {strides = array<i32>} : memref<2x1216xf32, #tpu.memory_space<vmem>>, vector<2x64xf32>,
    %92 = vector.extract_strided_slice %71 {offsets = [5, 0], sizes = [1, 64], strides = [1, 1]} : vector<38x64xf32> to vector<1x64xf32>
    %93 = vector.extract_strided_slice %71 {offsets = [24, 0], sizes = [1, 64], strides = [1, 1]} : vector<38x64xf32> to vector<1x64xf32>
    %94 = tpu.concatenate %92, %93 in 0 : vector<1x64xf32>, vector<1x64xf32> -> vector<2x64xf32>
    %c0_71 = arith.constant 0 : index
    %c320 = arith.constant 320 : index
    %95 = vector.load %arg19[%c0_71, %c320] : memref<2x1216xf32, #tpu.memory_space<vmem>>, vector<2x64xf32>
    tpu.vector_store %arg19[%c0_71, %c320], %94 {strides = array<i32>} : memref<2x1216xf32, #tpu.memory_space<vmem>>, vector<2x64xf32>,
    %96 = vector.extract_strided_slice %71 {offsets = [6, 0], sizes = [1, 64], strides = [1, 1]} : vector<38x64xf32> to vector<1x64xf32>
    %97 = vector.extract_strided_slice %71 {offsets = [25, 0], sizes = [1, 64], strides = [1, 1]} : vector<38x64xf32> to vector<1x64xf32>
    %98 = tpu.concatenate %96, %97 in 0 : vector<1x64xf32>, vector<1x64xf32> -> vector<2x64xf32>
    %c0_72 = arith.constant 0 : index
    %c384 = arith.constant 384 : index
    %99 = vector.load %arg19[%c0_72, %c384] : memref<2x1216xf32, #tpu.memory_space<vmem>>, vector<2x64xf32>
    tpu.vector_store %arg19[%c0_72, %c384], %98 {strides = array<i32>} : memref<2x1216xf32, #tpu.memory_space<vmem>>, vector<2x64xf32>,
    %100 = vector.extract_strided_slice %71 {offsets = [7, 0], sizes = [1, 64], strides = [1, 1]} : vector<38x64xf32> to vector<1x64xf32>
    %101 = vector.extract_strided_slice %71 {offsets = [26, 0], sizes = [1, 64], strides = [1, 1]} : vector<38x64xf32> to vector<1x64xf32>
    %102 = tpu.concatenate %100, %101 in 0 : vector<1x64xf32>, vector<1x64xf32> -> vector<2x64xf32>
    %c0_73 = arith.constant 0 : index
    %c448 = arith.constant 448 : index
    %103 = vector.load %arg19[%c0_73, %c448] : memref<2x1216xf32, #tpu.memory_space<vmem>>, vector<2x64xf32>
    tpu.vector_store %arg19[%c0_73, %c448], %102 {strides = array<i32>} : memref<2x1216xf32, #tpu.memory_space<vmem>>, vector<2x64xf32>,
    %104 = vector.extract_strided_slice %71 {offsets = [8, 0], sizes = [1, 64], strides = [1, 1]} : vector<38x64xf32> to vector<1x64xf32>
    %105 = vector.extract_strided_slice %71 {offsets = [27, 0], sizes = [1, 64], strides = [1, 1]} : vector<38x64xf32> to vector<1x64xf32>
    %106 = tpu.concatenate %104, %105 in 0 : vector<1x64xf32>, vector<1x64xf32> -> vector<2x64xf32>
    %c0_74 = arith.constant 0 : index
    %c512 = arith.constant 512 : index
    %107 = vector.load %arg19[%c0_74, %c512] : memref<2x1216xf32, #tpu.memory_space<vmem>>, vector<2x64xf32>
    tpu.vector_store %arg19[%c0_74, %c512], %106 {strides = array<i32>} : memref<2x1216xf32, #tpu.memory_space<vmem>>, vector<2x64xf32>,
    %108 = vector.extract_strided_slice %71 {offsets = [9, 0], sizes = [1, 64], strides = [1, 1]} : vector<38x64xf32> to vector<1x64xf32>
    %109 = vector.extract_strided_slice %71 {offsets = [28, 0], sizes = [1, 64], strides = [1, 1]} : vector<38x64xf32> to vector<1x64xf32>
    %110 = tpu.concatenate %108, %109 in 0 : vector<1x64xf32>, vector<1x64xf32> -> vector<2x64xf32>
    %c0_75 = arith.constant 0 : index
    %c576 = arith.constant 576 : index
    %111 = vector.load %arg19[%c0_75, %c576] : memref<2x1216xf32, #tpu.memory_space<vmem>>, vector<2x64xf32>
    tpu.vector_store %arg19[%c0_75, %c576], %110 {strides = array<i32>} : memref<2x1216xf32, #tpu.memory_space<vmem>>, vector<2x64xf32>,
    %112 = vector.extract_strided_slice %71 {offsets = [10, 0], sizes = [1, 64], strides = [1, 1]} : vector<38x64xf32> to vector<1x64xf32>
    %113 = vector.extract_strided_slice %71 {offsets = [29, 0], sizes = [1, 64], strides = [1, 1]} : vector<38x64xf32> to vector<1x64xf32>
    %114 = tpu.concatenate %112, %113 in 0 : vector<1x64xf32>, vector<1x64xf32> -> vector<2x64xf32>
    %c0_76 = arith.constant 0 : index
    %c640 = arith.constant 640 : index
    %115 = vector.load %arg19[%c0_76, %c640] : memref<2x1216xf32, #tpu.memory_space<vmem>>, vector<2x64xf32>
    tpu.vector_store %arg19[%c0_76, %c640], %114 {strides = array<i32>} : memref<2x1216xf32, #tpu.memory_space<vmem>>, vector<2x64xf32>,
    %116 = vector.extract_strided_slice %71 {offsets = [11, 0], sizes = [1, 64], strides = [1, 1]} : vector<38x64xf32> to vector<1x64xf32>
    %117 = vector.extract_strided_slice %71 {offsets = [30, 0], sizes = [1, 64], strides = [1, 1]} : vector<38x64xf32> to vector<1x64xf32>
    %118 = tpu.concatenate %116, %117 in 0 : vector<1x64xf32>, vector<1x64xf32> -> vector<2x64xf32>
    %c0_77 = arith.constant 0 : index
    %c704 = arith.constant 704 : index
    %119 = vector.load %arg19[%c0_77, %c704] : memref<2x1216xf32, #tpu.memory_space<vmem>>, vector<2x64xf32>
    tpu.vector_store %arg19[%c0_77, %c704], %118 {strides = array<i32>} : memref<2x1216xf32, #tpu.memory_space<vmem>>, vector<2x64xf32>,
    %120 = vector.extract_strided_slice %71 {offsets = [12, 0], sizes = [1, 64], strides = [1, 1]} : vector<38x64xf32> to vector<1x64xf32>
    %121 = vector.extract_strided_slice %71 {offsets = [31, 0], sizes = [1, 64], strides = [1, 1]} : vector<38x64xf32> to vector<1x64xf32>
    %122 = tpu.concatenate %120, %121 in 0 : vector<1x64xf32>, vector<1x64xf32> -> vector<2x64xf32>
    %c0_78 = arith.constant 0 : index
    %c768 = arith.constant 768 : index
    %123 = vector.load %arg19[%c0_78, %c768] : memref<2x1216xf32, #tpu.memory_space<vmem>>, vector<2x64xf32>
    tpu.vector_store %arg19[%c0_78, %c768], %122 {strides = array<i32>} : memref<2x1216xf32, #tpu.memory_space<vmem>>, vector<2x64xf32>,
    %124 = vector.extract_strided_slice %71 {offsets = [13, 0], sizes = [1, 64], strides = [1, 1]} : vector<38x64xf32> to vector<1x64xf32>
    %125 = vector.extract_strided_slice %71 {offsets = [32, 0], sizes = [1, 64], strides = [1, 1]} : vector<38x64xf32> to vector<1x64xf32>
    %126 = tpu.concatenate %124, %125 in 0 : vector<1x64xf32>, vector<1x64xf32> -> vector<2x64xf32>
    %c0_79 = arith.constant 0 : index
    %c832 = arith.constant 832 : index
    %127 = vector.load %arg19[%c0_79, %c832] : memref<2x1216xf32, #tpu.memory_space<vmem>>, vector<2x64xf32>
    tpu.vector_store %arg19[%c0_79, %c832], %126 {strides = array<i32>} : memref<2x1216xf32, #tpu.memory_space<vmem>>, vector<2x64xf32>,
    %128 = vector.extract_strided_slice %71 {offsets = [14, 0], sizes = [1, 64], strides = [1, 1]} : vector<38x64xf32> to vector<1x64xf32>
    %129 = vector.extract_strided_slice %71 {offsets = [33, 0], sizes = [1, 64], strides = [1, 1]} : vector<38x64xf32> to vector<1x64xf32>
    %130 = tpu.concatenate %128, %129 in 0 : vector<1x64xf32>, vector<1x64xf32> -> vector<2x64xf32>
    %c0_80 = arith.constant 0 : index
    %c896 = arith.constant 896 : index
    %131 = vector.load %arg19[%c0_80, %c896] : memref<2x1216xf32, #tpu.memory_space<vmem>>, vector<2x64xf32>
    tpu.vector_store %arg19[%c0_80, %c896], %130 {strides = array<i32>} : memref<2x1216xf32, #tpu.memory_space<vmem>>, vector<2x64xf32>,
    %132 = vector.extract_strided_slice %71 {offsets = [15, 0], sizes = [1, 64], strides = [1, 1]} : vector<38x64xf32> to vector<1x64xf32>
    %133 = vector.extract_strided_slice %71 {offsets = [34, 0], sizes = [1, 64], strides = [1, 1]} : vector<38x64xf32> to vector<1x64xf32>
    %134 = tpu.concatenate %132, %133 in 0 : vector<1x64xf32>, vector<1x64xf32> -> vector<2x64xf32>
    %c0_81 = arith.constant 0 : index
    %c960 = arith.constant 960 : index
    %135 = vector.load %arg19[%c0_81, %c960] : memref<2x1216xf32, #tpu.memory_space<vmem>>, vector<2x64xf32>
    tpu.vector_store %arg19[%c0_81, %c960], %134 {strides = array<i32>} : memref<2x1216xf32, #tpu.memory_space<vmem>>, vector<2x64xf32>,
    %136 = vector.extract_strided_slice %71 {offsets = [16, 0], sizes = [1, 64], strides = [1, 1]} : vector<38x64xf32> to vector<1x64xf32>
    %137 = vector.extract_strided_slice %71 {offsets = [35, 0], sizes = [1, 64], strides = [1, 1]} : vector<38x64xf32> to vector<1x64xf32>
    %138 = tpu.concatenate %136, %137 in 0 : vector<1x64xf32>, vector<1x64xf32> -> vector<2x64xf32>
    %c0_82 = arith.constant 0 : index
    %c1024 = arith.constant 1024 : index
    %139 = vector.load %arg19[%c0_82, %c1024] : memref<2x1216xf32, #tpu.memory_space<vmem>>, vector<2x64xf32>
    tpu.vector_store %arg19[%c0_82, %c1024], %138 {strides = array<i32>} : memref<2x1216xf32, #tpu.memory_space<vmem>>, vector<2x64xf32>,
    %140 = vector.extract_strided_slice %71 {offsets = [17, 0], sizes = [1, 64], strides = [1, 1]} : vector<38x64xf32> to vector<1x64xf32>
    %141 = vector.extract_strided_slice %71 {offsets = [36, 0], sizes = [1, 64], strides = [1, 1]} : vector<38x64xf32> to vector<1x64xf32>
    %142 = tpu.concatenate %140, %141 in 0 : vector<1x64xf32>, vector<1x64xf32> -> vector<2x64xf32>
    %c0_83 = arith.constant 0 : index
    %c1088 = arith.constant 1088 : index
    %143 = vector.load %arg19[%c0_83, %c1088] : memref<2x1216xf32, #tpu.memory_space<vmem>>, vector<2x64xf32>
    tpu.vector_store %arg19[%c0_83, %c1088], %142 {strides = array<i32>} : memref<2x1216xf32, #tpu.memory_space<vmem>>, vector<2x64xf32>,
    %144 = vector.extract_strided_slice %71 {offsets = [18, 0], sizes = [1, 64], strides = [1, 1]} : vector<38x64xf32> to vector<1x64xf32>
    %145 = vector.extract_strided_slice %71 {offsets = [37, 0], sizes = [1, 64], strides = [1, 1]} : vector<38x64xf32> to vector<1x64xf32>
    %146 = tpu.concatenate %144, %145 in 0 : vector<1x64xf32>, vector<1x64xf32> -> vector<2x64xf32>
    %c0_84 = arith.constant 0 : index
    %c1152 = arith.constant 1152 : index
    %147 = vector.load %arg19[%c0_84, %c1152] : memref<2x1216xf32, #tpu.memory_space<vmem>>, vector<2x64xf32>
    tpu.vector_store %arg19[%c0_84, %c1152], %146 {strides = array<i32>} : memref<2x1216xf32, #tpu.memory_space<vmem>>, vector<2x64xf32>,
    %c0_i32_85 = arith.constant 0 : i32
    %148 = tpu.memref_slice %arg14[%c0_i32_85] : memref<2x!tpu.dma_semaphore, #tpu.memory_space<semaphore_mem>> -> memref<1x!tpu.dma_semaphore, #tpu.memory_space<semaphore_mem>>
    %149 = tpu.memref_squeeze %148 : memref<1x!tpu.dma_semaphore, #tpu.memory_space<semaphore_mem>> -> memref<!tpu.dma_semaphore, #tpu.memory_space<semaphore_mem>>
    tpu.wait_dma2 semaphore(%149 : memref<!tpu.dma_semaphore, #tpu.memory_space<semaphore_mem>>) src(%arg5 : memref<1216x256xf32, #tpu.memory_space<any>>) dst(%arg12 : memref<1216x256xf32, #tpu.memory_space<vmem>>)
    %c0_86 = arith.constant 0 : index
    %c0_87 = arith.constant 0 : index
    %150 = vector.load %arg19[%c0_86, %c0_87] : memref<2x1216xf32, #tpu.memory_space<vmem>>, vector<2x1216xf32>
    %c0_88 = arith.constant 0 : index
    %c0_89 = arith.constant 0 : index
    %151 = vector.load %arg12[%c0_88, %c0_89] : memref<1216x256xf32, #tpu.memory_space<vmem>>, vector<1216x256xf32>
    %cst_90 = arith.constant dense<0.000000e+00> : vector<2x256xf32>
    %152 = tpu.matmul %150, %151, %cst_90 {dimension_numbers = #tpu.dot_dimension_numbers<[1], [0], [0], [1], [0, 0, 1, 1], [], []>} : vector<2x1216xf32>, vector<1216x256xf32>, vector<2x256xf32> -> vector<2x256xf32>
    %c0_91 = arith.constant 0 : index
    %c0_92 = arith.constant 0 : index
    %153 = vector.load %arg6[%c0_91, %c0_92] : memref<1x256xf32, #tpu.memory_space<vmem>>, vector<1x256xf32>
    %154 = vector.broadcast %153 : vector<1x256xf32> to vector<2x256xf32>
    %155 = arith.addf %152, %154 : vector<2x256xf32>
    %cst_93 = arith.constant 0.000000e+00 : f32
    %156 = vector.broadcast %cst_93 : f32 to vector<2x256xf32>
    %157 = arith.maximumf %155, %156 : vector<2x256xf32>
    %c1_i32_94 = arith.constant 1 : i32
    %158 = tpu.memref_slice %arg14[%c1_i32_94] : memref<2x!tpu.dma_semaphore, #tpu.memory_space<semaphore_mem>> -> memref<1x!tpu.dma_semaphore, #tpu.memory_space<semaphore_mem>>
    %159 = tpu.memref_squeeze %158 : memref<1x!tpu.dma_semaphore, #tpu.memory_space<semaphore_mem>> -> memref<!tpu.dma_semaphore, #tpu.memory_space<semaphore_mem>>
    tpu.wait_dma2 semaphore(%159 : memref<!tpu.dma_semaphore, #tpu.memory_space<semaphore_mem>>) src(%arg7 : memref<256x256xf32, #tpu.memory_space<any>>) dst(%arg13 : memref<256x256xf32, #tpu.memory_space<vmem>>)
    %c0_95 = arith.constant 0 : index
    %c0_96 = arith.constant 0 : index
    %160 = vector.load %arg13[%c0_95, %c0_96] : memref<256x256xf32, #tpu.memory_space<vmem>>, vector<256x256xf32>
    %cst_97 = arith.constant dense<0.000000e+00> : vector<2x256xf32>
    %161 = tpu.matmul %157, %160, %cst_97 {dimension_numbers = #tpu.dot_dimension_numbers<[1], [0], [0], [1], [0, 0, 1, 1], [], []>} : vector<2x256xf32>, vector<256x256xf32>, vector<2x256xf32> -> vector<2x256xf32>
    %c0_98 = arith.constant 0 : index
    %c0_99 = arith.constant 0 : index
    %162 = vector.load %arg8[%c0_98, %c0_99] : memref<1x256xf32, #tpu.memory_space<vmem>>, vector<1x256xf32>
    %163 = vector.broadcast %162 : vector<1x256xf32> to vector<2x256xf32>
    %164 = arith.addf %161, %163 : vector<2x256xf32>
    %cst_100 = arith.constant 0.000000e+00 : f32
    %165 = vector.broadcast %cst_100 : f32 to vector<2x256xf32>
    %166 = arith.maximumf %164, %165 : vector<2x256xf32>
    %c0_101 = arith.constant 0 : index
    %c0_102 = arith.constant 0 : index
    %167 = vector.load %arg9[%c0_101, %c0_102] : memref<256x16xf32, #tpu.memory_space<vmem>>, vector<256x16xf32>
    %cst_103 = arith.constant dense<0.000000e+00> : vector<2x16xf32>
    %168 = tpu.matmul %166, %167, %cst_103 {dimension_numbers = #tpu.dot_dimension_numbers<[1], [0], [0], [1], [0, 0, 1, 1], [], []>} : vector<2x256xf32>, vector<256x16xf32>, vector<2x16xf32> -> vector<2x16xf32>
    %c0_104 = arith.constant 0 : index
    %c0_105 = arith.constant 0 : index
    %169 = vector.load %arg10[%c0_104, %c0_105] : memref<1x16xf32, #tpu.memory_space<vmem>>, vector<1x16xf32>
    %170 = vector.broadcast %169 : vector<1x16xf32> to vector<2x16xf32>
    %171 = arith.addf %168, %170 : vector<2x16xf32>
    %c0_106 = arith.constant 0 : index
    %c0_107 = arith.constant 0 : index
    %172 = vector.load %arg11[%c0_106, %c0_107] : memref<2x16xf32, #tpu.memory_space<vmem>>, vector<2x16xf32>
    tpu.vector_store %arg11[%c0_106, %c0_107], %171 {strides = array<i32>} : memref<2x16xf32, #tpu.memory_space<vmem>>, vector<2x16xf32>,
    return
  }
}

</mosaic_0001>

<bundles_post_ra>
// kernel: motion_encoder_forward.1
= control target key start
LH: loop header
LB: loop body
LE: loop exit
PB: predicated region body
PF: predicated region fallthrough
CT: control target
= control target key end

     0   :  { %16 = vsyncpa [#allocation11], 0  ;;  %s5052_s0 = inlined_call_operand.vmem [shape: f32[2,88,12], index: 0, kind: input, shape index: {}]   ;;  %s5053_s1 = inlined_call_operand.hbm [shape: f32[60,64], index: 1, kind: input, shape index: {}]   ;;  %s5054_s2 = inlined_call_operand.hbm [shape: f32[1,64], index: 2, kind: input, shape index: {}]   ;;  %s5055_s3 = inlined_call_operand.vmem [shape: f32[320,64], index: 3, kind: input, shape index: {}]   ;;  %s5056_s4 = inlined_call_operand.hbm [shape: f32[1,64], index: 4, kind: input, shape index: {}]   ;;  %s5057_s5 = inlined_call_operand.hbm [shape: f32[1216,256], index: 5, kind: input, shape index: {}]   ;;  %s5058_s6 = inlined_call_operand.hbm [shape: f32[1,256], index: 6, kind: input, shape index: {}]   ;;  %s5059_s7 = inlined_call_operand.hbm [shape: f32[256,256], index: 7, kind: input, shape index: {}]   ;;  %s5060_s8 = inlined_call_operand.hbm [shape: f32[1,256], index: 8, kind: input, shape index: {}]   ;;  %s5061_s9 = inlined_call_operand.vmem [shape: f32[256,16], index: 9, kind: input, shape index: {}]   ;;  %s5062_s10 = inlined_call_operand.hbm [shape: f32[1,16], index: 10, kind: input, shape index: {}]   ;;  %s5063_s11 = inlined_call_operand.hbm [shape: f32[2,16], index: 11, kind: output, shape index: {}]  }
   0x1   :  { %17 = vsyncpa [#allocation14], 0 }
   0x2   :  { %18 = vsyncpa [#allocation17], 0 }
   0x3   :  { %19 = vsyncpa [#allocation20], 0 }
   0x4   :  { %20 = vsyncpa [#allocation12], 0  ;;  %s3819_s17 = smov [#allocation13]   ;;  %s3820_s19 = smov [#allocation16]  }
   0x5   :  { %s41_s18 = sshll.u32 %s3819_s17, 4  ;;  %s63_s20 = sshll.u32 %s3820_s19, 4  ;;  %s42_s18 = int_to_ptr.vmem [resolvable:$true] %s41_s18  ;;  %s64_s20 = int_to_ptr.vmem [resolvable:$true] %s63_s20 }
   0x6   :  { %s3607_s23 = scalar_lea.hbm %s5054_s2, 16 }
   0x7   :  { %p3608_p0 = scmp.ne.s32.totalorder %s5054_s2, %s3607_s23  ;;  %p3611_p1 = scmp.lt.u32.totalorder %s3607_s23, %s5054_s2 }
   0x9   :  { %p3613_p2 = pnand %p3611_p1, %p3608_p0 }
   0xb   :  { %3616 = shalt.err (!%p3613_p2)
}
   0xc   :  { %s3617_s28 = scalar_lea.vmem %s42_s18, 16  ;;  %s3621_s29 = scalar_lea.vmem %s42_s18, 32 }
   0xd   :  { %p3618_p3 = scmp.ne.s32.totalorder %s42_s18, %s3617_s28  ;;  %p3622_p4 = scmp.lt.s32.totalorder %s42_s18, %s42_s18 }
   0xe   :  { %p3623_p5 = scmp.lt.s32.totalorder %s3621_s29, %s3617_s28 }
  0x10   :  { %p3624_p6 = por %p3623_p5, %p3622_p4 }
  0x12   :  { %p3625_p7 = pnand %p3624_p6, %p3618_p3 }
  0x14   :  { %3628 = shalt.err (!%p3625_p7)
}
  0x15   :  { %44 = dma.hbm_to_vmem [thread:$0]  %s5054_s2, 16, %s42_s18, [#allocation14]  }
  0x16   :  { %s3629_s15 = scalar_lea.hbm %s5058_s6, 32 }
  0x17   :  { %p3630_p8 = scmp.ne.s32.totalorder %s5058_s6, %s3629_s15  ;;  %p3633_p9 = scmp.lt.u32.totalorder %s3629_s15, %s5058_s6 }
  0x19   :  { %p3635_p10 = pnand %p3633_p9, %p3630_p8 }
  0x1b   :  { %3638 = shalt.err (!%p3635_p10)
}
  0x1c   :  { %s3639_s22 = scalar_lea.vmem %s64_s20, 32  ;;  %p3644_p12 = scmp.lt.s32.totalorder %s64_s20, %s64_s20 }
  0x1d   :  { %p3640_p11 = scmp.ne.s32.totalorder %s64_s20, %s3639_s22  ;;  %p3645_p13 = scmp.lt.s32.totalorder %s3639_s22, %s3639_s22 }
  0x1f   :  { %p3646_p0 = por %p3645_p13, %p3644_p12 }
  0x21   :  { %p3647_p1 = pnand %p3646_p0, %p3640_p11 }
  0x23   :  { %3650 = shalt.err (!%p3647_p1)
}
  0x24   :  { %66 = dma.hbm_to_vmem [thread:$0]  %s5058_s6, 32, %s64_s20, [#allocation17]  }
  0x25   :  { %s3821_s23 = smov [#allocation10]   ;;  %s3651_s27 = scalar_lea.hbm %s5053_s1, 1024 }
  0x26   :  { %s28_s24 = sshll.u32 %s3821_s23, 4  ;;  %p3652_p2 = scmp.ne.s32.totalorder %s5053_s1, %s3651_s27  ;;  %s29_s24 = int_to_ptr.vmem [resolvable:$true] %s28_s24 }
  0x27   :  { %p3655_p3 = scmp.lt.u32.totalorder %s3651_s27, %s5053_s1 }
  0x29   :  { %p3657_p4 = pnand %p3655_p3, %p3652_p2 }
  0x2b   :  { %3660 = shalt.err (!%p3657_p4)
}
  0x2c   :  { %s3661_s13 = scalar_lea.vmem %s29_s24, 1024  ;;  %p3666_p6 = scmp.lt.s32.totalorder %s29_s24, %s29_s24 }
  0x2d   :  { %p3662_p5 = scmp.ne.s32.totalorder %s29_s24, %s3661_s13  ;;  %p3667_p7 = scmp.lt.s32.totalorder %s3661_s13, %s3661_s13 }
  0x2f   :  { %p3668_p8 = por %p3667_p7, %p3666_p6 }
  0x31   :  { %p3669_p9 = pnand %p3668_p8, %p3662_p5 }
  0x33   :  { %3672 = shalt.err (!%p3669_p9)
}
  0x34   :  { %s3822_s6 = smov 128   ;;  %s3823_s20 = smov 8  }
  0x35   :  { %34 = dma.hbm_to_vmem [thread:$0]  %s5053_s1, 1024, %s29_s24, [#allocation11], %s3822_s6, %s3822_s6, %s3823_s20  }
  0x36   :  { %s3824_s16 = smov [#allocation15]   ;;  %s3825_s19 = smov [#allocation18]  }
  0x37   :  { %s53_s17 = sshll.u32 %s3824_s16, 4  ;;  %s73_s21 = sshll.u32 %s3825_s19, 4  ;;  %s54_s17 = int_to_ptr.vmem [resolvable:$true] %s53_s17  ;;  %s74_s21 = int_to_ptr.vmem [resolvable:$true] %s73_s21 }
  0x38   :  { %s3673_s18 = scalar_lea.hbm %s5056_s4, 16 }
  0x39   :  { %p3674_p10 = scmp.ne.s32.totalorder %s5056_s4, %s3673_s18  ;;  %p3677_p11 = scmp.lt.u32.totalorder %s3673_s18, %s5056_s4 }
  0x3b   :  { %p3679_p12 = pnand %p3677_p11, %p3674_p10 }
  0x3d   :  { %3682 = shalt.err (!%p3679_p12)
}
  0x3e   :  { %s3683_s1 = scalar_lea.vmem %s54_s17, 16  ;;  %s3687_s24 = scalar_lea.vmem %s54_s17, 32 }
  0x3f   :  { %p3684_p13 = scmp.ne.s32.totalorder %s54_s17, %s3683_s1  ;;  %p3688_p0 = scmp.lt.s32.totalorder %s54_s17, %s54_s17 }
  0x40   :  { %p3689_p1 = scmp.lt.s32.totalorder %s3687_s24, %s3683_s1 }
  0x42   :  { %p3690_p2 = por %p3689_p1, %p3688_p0 }
  0x44   :  { %p3691_p3 = pnand %p3690_p2, %p3684_p13 }
  0x46   :  { %3694 = shalt.err (!%p3691_p3)
}
  0x47   :  { %56 = dma.hbm_to_vmem [thread:$0]  %s5056_s4, 16, %s54_s17, [#allocation14]  }
  0x48   :  { %s3695_s13 = scalar_lea.hbm %s5060_s8, 32 }
  0x49   :  { %p3696_p4 = scmp.ne.s32.totalorder %s5060_s8, %s3695_s13  ;;  %p3699_p5 = scmp.lt.u32.totalorder %s3695_s13, %s5060_s8 }
  0x4b   :  { %p3701_p6 = pnand %p3699_p5, %p3696_p4 }
  0x4d   :  { %3704 = shalt.err (!%p3701_p6)
}
  0x4e   :  { %s3705_s16 = scalar_lea.vmem %s74_s21, 32  ;;  %p3710_p8 = scmp.lt.s32.totalorder %s74_s21, %s74_s21 }
  0x4f   :  { %p3706_p7 = scmp.ne.s32.totalorder %s74_s21, %s3705_s16  ;;  %p3711_p9 = scmp.lt.s32.totalorder %s3705_s16, %s3705_s16 }
  0x51   :  { %p3712_p10 = por %p3711_p9, %p3710_p8 }
  0x53   :  { %p3713_p11 = pnand %p3712_p10, %p3706_p7 }
  0x55   :  { %3716 = shalt.err (!%p3713_p11)
}
  0x56   :  { %76 = dma.hbm_to_vmem [thread:$0]  %s5060_s8, 32, %s74_s21, [#allocation17]  }
  0x57   :  { %s3826_s19 = smov [#allocation19]   ;;  %s3717_s23 = scalar_lea.hbm %s5062_s10, 16 }
  0x58   :  { %s85_s22 = sshll.u32 %s3826_s19, 4  ;;  %p3718_p12 = scmp.ne.s32.totalorder %s5062_s10, %s3717_s23  ;;  %s86_s22 = int_to_ptr.vmem [resolvable:$true] %s85_s22 }
  0x59   :  { %p3721_p13 = scmp.lt.u32.totalorder %s3717_s23, %s5062_s10 }
  0x5b   :  { %p3723_p0 = pnand %p3721_p13, %p3718_p12 }
  0x5d   :  { %3726 = shalt.err (!%p3723_p0)
}
  0x5e   :  { %s3727_s24 = scalar_lea.vmem %s86_s22, 16  ;;  %s3731_s8 = scalar_lea.vmem %s86_s22, 32 }
  0x5f   :  { %p3728_p1 = scmp.ne.s32.totalorder %s86_s22, %s3727_s24  ;;  %p3732_p2 = scmp.lt.s32.totalorder %s86_s22, %s86_s22 }
  0x60   :  { %p3733_p3 = scmp.lt.s32.totalorder %s3731_s8, %s3727_s24 }
  0x62   :  { %p3734_p4 = por %p3733_p3, %p3732_p2 }
  0x64   :  { %p3735_p5 = pnand %p3734_p4, %p3728_p1 }
  0x66   :  { %3738 = shalt.err (!%p3735_p5)
}
  0x67   :  { %88 = dma.hbm_to_vmem [thread:$0]  %s5062_s10, 16, %s86_s22, [#allocation20]  }
  0x68   :  { %3805 = dma.done.wait [#allocation11], 1024  }
  0x69   :  { %3806 = vsyncadd [#allocation11], 4294966272 }
  0x6a   :  { %3807 = dma.done.wait [#allocation14], 32  }
  0x6b   :  { %3808 = vsyncadd [#allocation14], 4294967264 }
  0x6c   :  { %3809 = dma.done.wait [#allocation17], 64  }
  0x6d   :  { %3810 = vsyncadd [#allocation17], 4294967232 }
  0x6e   :  { %3811 = dma.done.wait [#allocation20], 16  }
  0x6f   :  { %3812 = vsyncadd [#allocation20], 4294967280  ;;  %v3827_v0 = vmov 0.0|0.0   ;;  %vm141_vm0 = vcmask 97280   ;;  %v3977_v1 = vld [vmem:[%s5052_s0] sm:$0xff]  ;;  %v131_v2 = vld [vmem:[%s5052_s0 + $0x8] sm:$0xff] }
  0x70   :  { %3105 = vmatprep.subr.bf16.mxu0 %v3827_v0  ;;  %3566 = vmatprep.subr.bf16.mxu1 %v3827_v0  ;;  %v3985_v3 = vld [vmem:[%s5052_s0 + $0x10] sm:$0xff]  ;;  %s3828_s20 = smov 24   ;;  %s3829_s14 = smov 12   ;;  %v3994_v4 = vld [vmem:[%s5052_s0 + $0x18] sm:$0xff]  ;;  %v3999_v5 = vld [vmem:[%s5052_s0 + $0x20] sm:$0xff]  ;;  %142 = vst.msk [vmem:[#allocation5] sm:$0xff] %vm141_vm0, %v3977_v1 }
  0x71   :  { %212 = vrot.lane.b32.xlu1 %v3977_v1, %s3828_s20  ;;  %165 = vrot.lane.b32.xlu0 %v3977_v1, %s3829_s14  ;;  %143 = vst.msk [vmem:[#allocation5 + $0x8] sm:$0xff] %vm141_vm0, %v131_v2  ;;  %144 = vst.msk [vmem:[#allocation5 + $0x10] sm:$0xff] %vm141_vm0, %v3985_v3  ;;  %v4009_v6 = vld [vmem:[%s5052_s0 + $0x28] sm:$0xff]  ;;  %v4014_v7 = vld [vmem:[%s5052_s0 + $0x30] sm:$0xff]  ;;  %vm3830_vm1 = vmmov 0   ;;  %v3831_v22 = vmov 0.0  }
  0x72   :  { %v4019_v8 = vld [vmem:[%s5052_s0 + $0x38] sm:$0xff]  ;;  %145 = vst.msk [vmem:[#allocation5 + $0x18] sm:$0xff] %vm141_vm0, %v3994_v4  ;;  %146 = vst.msk [vmem:[#allocation5 + $0x20] sm:$0xff] %vm141_vm0, %v3999_v5  ;;  %v4028_v9 = vld [vmem:[%s5052_s0 + $0x40] sm:$0xff]  ;;  %3011 = vmatprep.mubr.msk.f32.mxu0 %vm3830_vm1, %v3831_v22  ;;  %3059 = vmatprep.mubr.msk.f32.mxu1 %vm3830_vm1, %v3831_v22  ;;  %s3832_s22 = smov 36   ;;  %s3833_s23 = smov 48  }
  0x73   :  { %v4033_v10 = vld [vmem:[%s5052_s0 + $0x48] sm:$0xff]  ;;  %147 = vst.msk [vmem:[#allocation5 + $0x28] sm:$0xff] %vm141_vm0, %v4009_v6  ;;  %148 = vst.msk [vmem:[#allocation5 + $0x30] sm:$0xff] %vm141_vm0, %v4014_v7  ;;  %v583_v11 = vld [vmem:[#allocation10] sm:$0xff]  ;;  %vm662_vm2 = vcmask 1043456   ;;  %vm3834_vm3 = vmmov 1  }
  0x74   :  { %149 = vst.msk [vmem:[#allocation5 + $0x38] sm:$0xff] %vm141_vm0, %v4019_v8  ;;  %v4044_v12 = vld [vmem:[%s5052_s0 + $0x58] sm:$0xff]  ;;  %v4049_v13 = vld [vmem:[%s5052_s0 + $0x60] sm:$0xff]  ;;  %v4054_v14 = vld [vmem:[%s5052_s0 + $0x68] sm:$0xff]  ;;  %vm152_vm5 = vcmask 93184   ;;  %vm198_vm6 = vcmask 195681  }
  0x75   :  { %150 = vst.msk [vmem:[#allocation5 + $0x40] sm:$0xff] %vm141_vm0, %v4028_v9  ;;  %151 = vst.msk [vmem:[#allocation5 + $0x48] sm:$0xff] %vm141_vm0, %v4033_v10  ;;  %214 = vrot.lane.b32.xlu1 %v131_v2, %s3828_s20  ;;  %167 = vrot.lane.b32.xlu0 %v131_v2, %s3829_s14  ;;  %v4065_v15 = vld [vmem:[%s5052_s0 + $0x70] sm:$0xff]  ;;  %v584_v16 = vld [vmem:[#allocation10 + $0x8] sm:$0xff]  ;;  %vm245_vm7 = vcmask 294082   ;;  %vm200_vm8 = vcmask 195680  }
  0x76   :  { %364 = vst.msk [vmem:[#allocation5 + $0x54] sm:$0xff] %vm141_vm0, %v4044_v12  ;;  %365 = vst.msk [vmem:[#allocation5 + $0x5c] sm:$0xff] %vm141_vm0, %v4049_v13  ;;  %v4076_v17 = vld [vmem:[%s5052_s0 + $0x80] sm:$0xff]  ;;  %v3106_v18 = vpack.c.bf16 %v584_v16, %v583_v11  ;;  %v4085_v19 = vld [vmem:[%s5052_s0 + $0x78] sm:$0xff]  ;;  %vm247_vm9 = vcmask 294080   ;;  %vm294_vm10 = vcmask 392480  }
  0x77   :  { %366 = vst.msk [vmem:[#allocation5 + $0x64] sm:$0xff] %vm141_vm0, %v4054_v14  ;;  %367 = vst.msk [vmem:[#allocation5 + $0x6c] sm:$0xff] %vm141_vm0, %v4065_v15  ;;  %v585_v20 = vld [vmem:[#allocation10 + $0x10] sm:$0xff]  ;;  %v586_v21 = vld [vmem:[#allocation10 + $0x18] sm:$0xff]  ;;  %vm292_vm11 = vcmask 392483   ;;  %vm341_vm12 = vcmask 490880  }
  0x78   :  { %369 = vst.msk [vmem:[#allocation5 + $0x7c] sm:$0xff] %vm141_vm0, %v4076_v17  ;;  %368 = vst.msk [vmem:[#allocation5 + $0x74] sm:$0xff] %vm141_vm0, %v4085_v19  ;;  %v4096_v23 = vld [vmem:[%s5052_s0 + $0x88] sm:$0xff]  ;;  %3107 = vmatpush3.bf16.msra.mxu0 %v3106_v18  ;;  %v3109_v24 = vpack.c.bf16 %v586_v21, %v585_v20  ;;  %3570 = vmatpush3.bf16.msra.mxu1 %v3106_v18  ;;  %v587_v25 = vld [vmem:[#allocation10 + $0x20] sm:$0xff]  ;;  %vm339_vm13 = vcmask 490884   ;;  %vm598_vm14 = vcmask 490496  }
  0x79   :  { %370 = vst.msk [vmem:[#allocation5 + $0x84] sm:$0xff] %vm141_vm0, %v4096_v23  ;;  %261 = vrot.lane.b32.xlu1 %v131_v2, %s3832_s22  ;;  %259 = vrot.lane.b32.xlu0 %v3977_v1, %s3832_s22  ;;  %v588_v26 = vld [vmem:[#allocation10 + $0x28] sm:$0xff]  ;;  %v4108_v28 = vld [vmem:[%s5052_s0 + $0x90] sm:$0xff]  ;;  %v589_v29 = vld [vmem:[#allocation10 + $0x30] sm:$0xff]  ;;  %vm210_vm15 = vcmask 192608   ;;  %s3835_s17 = smov 64  }
  0x7a   :  { %3108 = vmatprep.subr.bf16.mxu0 %v3827_v0  ;;  %3567 = vmatprep.subr.bf16.mxu1 %v3827_v0  ;;  %v3112_v27 = vpack.c.bf16 %v588_v26, %v587_v25  ;;  %v590_v30 = vld [vmem:[#allocation10 + $0x38] sm:$0xf]  ;;  %371 = vst.msk [vmem:[#allocation5 + $0x8c] sm:$0xff] %vm141_vm0, %v4108_v28  ;;  %vm3116_vm4 = vmpackc.low %vm662_vm2, %vm3834_vm3  ;;  %v4135_v32 = vld [vmem:[%s5052_s0 + $0x98] sm:$0xff]  ;;  %vm304_vm3 = vcmask 391456   ;;  %s3838_s30 = smov [#allocation3]  }
  0x7b   :  { %v3115_v31 = vpack.c.bf16 %v590_v30, %v589_v29  ;;  %372 = vst.msk [vmem:[#allocation5 + $0x94] sm:$0xff] %vm141_vm0, %v4135_v32  ;;  %v4150_v33 = vld [vmem:[%s5052_s0 + $0xa0] sm:$0xff]  ;;  %v140_v34 = vld [vmem:[%s5052_s0 + $0x50] sm:$0xff]  ;;  %v4192_v35 = vld [vmem:[%s5052_s0 + $0xa8] sm:$0xff]  ;;  %s126_s10 = sshll.u32 %s3838_s30, 4  ;;  %s3739_s6 = scalar_lea.hbm %s5057_s5, 38912  ;;  %s4818_s10 = int_to_ptr.vmem [resolvable:$true] %s126_s10 }
  0x7c   :  { %3110 = vmatpush3.bf16.msra.mxu0 %v3109_v24  ;;  %3571 = vmatpush3.bf16.msra.mxu1 %v3109_v24  ;;  %373 = vst.msk [vmem:[#allocation5 + $0x9c] sm:$0xff] %vm141_vm0, %v4150_v33  ;;  %vm257_vm0 = vcmask 292032   ;;  %p3740_p6 = scmp.ne.s32.totalorder %s5057_s5, %s3739_s6  ;;  %p3743_p7 = scmp.lt.u32.totalorder %s3739_s6, %s5057_s5 }
  0x7d   :  { %308 = vrot.lane.b32.xlu1 %v131_v2, %s3833_s23  ;;  %306 = vrot.lane.b32.xlu0 %v3977_v1, %s3833_s23  ;;  %153 = vst.msk [vmem:[#allocation5 + $0x50] sm:$0xf] %vm152_vm5, %v140_v34  ;;  %374 = vst.msk [vmem:[#allocation5 + $0xa4] sm:$0xf] %vm152_vm5, %v4192_v35  ;;  %vm944_vm5 = vcmask 1046528  }
  0x7e   :  { %3111 = vmatprep.subr.bf16.mxu0 %v3827_v0  ;;  %3568 = vmatprep.subr.bf16.mxu1 %v3827_v0  ;;  %p3745_p8 = pnand %p3743_p7, %p3740_p6 }
  0x80   :  { %3113 = vmatpush3.bf16.msra.mxu0 %v3112_v27  ;;  %3572 = vmatpush3.bf16.msra.mxu1 %v3112_v27 }
  0x81   :  { %216 = vrot.lane.b32.xlu1 %v3985_v3, %s3828_s20  ;;  %169 = vrot.lane.b32.xlu0 %v3985_v3, %s3829_s14 }
  0x82   :  { %3114 = vmatprep.subr.bf16.mxu0 %v3827_v0  ;;  %3569 = vmatprep.subr.bf16.mxu1 %v3827_v0 }
  0x84   :  { %3117 = vmatpush3.bf16.msk.msra.mxu0 %vm3116_vm4, %v3115_v31  ;;  %3573 = vmatpush3.bf16.msk.msra.mxu1 %vm3116_vm4, %v3115_v31  ;;  %vm857_vm4 = vcmask 523264  }
  0x85   :  { %310 = vrot.lane.b32.xlu1 %v3985_v3, %s3833_s23  ;;  %263 = vrot.lane.b32.xlu0 %v3985_v3, %s3832_s22 }
  0x89   :  { %218 = vrot.lane.b32.xlu1 %v3994_v4, %s3828_s20  ;;  %171 = vrot.lane.b32.xlu0 %v3994_v4, %s3829_s14 }
  0x8d   :  { %312 = vrot.lane.b32.xlu1 %v3994_v4, %s3833_s23  ;;  %265 = vrot.lane.b32.xlu0 %v3994_v4, %s3832_s22 }
  0x91   :  { %220 = vrot.lane.b32.xlu1 %v3999_v5, %s3828_s20  ;;  %173 = vrot.lane.b32.xlu0 %v3999_v5, %s3829_s14 }
  0x95   :  { %314 = vrot.lane.b32.xlu1 %v3999_v5, %s3833_s23  ;;  %267 = vrot.lane.b32.xlu0 %v3999_v5, %s3832_s22 }
  0x99   :  { %222 = vrot.lane.b32.xlu1 %v4009_v6, %s3828_s20  ;;  %175 = vrot.lane.b32.xlu0 %v4009_v6, %s3829_s14 }
  0x9d   :  { %316 = vrot.lane.b32.xlu1 %v4009_v6, %s3833_s23  ;;  %269 = vrot.lane.b32.xlu0 %v4009_v6, %s3832_s22 }
  0xa1   :  { %224 = vrot.lane.b32.xlu1 %v4014_v7, %s3828_s20  ;;  %177 = vrot.lane.b32.xlu0 %v4014_v7, %s3829_s14 }
  0xa5   :  { %318 = vrot.lane.b32.xlu1 %v4014_v7, %s3833_s23  ;;  %271 = vrot.lane.b32.xlu0 %v4014_v7, %s3832_s22 }
  0xa9   :  { %226 = vrot.lane.b32.xlu1 %v4019_v8, %s3828_s20  ;;  %179 = vrot.lane.b32.xlu0 %v4019_v8, %s3829_s14 }
  0xad   :  { %320 = vrot.lane.b32.xlu1 %v4019_v8, %s3833_s23  ;;  %273 = vrot.lane.b32.xlu0 %v4019_v8, %s3832_s22 }
  0xb1   :  { %228 = vrot.lane.b32.xlu1 %v4028_v9, %s3828_s20  ;;  %181 = vrot.lane.b32.xlu0 %v4028_v9, %s3829_s14 }
  0xb5   :  { %322 = vrot.lane.b32.xlu1 %v4028_v9, %s3833_s23  ;;  %275 = vrot.lane.b32.xlu0 %v4028_v9, %s3832_s22 }
  0xb9   :  { %230 = vrot.lane.b32.xlu1 %v4033_v10, %s3828_s20  ;;  %183 = vrot.lane.b32.xlu0 %v4033_v10, %s3829_s14 }
  0xbd   :  { %324 = vrot.lane.b32.xlu1 %v4033_v10, %s3833_s23  ;;  %277 = vrot.lane.b32.xlu0 %v4033_v10, %s3832_s22 }
  0xc1   :  { %232 = vrot.lane.b32.xlu1 %v140_v34, %s3828_s20  ;;  %185 = vrot.lane.b32.xlu0 %v140_v34, %s3829_s14 }
  0xc5   :  { %326 = vrot.lane.b32.xlu1 %v140_v34, %s3833_s23  ;;  %279 = vrot.lane.b32.xlu0 %v140_v34, %s3832_s22 }
  0xc9   :  { %430 = vrot.lane.b32.xlu1 %v4044_v12, %s3828_s20  ;;  %386 = vrot.lane.b32.xlu0 %v4044_v12, %s3829_s14 }
  0xcd   :  { %518 = vrot.lane.b32.xlu1 %v4044_v12, %s3833_s23  ;;  %474 = vrot.lane.b32.xlu0 %v4044_v12, %s3832_s22 }
  0xd1   :  { %432 = vrot.lane.b32.xlu1 %v4049_v13, %s3828_s20  ;;  %388 = vrot.lane.b32.xlu0 %v4049_v13, %s3829_s14 }
  0xd5   :  { %520 = vrot.lane.b32.xlu1 %v4049_v13, %s3833_s23  ;;  %476 = vrot.lane.b32.xlu0 %v4049_v13, %s3832_s22 }
  0xd9   :  { %434 = vrot.lane.b32.xlu1 %v4054_v14, %s3828_s20  ;;  %390 = vrot.lane.b32.xlu0 %v4054_v14, %s3829_s14 }
  0xdd   :  { %522 = vrot.lane.b32.xlu1 %v4054_v14, %s3833_s23  ;;  %478 = vrot.lane.b32.xlu0 %v4054_v14, %s3832_s22 }
  0xe1   :  { %436 = vrot.lane.b32.xlu1 %v4065_v15, %s3828_s20  ;;  %392 = vrot.lane.b32.xlu0 %v4065_v15, %s3829_s14 }
  0xe3   :  { %v213_v36 = vpop.permute.xlu1 %212  ;;  %v166_v37 = vpop.permute.xlu0 %165 }
  0xe4   :  { %199 = vst.msk [vmem:[#allocation5 - $0x1] sm:$0xfe] %vm198_vm6, %v166_v37 }
  0xe5   :  { %246 = vst.msk [vmem:[#allocation5 - $0x2] sm:$0xfc] %vm245_vm7, %v213_v36  ;;  %524 = vrot.lane.b32.xlu1 %v4065_v15, %s3833_s23  ;;  %480 = vrot.lane.b32.xlu0 %v4065_v15, %s3832_s22 }
  0xe7   :  { %v215_v38 = vpop.permute.xlu1 %214  ;;  %v168_v39 = vpop.permute.xlu0 %167 }
  0xe8   :  { %201 = vst.msk [vmem:[#allocation5 + $0x7] sm:$0xff] %vm200_vm8, %v168_v39 }
  0xe9   :  { %396 = vrot.lane.b32.xlu1 %v4076_v17, %s3829_s14  ;;  %394 = vrot.lane.b32.xlu0 %v4085_v19, %s3829_s14  ;;  %248 = vst.msk [vmem:[#allocation5 + $0x6] sm:$0xff] %vm247_vm9, %v215_v38 }
  0xeb   :  { %v262_v40 = vpop.permute.xlu1 %261  ;;  %v260_v41 = vpop.permute.xlu0 %259 }
  0xec   :  { %295 = vst.msk [vmem:[#allocation5 + $0x5] sm:$0xff] %vm294_vm10, %v262_v40 }
  0xed   :  { %293 = vst.msk [vmem:[#allocation5 - $0x3] sm:$0xf8] %vm292_vm11, %v260_v41  ;;  %438 = vrot.lane.b32.xlu1 %v4085_v19, %s3828_s20  ;;  %398 = vrot.lane.b32.xlu0 %v4096_v23, %s3829_s14 }
  0xef   :  { %v309_v42 = vpop.permute.xlu1 %308  ;;  %v307_v43 = vpop.permute.xlu0 %306 }
  0xf0   :  { %342 = vst.msk [vmem:[#allocation5 + $0x4] sm:$0xff] %vm341_vm12, %v309_v42 }
  0xf1   :  { %340 = vst.msk [vmem:[#allocation5 - $0x4] sm:$0xf0] %vm339_vm13, %v307_v43  ;;  %442 = vrot.lane.b32.xlu1 %v4096_v23, %s3828_s20  ;;  %440 = vrot.lane.b32.xlu0 %v4076_v17, %s3828_s20 }
  0xf3   :  { %v217_v44 = vpop.permute.xlu1 %216  ;;  %v170_v45 = vpop.permute.xlu0 %169 }
  0xf4   :  { %202 = vst.msk [vmem:[#allocation5 + $0xf] sm:$0xff] %vm200_vm8, %v170_v45 }
  0xf5   :  { %249 = vst.msk [vmem:[#allocation5 + $0xe] sm:$0xff] %vm247_vm9, %v217_v44  ;;  %484 = vrot.lane.b32.xlu1 %v4076_v17, %s3832_s22  ;;  %482 = vrot.lane.b32.xlu0 %v4085_v19, %s3832_s22 }
  0xf7   :  { %v311_v46 = vpop.permute.xlu1 %310  ;;  %v264_v47 = vpop.permute.xlu0 %263 }
  0xf8   :  { %v562_v48 = vld [vmem:[#allocation5] sm:$0xff]  ;;  %296 = vst.msk [vmem:[#allocation5 + $0xd] sm:$0xff] %vm294_vm10, %v264_v47 }
  0xf9   :  { %3012 = vmatmul.mubr.msk.f32.vlgmr.msra.gmra.mrb[0].mxu0 %vm598_vm14, %v562_v48  ;;  %343 = vst.msk [vmem:[#allocation5 + $0xc] sm:$0xff] %vm341_vm12, %v311_v46  ;;  %526 = vrot.lane.b32.xlu1 %v4085_v19, %s3833_s23 }
  0xfa   :  { %486 = vrot.lane.b32.xlu0 %v4096_v23, %s3832_s22  ;;  %3014 = vmatprep.mubr.msk.f32.mxu0 %vm3830_vm1, %v3831_v22 }
  0xfb   :  { %v219_v49 = vpop.permute.xlu1 %218  ;;  %v172_v50 = vpop.permute.xlu0 %171 }
  0xfc   :  { %203 = vst.msk [vmem:[#allocation5 + $0x17] sm:$0xff] %vm200_vm8, %v172_v50 }
  0xfd   :  { %250 = vst.msk [vmem:[#allocation5 + $0x16] sm:$0xff] %vm247_vm9, %v219_v49  ;;  %400 = vrot.lane.b32.xlu1 %v4108_v28, %s3829_s14 }
  0xfe   :  { %530 = vrot.lane.b32.xlu0 %v4096_v23, %s3833_s23 }
  0xff   :  { %v313_v51 = vpop.permute.xlu1 %312  ;;  %v266_v52 = vpop.permute.xlu0 %265 }
 0x100   :  { %297 = vst.msk [vmem:[#allocation5 + $0x15] sm:$0xff] %vm294_vm10, %v266_v52  ;;  %v563_v53 = vld [vmem:[#allocation5 + $0x8] sm:$0xff] }
 0x101   :  { %344 = vst.msk [vmem:[#allocation5 + $0x14] sm:$0xff] %vm341_vm12, %v313_v51  ;;  %488 = vrot.lane.b32.xlu1 %v4108_v28, %s3832_s22  ;;  %3015 = vmatmul.mubr.msk.f32.gmra.mrb[2].mxu0 %vm598_vm14, %v563_v53 }
 0x102   :  { %444 = vrot.lane.b32.xlu0 %v4108_v28, %s3828_s20  ;;  %3017 = vmatprep.mubr.msk.f32.mxu0 %vm3830_vm1, %v3831_v22 }
 0x103   :  { %v221_v54 = vpop.permute.xlu1 %220  ;;  %v174_v55 = vpop.permute.xlu0 %173 }
 0x104   :  { %204 = vst.msk [vmem:[#allocation5 + $0x1f] sm:$0xff] %vm200_vm8, %v174_v55 }
 0x105   :  { %251 = vst.msk [vmem:[#allocation5 + $0x1e] sm:$0xff] %vm247_vm9, %v221_v54  ;;  %532 = vrot.lane.b32.xlu1 %v4108_v28, %s3833_s23 }
 0x106   :  { %528 = vrot.lane.b32.xlu0 %v4076_v17, %s3833_s23 }
 0x107   :  { %v315_v56 = vpop.permute.xlu1 %314  ;;  %v268_v57 = vpop.permute.xlu0 %267 }
 0x108   :  { %298 = vst.msk [vmem:[#allocation5 + $0x1d] sm:$0xff] %vm294_vm10, %v268_v57  ;;  %v564_v58 = vld [vmem:[#allocation5 + $0x10] sm:$0xff] }
 0x109   :  { %345 = vst.msk [vmem:[#allocation5 + $0x1c] sm:$0xff] %vm341_vm12, %v315_v56  ;;  %3018 = vmatmul.mubr.msk.f32.gmra.mrb[4].mxu0 %vm598_vm14, %v564_v58  ;;  %446 = vrot.lane.b32.xlu1 %v4135_v32, %s3828_s20 }
 0x10a   :  { %402 = vrot.lane.b32.xlu0 %v4135_v32, %s3829_s14  ;;  %3020 = vmatprep.mubr.msk.f32.mxu0 %vm3830_vm1, %v3831_v22 }
 0x10b   :  { %v223_v59 = vpop.permute.xlu1 %222  ;;  %v176_v60 = vpop.permute.xlu0 %175 }
 0x10c   :  { %205 = vst.msk [vmem:[#allocation5 + $0x27] sm:$0xff] %vm200_vm8, %v176_v60 }
 0x10d   :  { %252 = vst.msk [vmem:[#allocation5 + $0x26] sm:$0xff] %vm247_vm9, %v223_v59  ;;  %534 = vrot.lane.b32.xlu1 %v4135_v32, %s3833_s23 }
 0x10e   :  { %490 = vrot.lane.b32.xlu0 %v4135_v32, %s3832_s22 }
 0x10f   :  { %v317_v61 = vpop.permute.xlu1 %316  ;;  %v270_v62 = vpop.permute.xlu0 %269 }
 0x110   :  { %299 = vst.msk [vmem:[#allocation5 + $0x25] sm:$0xff] %vm294_vm10, %v270_v62  ;;  %v565_v63 = vld [vmem:[#allocation5 + $0x18] sm:$0xff] }
 0x111   :  { %346 = vst.msk [vmem:[#allocation5 + $0x24] sm:$0xff] %vm341_vm12, %v317_v61  ;;  %3021 = vmatmul.mubr.msk.f32.gmra.mrb[6].mxu0 %vm598_vm14, %v565_v63  ;;  %448 = vrot.lane.b32.xlu1 %v4150_v33, %s3828_s20 }
 0x112   :  { %404 = vrot.lane.b32.xlu0 %v4150_v33, %s3829_s14  ;;  %3023 = vmatprep.mubr.msk.f32.mxu0 %vm3830_vm1, %v3831_v22 }
 0x113   :  { %v225_v0 = vpop.permute.xlu1 %224  ;;  %v178_v1 = vpop.permute.xlu0 %177 }
 0x114   :  { %206 = vst.msk [vmem:[#allocation5 + $0x2f] sm:$0xff] %vm200_vm8, %v178_v1 }
 0x115   :  { %253 = vst.msk [vmem:[#allocation5 + $0x2e] sm:$0xff] %vm247_vm9, %v225_v0  ;;  %536 = vrot.lane.b32.xlu1 %v4150_v33, %s3833_s23 }
 0x116   :  { %492 = vrot.lane.b32.xlu0 %v4150_v33, %s3832_s22 }
 0x117   :  { %v319_v2 = vpop.permute.xlu1 %318  ;;  %v272_v3 = vpop.permute.xlu0 %271 }
 0x118   :  { %300 = vst.msk [vmem:[#allocation5 + $0x2d] sm:$0xff] %vm294_vm10, %v272_v3  ;;  %v566_v4 = vld [vmem:[#allocation5 + $0x20] sm:$0xff] }
 0x119   :  { %347 = vst.msk [vmem:[#allocation5 + $0x2c] sm:$0xff] %vm341_vm12, %v319_v2  ;;  %3024 = vmatmul.mubr.msk.f32.gmra.mrb[8].mxu0 %vm598_vm14, %v566_v4  ;;  %450 = vrot.lane.b32.xlu1 %v4192_v35, %s3828_s20 }
 0x11a   :  { %406 = vrot.lane.b32.xlu0 %v4192_v35, %s3829_s14  ;;  %3026 = vmatprep.mubr.msk.f32.mxu0 %vm3830_vm1, %v3831_v22 }
 0x11b   :  { %v227_v5 = vpop.permute.xlu1 %226  ;;  %v180_v6 = vpop.permute.xlu0 %179 }
 0x11c   :  { %207 = vst.msk [vmem:[#allocation5 + $0x37] sm:$0xff] %vm200_vm8, %v180_v6 }
 0x11d   :  { %254 = vst.msk [vmem:[#allocation5 + $0x36] sm:$0xff] %vm247_vm9, %v227_v5  ;;  %538 = vrot.lane.b32.xlu1 %v4192_v35, %s3833_s23 }
 0x11e   :  { %494 = vrot.lane.b32.xlu0 %v4192_v35, %s3832_s22 }
 0x11f   :  { %v321_v7 = vpop.permute.xlu1 %320  ;;  %v274_v8 = vpop.permute.xlu0 %273 }
 0x120   :  { %301 = vst.msk [vmem:[#allocation5 + $0x35] sm:$0xff] %vm294_vm10, %v274_v8  ;;  %v567_v9 = vld [vmem:[#allocation5 + $0x28] sm:$0xff] }
 0x121   :  { %348 = vst.msk [vmem:[#allocation5 + $0x34] sm:$0xff] %vm341_vm12, %v321_v7  ;;  %3027 = vmatmul.mubr.msk.f32.gmra.mrb[10].mxu0 %vm598_vm14, %v567_v9 }
 0x122   :  { %3029 = vmatprep.mubr.msk.f32.mxu0 %vm3830_vm1, %v3831_v22 }
 0x123   :  { %v229_v10 = vpop.permute.xlu1 %228  ;;  %v182_v11 = vpop.permute.xlu0 %181 }
 0x124   :  { %208 = vst.msk [vmem:[#allocation5 + $0x3f] sm:$0xff] %vm200_vm8, %v182_v11 }
 0x125   :  { %255 = vst.msk [vmem:[#allocation5 + $0x3e] sm:$0xff] %vm247_vm9, %v229_v10 }
 0x127   :  { %v323_v12 = vpop.permute.xlu1 %322  ;;  %v276_v13 = vpop.permute.xlu0 %275 }
 0x128   :  { %302 = vst.msk [vmem:[#allocation5 + $0x3d] sm:$0xff] %vm294_vm10, %v276_v13  ;;  %v568_v14 = vld [vmem:[#allocation5 + $0x30] sm:$0xff] }
 0x129   :  { %349 = vst.msk [vmem:[#allocation5 + $0x3c] sm:$0xff] %vm341_vm12, %v323_v12  ;;  %3030 = vmatmul.mubr.msk.f32.gmra.mrb[12].mxu0 %vm598_vm14, %v568_v14 }
 0x12a   :  { %3032 = vmatprep.mubr.msk.f32.mxu0 %vm3830_vm1, %v3831_v22 }
 0x12b   :  { %v231_v15 = vpop.permute.xlu1 %230  ;;  %v184_v16 = vpop.permute.xlu0 %183 }
 0x12c   :  { %209 = vst.msk [vmem:[#allocation5 + $0x47] sm:$0xff] %vm200_vm8, %v184_v16 }
 0x12d   :  { %256 = vst.msk [vmem:[#allocation5 + $0x46] sm:$0xff] %vm247_vm9, %v231_v15 }
 0x12f   :  { %v325_v17 = vpop.permute.xlu1 %324  ;;  %v278_v18 = vpop.permute.xlu0 %277 }
 0x130   :  { %303 = vst.msk [vmem:[#allocation5 + $0x45] sm:$0xff] %vm294_vm10, %v278_v18  ;;  %v569_v19 = vld [vmem:[#allocation5 + $0x38] sm:$0xff]  ;;  %v4446_v18 = vld [vmem:[#allocation13] ss:$0 sm:$0xff] }
 0x131   :  { %350 = vst.msk [vmem:[#allocation5 + $0x44] sm:$0xff] %vm341_vm12, %v325_v17  ;;  %3033 = vmatmul.mubr.msk.f32.gmra.mrb[14].mxu0 %vm598_vm14, %v569_v19 }
 0x132   :  { %3035 = vmatprep.mubr.msk.f32.mxu0 %vm3830_vm1, %v3831_v22 }
 0x133   :  { %v233_v20 = vpop.permute.xlu1 %232  ;;  %v186_v21 = vpop.permute.xlu0 %185 }
 0x134   :  { %211 = vst.msk [vmem:[#allocation5 + $0x4f] sm:$0x1f] %vm210_vm15, %v186_v21 }
 0x135   :  { %258 = vst.msk [vmem:[#allocation5 + $0x4e] sm:$0x3f] %vm257_vm0, %v233_v20 }
 0x137   :  { %v327_v23 = vpop.permute.xlu1 %326  ;;  %v280_v24 = vpop.permute.xlu0 %279 }
 0x138   :  { %305 = vst.msk [vmem:[#allocation5 + $0x4d] sm:$0x7f] %vm304_vm3, %v280_v24  ;;  %v570_v25 = vld [vmem:[#allocation5 + $0x40] sm:$0xff]  ;;  %v1227_v24 = vld [vmem:[%s5055_s3 + $0x80] sm:$0xff] }
 0x139   :  { %351 = vst.msk [vmem:[#allocation5 + $0x4c] sm:$0xff] %vm341_vm12, %v327_v23  ;;  %3036 = vmatmul.mubr.msk.f32.gmra.mrb[16].mxu0 %vm598_vm14, %v570_v25 }
 0x13a   :  { %3038 = vmatprep.mubr.msk.f32.mxu0 %vm3830_vm1, %v3831_v22 }
 0x13b   :  { %v431_v26 = vpop.permute.xlu1 %430  ;;  %v387_v27 = vpop.permute.xlu0 %386 }
 0x13c   :  { %419 = vst.msk [vmem:[#allocation5 + $0x53] sm:$0xfe] %vm198_vm6, %v387_v27  ;;  %v1212_v27 = vld [vmem:[%s5055_s3 + $0x8] sm:$0xff]  ;;  %vm976_vm6 = vcmask 1045504  }
 0x13d   :  { %463 = vst.msk [vmem:[#allocation5 + $0x52] sm:$0xfc] %vm245_vm7, %v431_v26  ;;  %v1211_v26 = vld [vmem:[%s5055_s3] sm:$0xff]  ;;  %vm937_vm7 = vcmask 521216  }
 0x13f   :  { %v519_v28 = vpop.permute.xlu1 %518  ;;  %v475_v29 = vpop.permute.xlu0 %474 }
 0x140   :  { %507 = vst.msk [vmem:[#allocation5 + $0x51] sm:$0xf8] %vm292_vm11, %v475_v29  ;;  %v571_v30 = vld [vmem:[#allocation5 + $0x48] sm:$0xff]  ;;  %v1229_v29 = vld [vmem:[%s5055_s3 + $0x90] sm:$0xff]  ;;  %vm1115_vm11 = vcmask 1041408  }
 0x141   :  { %551 = vst.msk [vmem:[#allocation5 + $0x50] sm:$0xf0] %vm339_vm13, %v519_v28  ;;  %3039 = vmatmul.mubr.msk.f32.gmra.mrb[18].mxu0 %vm598_vm14, %v571_v30  ;;  %v3120_v28 = vpack.c.bf16 %v1212_v27, %v1211_v26  ;;  %v1230_v30 = vld [vmem:[%s5055_s3 + $0x98] sm:$0xff]  ;;  %vm1074_vm13 = vcmask 519168  }
 0x142   :  { %3041 = vmatprep.mubr.msk.f32.mxu0 %vm3830_vm1, %v3831_v22 }
 0x143   :  { %v433_v31 = vpop.permute.xlu1 %432  ;;  %v389_v32 = vpop.permute.xlu0 %388 }
 0x144   :  { %420 = vst.msk [vmem:[#allocation5 + $0x5b] sm:$0xff] %vm200_vm8, %v389_v32  ;;  %v3122_v32 = vpack.c.bf16 %v1230_v30, %v1229_v29 }
 0x145   :  { %464 = vst.msk [vmem:[#allocation5 + $0x5a] sm:$0xff] %vm247_vm9, %v433_v31 }
 0x147   :  { %v521_v33 = vpop.permute.xlu1 %520  ;;  %v477_v34 = vpop.permute.xlu0 %476 }
 0x148   :  { %508 = vst.msk [vmem:[#allocation5 + $0x59] sm:$0xff] %vm294_vm10, %v477_v34  ;;  %v572_v35 = vld [vmem:[#allocation5 + $0x50] sm:$0xff]  ;;  %v1214_v34 = vld [vmem:[%s5055_s3 + $0x18] sm:$0xff] }
 0x149   :  { %552 = vst.msk [vmem:[#allocation5 + $0x58] sm:$0xff] %vm341_vm12, %v521_v33  ;;  %3042 = vmatmul.mubr.msk.f32.gmra.mrb[20].mxu0 %vm598_vm14, %v572_v35  ;;  %v1213_v33 = vld [vmem:[%s5055_s3 + $0x10] sm:$0xff] }
 0x14a   :  { %3044 = vmatprep.mubr.msk.f32.mxu0 %vm3830_vm1, %v3831_v22 }
 0x14b   :  { %v435_v36 = vpop.permute.xlu1 %434  ;;  %v391_v37 = vpop.permute.xlu0 %390 }
 0x14c   :  { %421 = vst.msk [vmem:[#allocation5 + $0x63] sm:$0xff] %vm200_vm8, %v391_v37  ;;  %v3124_v37 = vpack.c.bf16 %v1214_v34, %v1213_v33 }
 0x14d   :  { %465 = vst.msk [vmem:[#allocation5 + $0x62] sm:$0xff] %vm247_vm9, %v435_v36 }
 0x14f   :  { %v523_v38 = vpop.permute.xlu1 %522  ;;  %v479_v39 = vpop.permute.xlu0 %478 }
 0x150   :  { %509 = vst.msk [vmem:[#allocation5 + $0x61] sm:$0xff] %vm294_vm10, %v479_v39  ;;  %v573_v40 = vld [vmem:[#allocation5 + $0x58] sm:$0xff]  ;;  %v1231_v39 = vld [vmem:[%s5055_s3 + $0xa0] sm:$0xff] }
 0x151   :  { %553 = vst.msk [vmem:[#allocation5 + $0x60] sm:$0xff] %vm341_vm12, %v523_v38  ;;  %3045 = vmatmul.mubr.msk.f32.gmra.mrb[22].mxu0 %vm598_vm14, %v573_v40  ;;  %v1232_v40 = vld [vmem:[%s5055_s3 + $0xa8] sm:$0xff] }
 0x152   :  { %3047 = vmatprep.mubr.msk.f32.mxu0 %vm3830_vm1, %v3831_v22 }
 0x153   :  { %v437_v41 = vpop.permute.xlu1 %436  ;;  %v393_v42 = vpop.permute.xlu0 %392 }
 0x154   :  { %422 = vst.msk [vmem:[#allocation5 + $0x6b] sm:$0xff] %vm200_vm8, %v393_v42  ;;  %v3126_v42 = vpack.c.bf16 %v1232_v40, %v1231_v39 }
 0x155   :  { %466 = vst.msk [vmem:[#allocation5 + $0x6a] sm:$0xff] %vm247_vm9, %v437_v41  ;;  %v1215_v41 = vld [vmem:[%s5055_s3 + $0x20] sm:$0xff] }
 0x157   :  { %v525_v43 = vpop.permute.xlu1 %524  ;;  %v481_v44 = vpop.permute.xlu0 %480 }
 0x158   :  { %510 = vst.msk [vmem:[#allocation5 + $0x69] sm:$0xff] %vm294_vm10, %v481_v44  ;;  %v574_v45 = vld [vmem:[#allocation5 + $0x60] sm:$0xff] }
 0x159   :  { %554 = vst.msk [vmem:[#allocation5 + $0x68] sm:$0xff] %vm341_vm12, %v525_v43  ;;  %3048 = vmatmul.mubr.msk.f32.gmra.mrb[24].mxu0 %vm598_vm14, %v574_v45  ;;  %v1216_v43 = vld [vmem:[%s5055_s3 + $0x28] sm:$0xff] }
 0x15a   :  { %3050 = vmatprep.mubr.msk.f32.mxu0 %vm3830_vm1, %v3831_v22  ;;  %v3128_v44 = vpack.c.bf16 %v1216_v43, %v1215_v41 }
 0x15b   :  { %v397_v46 = vpop.permute.xlu1 %396  ;;  %v395_v47 = vpop.permute.xlu0 %394 }
 0x15c   :  { %424 = vst.msk [vmem:[#allocation5 + $0x7b] sm:$0xff] %vm200_vm8, %v397_v46  ;;  %423 = vst.msk [vmem:[#allocation5 + $0x73] sm:$0xff] %vm200_vm8, %v395_v47  ;;  %v1233_v46 = vld [vmem:[%s5055_s3 + $0xb0] sm:$0xff]  ;;  %v1234_v47 = vld [vmem:[%s5055_s3 + $0xb8] sm:$0xff] }
 0x15f   :  { %v439_v48 = vpop.permute.xlu1 %438  ;;  %v399_v49 = vpop.permute.xlu0 %398 }
 0x160   :  { %467 = vst.msk [vmem:[#allocation5 + $0x72] sm:$0xff] %vm247_vm9, %v439_v48  ;;  %v575_v50 = vld [vmem:[#allocation5 + $0x68] sm:$0xff] }
 0x161   :  { %425 = vst.msk [vmem:[#allocation5 + $0x83] sm:$0xff] %vm200_vm8, %v399_v49  ;;  %3051 = vmatmul.mubr.msk.f32.gmra.mrb[26].mxu0 %vm598_vm14, %v575_v50  ;;  %v3130_v50 = vpack.c.bf16 %v1234_v47, %v1233_v46 }
 0x162   :  { %3053 = vmatprep.mubr.msk.f32.mxu0 %vm3830_vm1, %v3831_v22 }
 0x163   :  { %v443_v51 = vpop.permute.xlu1 %442  ;;  %v441_v52 = vpop.permute.xlu0 %440 }
 0x164   :  { %469 = vst.msk [vmem:[#allocation5 + $0x82] sm:$0xff] %vm247_vm9, %v443_v51  ;;  %468 = vst.msk [vmem:[#allocation5 + $0x7a] sm:$0xff] %vm247_vm9, %v441_v52  ;;  %v1217_v51 = vld [vmem:[%s5055_s3 + $0x30] sm:$0xff]  ;;  %v1218_v52 = vld [vmem:[%s5055_s3 + $0x38] sm:$0xff] }
 0x167   :  { %v485_v53 = vpop.permute.xlu1 %484  ;;  %v483_v54 = vpop.permute.xlu0 %482 }
 0x168   :  { %512 = vst.msk [vmem:[#allocation5 + $0x79] sm:$0xff] %vm294_vm10, %v485_v53  ;;  %511 = vst.msk [vmem:[#allocation5 + $0x71] sm:$0xff] %vm294_vm10, %v483_v54  ;;  %v3132_v53 = vpack.c.bf16 %v1218_v52, %v1217_v51 }
 0x16b   :  { %v527_v55 = vpop.permute.xlu1 %526 }
 0x16c   :  { %v487_v56 = vpop.permute.xlu0 %486  ;;  %555 = vst.msk [vmem:[#allocation5 + $0x70] sm:$0xff] %vm341_vm12, %v527_v55  ;;  %v1235_v55 = vld [vmem:[%s5055_s3 + $0xc0] sm:$0xff] }
 0x16d   :  { %513 = vst.msk [vmem:[#allocation5 + $0x81] sm:$0xff] %vm294_vm10, %v487_v56  ;;  %v1236_v56 = vld [vmem:[%s5055_s3 + $0xc8] sm:$0xff] }
 0x16f   :  { %v401_v57 = vpop.permute.xlu1 %400 }
 0x170   :  { %v531_v58 = vpop.permute.xlu0 %530  ;;  %426 = vst.msk [vmem:[#allocation5 + $0x8b] sm:$0xff] %vm200_vm8, %v401_v57 }
 0x171   :  { %557 = vst.msk [vmem:[#allocation5 + $0x80] sm:$0xff] %vm341_vm12, %v531_v58 }
 0x173   :  { %v489_v59 = vpop.permute.xlu1 %488  ;;  %v576_v61 = vld [vmem:[#allocation5 + $0x70] sm:$0xff] }
 0x174   :  { %v445_v60 = vpop.permute.xlu0 %444  ;;  %3054 = vmatmul.mubr.msk.f32.gmra.mrb[28].mxu0 %vm598_vm14, %v576_v61 }
 0x175   :  { %470 = vst.msk [vmem:[#allocation5 + $0x8a] sm:$0xff] %vm247_vm9, %v445_v60  ;;  %3056 = vmatprep.mubr.msk.f32.mxu0 %vm3830_vm1, %v3831_v22  ;;  %v1219_v60 = vld [vmem:[%s5055_s3 + $0x40] sm:$0xff] }
 0x176   :  { %514 = vst.msk [vmem:[#allocation5 + $0x89] sm:$0xff] %vm294_vm10, %v489_v59  ;;  %v3134_v59 = vpack.c.bf16 %v1236_v56, %v1235_v55 }
 0x177   :  { %v533_v62 = vpop.permute.xlu1 %532 }
 0x178   :  { %v529_v63 = vpop.permute.xlu0 %528  ;;  %v578_v0 = vld [vmem:[#allocation5 + $0x80] sm:$0xff]  ;;  %558 = vst.msk [vmem:[#allocation5 + $0x88] sm:$0xff] %vm341_vm12, %v533_v62  ;;  %v1220_v62 = vld [vmem:[%s5055_s3 + $0x48] sm:$0xff] }
 0x179   :  { %556 = vst.msk [vmem:[#allocation5 + $0x78] sm:$0xff] %vm341_vm12, %v529_v63  ;;  %3060 = vmatmul.mubr.msk.f32.vlgmr.msra.gmra.mrb[0].mxu1 %vm598_vm14, %v578_v0  ;;  %v3136_v63 = vpack.c.bf16 %v1220_v62, %v1219_v60 }
 0x17a   :  { %3062 = vmatprep.mubr.msk.f32.mxu1 %vm3830_vm1, %v3831_v22 }
 0x17b   :  { %v447_v2 = vpop.permute.xlu1 %446 }
 0x17c   :  { %v403_v1 = vpop.permute.xlu0 %402 }
 0x17d   :  { %427 = vst.msk [vmem:[#allocation5 + $0x93] sm:$0xff] %vm200_vm8, %v403_v1  ;;  %v1237_v1 = vld [vmem:[%s5055_s3 + $0xd0] sm:$0xff] }
 0x17e   :  { %471 = vst.msk [vmem:[#allocation5 + $0x92] sm:$0xff] %vm247_vm9, %v447_v2  ;;  %v1238_v2 = vld [vmem:[%s5055_s3 + $0xd8] sm:$0xff] }
 0x17f   :  { %v579_v5 = vld [vmem:[#allocation5 + $0x88] sm:$0xff]  ;;  %v535_v6 = vpop.permute.xlu1 %534 }
 0x180   :  { %v491_v3 = vpop.permute.xlu0 %490  ;;  %v577_v4 = vld [vmem:[#allocation5 + $0x78] sm:$0xff]  ;;  %3063 = vmatmul.mubr.msk.f32.gmra.mrb[2].mxu1 %vm598_vm14, %v579_v5  ;;  %v3138_v5 = vpack.c.bf16 %v1238_v2, %v1237_v1 }
 0x181   :  { %515 = vst.msk [vmem:[#allocation5 + $0x91] sm:$0xff] %vm294_vm10, %v491_v3  ;;  %3057 = vmatmul.mubr.msk.f32.gmra.mrb[30].mxu0 %vm598_vm14, %v577_v4  ;;  %3065 = vmatprep.mubr.msk.f32.mxu1 %vm3830_vm1, %v3831_v22 }
 0x182   :  { %559 = vst.msk [vmem:[#allocation5 + $0x90] sm:$0xff] %vm341_vm12, %v535_v6  ;;  %v1221_v6 = vld [vmem:[%s5055_s3 + $0x50] sm:$0xff] }
 0x183   :  { %v449_v8 = vpop.permute.xlu1 %448 }
 0x184   :  { %v405_v7 = vpop.permute.xlu0 %404 }
 0x185   :  { %428 = vst.msk [vmem:[#allocation5 + $0x9b] sm:$0xff] %vm200_vm8, %v405_v7  ;;  %v1222_v7 = vld [vmem:[%s5055_s3 + $0x58] sm:$0xff]  ;;  %vm1068_vm8 = vcmask 523270  }
 0x186   :  { %472 = vst.msk [vmem:[#allocation5 + $0x9a] sm:$0xff] %vm247_vm9, %v449_v8  ;;  %v3140_v8 = vpack.c.bf16 %v1222_v7, %v1221_v6  ;;  %vm1139_vm9 = vcmask 1040384  }
 0x187   :  { %v537_v10 = vpop.permute.xlu1 %536 }
 0x188   :  { %v493_v9 = vpop.permute.xlu0 %492 }
 0x189   :  { %516 = vst.msk [vmem:[#allocation5 + $0x99] sm:$0xff] %vm294_vm10, %v493_v9  ;;  %v580_v11 = vld [vmem:[#allocation5 + $0x90] sm:$0xff]  ;;  %vm1077_vm10 = vcmask 1042432  }
 0x18a   :  { %560 = vst.msk [vmem:[#allocation5 + $0x98] sm:$0xff] %vm341_vm12, %v537_v10  ;;  %3066 = vmatmul.mubr.msk.f32.gmra.mrb[4].mxu1 %vm598_vm14, %v580_v11  ;;  %v1239_v10 = vld [vmem:[%s5055_s3 + $0xe0] sm:$0xff]  ;;  %v1240_v11 = vld [vmem:[%s5055_s3 + $0xe8] sm:$0xff] }
 0x18b   :  { %3068 = vmatprep.mubr.msk.f32.mxu1 %vm3830_vm1, %v3831_v22  ;;  %v451_v13 = vpop.permute.xlu1 %450 }
 0x18c   :  { %v407_v12 = vpop.permute.xlu0 %406 }
 0x18d   :  { %429 = vst.msk [vmem:[#allocation5 + $0xa3] sm:$0x1f] %vm210_vm15, %v407_v12  ;;  %v1223_v12 = vld [vmem:[%s5055_s3 + $0x60] sm:$0xff]  ;;  %vm1113_vm15 = vcmask 1043968  }
 0x18e   :  { %473 = vst.msk [vmem:[#allocation5 + $0xa2] sm:$0x3f] %vm257_vm0, %v451_v13  ;;  %v3142_v13 = vpack.c.bf16 %v1240_v11, %v1239_v10  ;;  %vm1566_vm0 = vcmask 517120  }
 0x18f   :  { %v539_v15 = vpop.permute.xlu1 %538 }
 0x190   :  { %v495_v14 = vpop.permute.xlu0 %494 }
 0x191   :  { %517 = vst.msk [vmem:[#allocation5 + $0xa1] sm:$0x7f] %vm304_vm3, %v495_v14  ;;  %v581_v16 = vld [vmem:[#allocation5 + $0x98] sm:$0xff] }
 0x192   :  { %561 = vst.msk [vmem:[#allocation5 + $0xa0] sm:$0xff] %vm341_vm12, %v539_v15  ;;  %3069 = vmatmul.mubr.msk.f32.gmra.mrb[6].mxu1 %vm598_vm14, %v581_v16  ;;  %v1224_v14 = vld [vmem:[%s5055_s3 + $0x68] sm:$0xff]  ;;  %vm969_vm12 = vcmask 1048064  }
 0x193   :  { %3071 = vmatprep.mubr.msk.f32.mxu1 %vm3830_vm1, %v3831_v22  ;;  %v1228_v22 = vld [vmem:[%s5055_s3 + $0x88] sm:$0xff]  ;;  %v3144_v15 = vpack.c.bf16 %v1224_v14, %v1223_v12  ;;  %vm997_vm1 = vcmask 1044480  }
 0x194   :  { %v3118_v25 = vpack.c.bf16 %v1228_v22, %v1227_v24  ;;  %v1225_v24 = vld [vmem:[%s5055_s3 + $0x70] sm:$0xff]  ;;  %v1226_v22 = vld [vmem:[%s5055_s3 + $0x78] sm:$0xff] }
 0x195   :  { %v3148_v26 = vpack.c.bf16 %v1226_v22, %v1225_v24 }
 0x196   :  { %3119 = vmatprep.subr.bf16.mxu1 %v3118_v25 }
 0x197   :  { %3121 = vmatpush3.bf16.msra.mxu1 %v3120_v28 }
 0x198   :  { %3123 = vmatprep.subr.bf16.mxu1 %v3122_v32 }
 0x199   :  { %v582_v17 = vld [vmem:[#allocation5 + $0xa0] sm:$0xff] }
 0x19a   :  { %3072 = vmatmul.mubr.msk.f32.gmra.mrb[8].mxu1 %vm598_vm14, %v582_v17  ;;  %vm1107_vm14 = vcmask 1048070  }
 0x19b   :  { %3125 = vmatpush3.bf16.msra.mxu1 %v3124_v37 }
 0x19c   :  { %3127 = vmatprep.subr.bf16.mxu1 %v3126_v42 }
 0x19f   :  { %3129 = vmatpush3.bf16.msra.mxu1 %v3128_v44 }
 0x1a0   :  { %3131 = vmatprep.subr.bf16.mxu1 %v3130_v50 }
 0x1a3   :  { %3133 = vmatpush3.bf16.msra.mxu1 %v3132_v53 }
 0x1a4   :  { %3135 = vmatprep.subr.bf16.mxu1 %v3134_v59 }
 0x1a7   :  { %3137 = vmatpush3.bf16.msra.mxu1 %v3136_v63 }
 0x1a8   :  { %3139 = vmatprep.subr.bf16.mxu1 %v3138_v5 }
 0x1ab   :  { %3141 = vmatpush3.bf16.msra.mxu1 %v3140_v8 }
 0x1ac   :  { %3143 = vmatprep.subr.bf16.mxu1 %v3142_v13 }
 0x1af   :  { %3145 = vmatpush3.bf16.msra.mxu1 %v3144_v15 }
 0x1cc   :  { %v732_v19 = vpop.f32.mrb[0].mxu0 }
 0x1cd   :  { %v733_v20 = vadd.f32 %v4446_v18, %v732_v19  ;;  %v3013_v21 = vpop.f32.mrb[1].mxu0 }
 0x1ce   :  { %v1242_v21 = vld [vmem:[%s5055_s3 + $0xf8] sm:$0xff] }
 0x1cf   :  { %v836_v23 = vmax.f32 %v733_v20, 0.0  ;;  %v1241_v20 = vld [vmem:[%s5055_s3 + $0xf0] sm:$0xff] }
 0x1d1   :  { %858 = vst.msk [vmem:[#allocation6] sm:$0xff] %vm857_vm4, %v836_v23  ;;  %v3146_v23 = vpack.c.bf16 %v1242_v21, %v1241_v20 }
 0x1d3   :  { %3147 = vmatprep.subr.bf16.mxu1 %v3146_v23 }
 0x1d4   :  { %v737_v31 = vpop.f32.mrb[2].mxu0  ;;  %3149 = vmatpush3.bf16.msra.mxu1 %v3148_v26 }
 0x1d5   :  { %v738_v35 = vadd.f32 %v4446_v18, %v737_v31  ;;  %v3016_v36 = vpop.f32.mrb[3].mxu0 }
 0x1d7   :  { %v837_v38 = vmax.f32 %v738_v35, 0.0 }
 0x1d9   :  { %859 = vst.msk [vmem:[#allocation6 + $0x8] sm:$0xff] %vm857_vm4, %v837_v38 }
 0x1dc   :  { %v742_v45 = vpop.f32.mrb[4].mxu0 }
 0x1dd   :  { %v743_v48 = vadd.f32 %v4446_v18, %v742_v45  ;;  %v3019_v49 = vpop.f32.mrb[5].mxu0 }
 0x1df   :  { %v838_v54 = vmax.f32 %v743_v48, 0.0 }
 0x1e0   :  { %v879_v57 = vld [vmem:[#allocation6] ss:$2 sm:$0xff]  ;;  %v901_v58 = vld [vmem:[#allocation6 + $0x1] ss:$2 sm:$0xff] }
 0x1e1   :  { %860 = vst.msk [vmem:[#allocation6 + $0x10] sm:$0xff] %vm857_vm4, %v838_v54  ;;  %v4511_v61 = vmax.f32 %v879_v57, %v901_v58 }
 0x1e3   :  { %933 = vst.msk [vmem:[#allocation7] sm:$0xff] %vm857_vm4, %v4511_v61  ;;  %v998_v30 = vrot.slane %v4511_v61, 3  ;;  %v1029_v31 = vrot.slane %v4511_v61, 4  ;;  %v945_v32 = vrot.slane %v4511_v61, 1  ;;  %v977_v38 = vrot.slane %v4511_v61, 2 }
 0x1e4   :  { %v747_v0 = vpop.f32.mrb[6].mxu0 }
 0x1e5   :  { %v748_v3 = vadd.f32 %v4446_v18, %v747_v0  ;;  %v3022_v4 = vpop.f32.mrb[7].mxu0 }
 0x1e7   :  { %v839_v9 = vmax.f32 %v748_v3, 0.0 }
 0x1e9   :  { %861 = vst.msk [vmem:[#allocation6 + $0x18] sm:$0xff] %vm857_vm4, %v839_v9 }
 0x1ec   :  { %v752_v16 = vpop.f32.mrb[8].mxu0 }
 0x1ed   :  { %v753_v17 = vadd.f32 %v4446_v18, %v752_v16  ;;  %v3025_v19 = vpop.f32.mrb[9].mxu0 }
 0x1ef   :  { %v840_v25 = vmax.f32 %v753_v17, 0.0 }
 0x1f0   :  { %v881_v27 = vld [vmem:[#allocation6 + $0x10] ss:$2 sm:$0xff]  ;;  %v903_v28 = vld [vmem:[#allocation6 + $0x11] ss:$2 sm:$0xff] }
 0x1f1   :  { %862 = vst.msk [vmem:[#allocation6 + $0x20] sm:$0xff] %vm857_vm4, %v840_v25  ;;  %v923_v29 = vmax.f32 %v881_v27, %v903_v28 }
 0x1f3   :  { %v999_v33 = vrot.slane %v923_v29, 3  ;;  %v1030_v34 = vrot.slane %v923_v29, 4  ;;  %934 = vst.msk [vmem:[#allocation7 + $0x18] sm:$0xff] %vm857_vm4, %v923_v29  ;;  %v946_v35 = vrot.slane %v923_v29, 1  ;;  %v978_v36 = vrot.slane %v923_v29, 2 }
 0x1f4   :  { %v757_v37 = vpop.f32.mrb[10].mxu0 }
 0x1f5   :  { %v758_v39 = vadd.f32 %v4446_v18, %v757_v37  ;;  %v3028_v40 = vpop.f32.mrb[11].mxu0  ;;  %v1000_v41 = vsel %vm997_vm1, %v998_v30, %v999_v33  ;;  %v1031_v42 = vsel %vm662_vm2, %v1029_v31, %v1030_v34  ;;  %v947_v43 = vsel %vm944_vm5, %v945_v32, %v946_v35 }
 0x1f6   :  { %1009 = vrot.lane.b32.xlu0 %v1000_v41, %s3835_s17  ;;  %1045 = vst.msk [vmem:[#allocation7 + $0x10] sm:$0xff] %vm857_vm4, %v1031_v42  ;;  %954 = vrot.lane.b32.xlu1 %v947_v43, %s3835_s17  ;;  %v979_v44 = vsel %vm976_vm6, %v977_v38, %v978_v36 }
 0x1f7   :  { %v841_v45 = vmax.f32 %v758_v39, 0.0  ;;  %991 = vst.msk [vmem:[#allocation7 + $0x8] sm:$0xff] %vm857_vm4, %v979_v44 }
 0x1f9   :  { %863 = vst.msk [vmem:[#allocation6 + $0x28] sm:$0xff] %vm857_vm4, %v841_v45 }
 0x1fc   :  { %v762_v46 = vpop.f32.mrb[12].mxu0 }
 0x1fd   :  { %v763_v47 = vadd.f32 %v4446_v18, %v762_v46  ;;  %v3031_v48 = vpop.f32.mrb[13].mxu0 }
 0x1ff   :  { %v842_v49 = vmax.f32 %v763_v47, 0.0 }
 0x200   :  { %v883_v50 = vld [vmem:[#allocation6 + $0x20] ss:$2 sm:$0xff]  ;;  %v905_v51 = vld [vmem:[#allocation6 + $0x21] ss:$2 sm:$0xff] }
 0x201   :  { %864 = vst.msk [vmem:[#allocation6 + $0x30] sm:$0xff] %vm857_vm4, %v842_v49  ;;  %v924_v52 = vmax.f32 %v883_v50, %v905_v51 }
 0x203   :  { %v1001_v53 = vrot.slane %v924_v52, 3  ;;  %v1032_v54 = vrot.slane %v924_v52, 4  ;;  %935 = vst.msk [vmem:[#allocation7 + $0x30] sm:$0xff] %vm857_vm4, %v924_v52  ;;  %v948_v55 = vrot.slane %v924_v52, 1  ;;  %v980_v56 = vrot.slane %v924_v52, 2 }
 0x204   :  { %v767_v57 = vpop.f32.mrb[14].mxu0 }
 0x205   :  { %v768_v58 = vadd.f32 %v4446_v18, %v767_v57  ;;  %v3034_v59 = vpop.f32.mrb[15].mxu0  ;;  %v1002_v60 = vsel %vm997_vm1, %v999_v33, %v1001_v53  ;;  %v1033_v61 = vsel %vm662_vm2, %v1030_v34, %v1032_v54  ;;  %v949_v62 = vsel %vm944_vm5, %v946_v35, %v948_v55 }
 0x206   :  { %1046 = vst.msk [vmem:[#allocation7 + $0x28] sm:$0xff] %vm857_vm4, %v1033_v61  ;;  %1011 = vrot.lane.b32.xlu0 %v1002_v60, %s3835_s17  ;;  %956 = vrot.lane.b32.xlu1 %v949_v62, %s3835_s17  ;;  %v981_v63 = vsel %vm976_vm6, %v978_v36, %v980_v56  ;;  %v1243_v61 = vld [vmem:[%s5055_s3 + $0x100] sm:$0xff]  ;;  %v1244_v62 = vld [vmem:[%s5055_s3 + $0x108] sm:$0xff] }
 0x207   :  { %v843_v0 = vmax.f32 %v768_v58, 0.0  ;;  %992 = vst.msk [vmem:[#allocation7 + $0x20] sm:$0xff] %vm857_vm4, %v981_v63 }
 0x209   :  { %865 = vst.msk [vmem:[#allocation6 + $0x38] sm:$0xff] %vm857_vm4, %v843_v0 }
 0x20c   :  { %v772_v1 = vpop.f32.mrb[16].mxu0 }
 0x20d   :  { %v773_v2 = vadd.f32 %v4446_v18, %v772_v1  ;;  %v3037_v3 = vpop.f32.mrb[17].mxu0 }
 0x20e   :  { %v4641_v3 = vpack.c.bf16 %v1244_v62, %v1243_v61  ;;  %v1246_v61 = vld [vmem:[%s5055_s3 + $0x118] sm:$0xff] }
 0x20f   :  { %v844_v4 = vmax.f32 %v773_v2, 0.0 }
 0x210   :  { %v885_v5 = vld [vmem:[#allocation6 + $0x30] ss:$2 sm:$0xff]  ;;  %v907_v6 = vld [vmem:[#allocation6 + $0x31] ss:$2 sm:$0xff]  ;;  %3151 = vmatprep.subr.bf16.mxu1 %v4641_v3 }
 0x211   :  { %866 = vst.msk [vmem:[#allocation6 + $0x40] sm:$0xff] %vm857_vm4, %v844_v4  ;;  %v925_v7 = vmax.f32 %v885_v5, %v907_v6 }
 0x213   :  { %v1003_v8 = vrot.slane %v925_v7, 3  ;;  %936 = vst.msk [vmem:[#allocation7 + $0x48] sm:$0xff] %vm857_vm4, %v925_v7  ;;  %v950_v9 = vrot.slane %v925_v7, 1  ;;  %v982_v10 = vrot.slane %v925_v7, 2  ;;  %v1034_v11 = vrot.slane %v925_v7, 4 }
 0x214   :  { %v777_v12 = vpop.f32.mrb[18].mxu0 }
 0x215   :  { %v778_v13 = vadd.f32 %v4446_v18, %v777_v12  ;;  %v3040_v14 = vpop.f32.mrb[19].mxu0  ;;  %v1004_v15 = vsel %vm997_vm1, %v1001_v53, %v1003_v8  ;;  %v951_v16 = vsel %vm944_vm5, %v948_v55, %v950_v9  ;;  %v983_v17 = vsel %vm976_vm6, %v980_v56, %v982_v10 }
 0x216   :  { %1013 = vrot.lane.b32.xlu0 %v1004_v15, %s3835_s17  ;;  %958 = vrot.lane.b32.xlu1 %v951_v16, %s3835_s17  ;;  %993 = vst.msk [vmem:[#allocation7 + $0x38] sm:$0xff] %vm857_vm4, %v983_v17  ;;  %v1035_v19 = vsel %vm662_vm2, %v1032_v54, %v1034_v11 }
 0x217   :  { %v845_v20 = vmax.f32 %v778_v13, 0.0  ;;  %1047 = vst.msk [vmem:[#allocation7 + $0x40] sm:$0xff] %vm857_vm4, %v1035_v19 }
 0x219   :  { %867 = vst.msk [vmem:[#allocation6 + $0x48] sm:$0xff] %vm857_vm4, %v845_v20 }
 0x21c   :  { %v782_v21 = vpop.f32.mrb[20].mxu0 }
 0x21d   :  { %v783_v23 = vadd.f32 %v4446_v18, %v782_v21  ;;  %v3043_v24 = vpop.f32.mrb[21].mxu0 }
 0x21f   :  { %v846_v22 = vmax.f32 %v783_v23, 0.0 }
 0x220   :  { %v887_v25 = vld [vmem:[#allocation6 + $0x40] ss:$2 sm:$0xff]  ;;  %v909_v26 = vld [vmem:[#allocation6 + $0x41] ss:$2 sm:$0xff] }
 0x221   :  { %868 = vst.msk [vmem:[#allocation6 + $0x50] sm:$0xff] %vm857_vm4, %v846_v22  ;;  %v926_v27 = vmax.f32 %v887_v25, %v909_v26 }
 0x223   :  { %v952_v28 = vrot.slane %v926_v27, 1  ;;  %v1036_v29 = vrot.slane %v926_v27, 4  ;;  %938 = vst.msk [vmem:[#allocation7 + $0x60] sm:$0x3f] %vm937_vm7, %v926_v27  ;;  %v984_v30 = vrot.slane %v926_v27, 2  ;;  %v1005_v32 = vrot.slane %v926_v27, 3 }
 0x224   :  { %v787_v31 = vpop.f32.mrb[22].mxu0 }
 0x225   :  { %v788_v33 = vadd.f32 %v4446_v18, %v787_v31  ;;  %962 = vrot.lane.b32.xlu0 %v952_v28, %s3835_s17  ;;  %v3046_v34 = vpop.f32.mrb[23].mxu0  ;;  %v953_v35 = vsel %vm944_vm5, %v950_v9, %v952_v28  ;;  %v1037_v36 = vsel %vm662_vm2, %v1034_v11, %v1036_v29  ;;  %995 = vst.msk [vmem:[#allocation7 + $0x68] sm:$0x3f] %vm937_vm7, %v984_v30 }
 0x226   :  { %960 = vrot.lane.b32.xlu1 %v953_v35, %s3835_s17  ;;  %1048 = vst.msk [vmem:[#allocation7 + $0x58] sm:$0xff] %vm857_vm4, %v1037_v36  ;;  %v985_v37 = vsel %vm976_vm6, %v982_v10, %v984_v30  ;;  %v1006_v39 = vsel %vm997_vm1, %v1003_v8, %v1005_v32 }
 0x227   :  { %v847_v38 = vmax.f32 %v788_v33, 0.0  ;;  %994 = vst.msk [vmem:[#allocation7 + $0x50] sm:$0xff] %vm857_vm4, %v985_v37 }
 0x229   :  { %869 = vst.msk [vmem:[#allocation6 + $0x58] sm:$0xff] %vm857_vm4, %v847_v38  ;;  %1015 = vrot.lane.b32.xlu0 %v1006_v39, %s3835_s17 }
 0x22c   :  { %v792_v40 = vpop.f32.mrb[24].mxu0 }
 0x22d   :  { %v793_v41 = vadd.f32 %v4446_v18, %v792_v40  ;;  %v3049_v42 = vpop.f32.mrb[25].mxu0 }
 0x22f   :  { %v848_v43 = vmax.f32 %v793_v41, 0.0 }
 0x230   :  { %v889_v44 = vld [vmem:[#allocation6 + $0x50] ss:$2 sm:$0xff]  ;;  %v911_v45 = vld [vmem:[#allocation6 + $0x51] ss:$2 sm:$0xff] }
 0x231   :  { %870 = vst.msk [vmem:[#allocation6 + $0x60] sm:$0xff] %vm857_vm4, %v848_v43  ;;  %v927_v46 = vmax.f32 %v889_v44, %v911_v45 }
 0x233   :  { %v1140_v47 = vrot.slane %v927_v46, 7  ;;  %v1007_v48 = vrot.slane %v927_v46, 3  ;;  %v1038_v49 = vrot.slane %v927_v46, 4  ;;  %1175 = vst.msk [vmem:[#allocation7 + $0x70] sm:$0xc0] %vm1068_vm8, %v927_v46  ;;  %v1116_v51 = vrot.slane %v927_v46, 6 }
 0x234   :  { %v797_v50 = vpop.f32.mrb[26].mxu0  ;;  %v1078_v57 = vrot.slane %v927_v46, 5 }
 0x235   :  { %v798_v52 = vadd.f32 %v4446_v18, %v797_v50  ;;  %1151 = vrot.lane.b32.xlu1 %v1140_v47, %s3835_s17  ;;  %v3052_v53 = vpop.f32.mrb[27].mxu0  ;;  %v1008_v54 = vsel %vm997_vm1, %v1005_v32, %v1007_v48  ;;  %v1039_v55 = vsel %vm662_vm2, %v1036_v29, %v1038_v49  ;;  %1069 = vst.msk [vmem:[#allocation7 + $0x60] sm:$0xc0] %vm1068_vm8, %v1038_v49  ;;  %1133 = vst.msk [vmem:[#allocation7 + $0x68] sm:$0xc0] %vm1068_vm8, %v1116_v51 }
 0x236   :  { %1017 = vrot.lane.b32.xlu0 %v1008_v54, %s3835_s17  ;;  %1049 = vst.msk [vmem:[#allocation7 + $0x70] sm:$0x3f] %vm937_vm7, %v1039_v55 }
 0x237   :  { %v849_v56 = vmax.f32 %v798_v52, 0.0 }
 0x239   :  { %871 = vst.msk [vmem:[#allocation6 + $0x68] sm:$0xff] %vm857_vm4, %v849_v56  ;;  %1089 = vrot.lane.b32.xlu1 %v1078_v57, %s3835_s17 }
 0x240   :  { %v891_v58 = vld [vmem:[#allocation6 + $0x60] ss:$2 sm:$0xff]  ;;  %v913_v59 = vld [vmem:[#allocation6 + $0x61] ss:$2 sm:$0xff] }
 0x241   :  { %v4627_v60 = vmax.f32 %v891_v58, %v913_v59 }
 0x243   :  { %v1141_v63 = vrot.slane %v4627_v60, 7  ;;  %1176 = vst.msk [vmem:[#allocation7 + $0x88] sm:$0xff] %vm857_vm4, %v4627_v60  ;;  %v1079_v0 = vrot.slane %v4627_v60, 5  ;;  %v1117_v1 = vrot.slane %v4627_v60, 6  ;;  %v1054_v2 = vrot.slane %v4627_v60, 4  ;;  %v1245_v60 = vld [vmem:[%s5055_s3 + $0x110] sm:$0xff] }
 0x245   :  { %v1142_v4 = vsel %vm1139_vm9, %v1140_v47, %v1141_v63  ;;  %v1080_v5 = vsel %vm1077_vm10, %v1078_v57, %v1079_v0  ;;  %v1118_v6 = vsel %vm1115_vm11, %v1116_v51, %v1117_v1  ;;  %v1055_v7 = vsel %vm662_vm2, %v1038_v49, %v1054_v2 }
 0x246   :  { %1153 = vrot.lane.b32.xlu0 %v1142_v4, %s3835_s17  ;;  %1091 = vrot.lane.b32.xlu1 %v1080_v5, %s3835_s17  ;;  %1134 = vst.msk [vmem:[#allocation7 + $0x80] sm:$0xff] %vm857_vm4, %v1118_v6  ;;  %1070 = vst.msk [vmem:[#allocation7 + $0x78] sm:$0xff] %vm857_vm4, %v1055_v7  ;;  %v1247_v5 = vld [vmem:[%s5055_s3 + $0x120] sm:$0xff]  ;;  %v1248_v6 = vld [vmem:[%s5055_s3 + $0x128] sm:$0xff] }
 0x247   :  { %v802_v8 = vpop.f32.mrb[28].mxu0 }
 0x248   :  { %v803_v9 = vadd.f32 %v4446_v18, %v802_v8  ;;  %v3055_v10 = vpop.f32.mrb[29].mxu0 }
 0x24a   :  { %v850_v11 = vmax.f32 %v803_v9, 0.0 }
 0x24c   :  { %v812_v12 = vpop.f32.mrb[0].mxu1  ;;  %872 = vst.msk [vmem:[#allocation6 + $0x70] sm:$0xff] %vm857_vm4, %v850_v11  ;;  %v3158_v11 = vpack.c.bf16 %v1248_v6, %v1247_v5  ;;  %v1192_v5 = vld [vmem:[#allocation7 + $0x58] sm:$0xff]  ;;  %v1195_v6 = vld [vmem:[#allocation7 + $0x70] sm:$0xff] }
 0x24d   :  { %v813_v13 = vadd.f32 %v4446_v18, %v812_v12  ;;  %v3061_v14 = vpop.f32.mrb[1].mxu1 }
 0x24f   :  { %v852_v15 = vmax.f32 %v813_v13, 0.0 }
 0x251   :  { %874 = vst.msk [vmem:[#allocation6 + $0x80] sm:$0xff] %vm857_vm4, %v852_v15 }
 0x253   :  { %v817_v17 = vpop.f32.mrb[2].mxu1 }
 0x254   :  { %v807_v16 = vpop.f32.mrb[30].mxu0  ;;  %v818_v20 = vadd.f32 %v4446_v18, %v817_v17  ;;  %v3064_v23 = vpop.f32.mrb[3].mxu1 }
 0x255   :  { %v808_v19 = vadd.f32 %v4446_v18, %v807_v16  ;;  %v3058_v21 = vpop.f32.mrb[31].mxu0  ;;  %v1250_v16 = vld [vmem:[%s5055_s3 + $0x138] sm:$0xff] }
 0x256   :  { %v853_v22 = vmax.f32 %v818_v20, 0.0 }
 0x257   :  { %v851_v24 = vmax.f32 %v808_v19, 0.0 }
 0x258   :  { %875 = vst.msk [vmem:[#allocation6 + $0x88] sm:$0xff] %vm857_vm4, %v853_v22 }
 0x259   :  { %873 = vst.msk [vmem:[#allocation6 + $0x78] sm:$0xff] %vm857_vm4, %v851_v24 }
 0x25d   :  { %v822_v25 = vpop.f32.mrb[4].mxu1 }
 0x25e   :  { %v823_v26 = vadd.f32 %v4446_v18, %v822_v25  ;;  %v3067_v27 = vpop.f32.mrb[5].mxu1 }
 0x25f   :  { %v895_v32 = vld [vmem:[#allocation6 + $0x80] ss:$2 sm:$0xff]  ;;  %v917_v33 = vld [vmem:[#allocation6 + $0x81] ss:$2 sm:$0xff] }
 0x260   :  { %v854_v28 = vmax.f32 %v823_v26, 0.0  ;;  %v893_v29 = vld [vmem:[#allocation6 + $0x70] ss:$2 sm:$0xff]  ;;  %v915_v30 = vld [vmem:[#allocation6 + $0x71] ss:$2 sm:$0xff]  ;;  %v4662_v34 = vmax.f32 %v895_v32, %v917_v33 }
 0x261   :  { %v929_v31 = vmax.f32 %v893_v29, %v915_v30 }
 0x262   :  { %876 = vst.msk [vmem:[#allocation6 + $0x90] sm:$0xff] %vm857_vm4, %v854_v28  ;;  %v1145_v39 = vrot.slane %v4662_v34, 7  ;;  %1178 = vst.msk [vmem:[#allocation7 + $0xb8] sm:$0xff] %vm857_vm4, %v4662_v34  ;;  %v1083_v40 = vrot.slane %v4662_v34, 5  ;;  %v1121_v41 = vrot.slane %v4662_v34, 6  ;;  %v1058_v42 = vrot.slane %v4662_v34, 4 }
 0x263   :  { %v1143_v35 = vrot.slane %v929_v31, 7  ;;  %1177 = vst.msk [vmem:[#allocation7 + $0xa0] sm:$0xff] %vm857_vm4, %v929_v31  ;;  %v1081_v36 = vrot.slane %v929_v31, 5  ;;  %v1119_v37 = vrot.slane %v929_v31, 6  ;;  %v1056_v38 = vrot.slane %v929_v31, 4 }
 0x265   :  { %v827_v43 = vpop.f32.mrb[6].mxu1  ;;  %v1144_v44 = vsel %vm1139_vm9, %v1141_v63, %v1143_v35  ;;  %v1082_v45 = vsel %vm1077_vm10, %v1079_v0, %v1081_v36  ;;  %v1120_v46 = vsel %vm1115_vm11, %v1117_v1, %v1119_v37  ;;  %v1057_v47 = vsel %vm662_vm2, %v1054_v2, %v1056_v38 }
 0x266   :  { %v828_v48 = vadd.f32 %v4446_v18, %v827_v43  ;;  %v3070_v49 = vpop.f32.mrb[7].mxu1  ;;  %1155 = vrot.lane.b32.xlu0 %v1144_v44, %s3835_s17  ;;  %1093 = vrot.lane.b32.xlu1 %v1082_v45, %s3835_s17  ;;  %1135 = vst.msk [vmem:[#allocation7 + $0x98] sm:$0xff] %vm857_vm4, %v1120_v46  ;;  %1071 = vst.msk [vmem:[#allocation7 + $0x90] sm:$0xff] %vm857_vm4, %v1057_v47  ;;  %v1122_v50 = vsel %vm1115_vm11, %v1119_v37, %v1121_v41 }
 0x267   :  { %v1059_v51 = vsel %vm662_vm2, %v1056_v38, %v1058_v42  ;;  %1136 = vst.msk [vmem:[#allocation7 + $0xb0] sm:$0xff] %vm857_vm4, %v1122_v50  ;;  %v1146_v55 = vsel %vm1139_vm9, %v1143_v35, %v1145_v39  ;;  %v1084_v56 = vsel %vm1077_vm10, %v1081_v36, %v1083_v40  ;;  %v3154_v2 = vpack.c.bf16 %v1246_v61, %v1245_v60 }
 0x268   :  { %v855_v52 = vmax.f32 %v828_v48, 0.0  ;;  %1072 = vst.msk [vmem:[#allocation7 + $0xa8] sm:$0xff] %vm857_vm4, %v1059_v51  ;;  %v1010_v53 = vpop.permute.xlu0 %1009  ;;  %v955_v54 = vpop.permute.xlu1 %954 }
 0x269   :  { %1024 = vst.msk [vmem:[#allocation7 + $0x8] sm:$0xff] %vm969_vm12, %v1010_v53  ;;  %970 = vst.msk [vmem:[#allocation7] sm:$0xff] %vm969_vm12, %v955_v54 }
 0x26a   :  { %877 = vst.msk [vmem:[#allocation6 + $0x98] sm:$0xff] %vm857_vm4, %v855_v52  ;;  %1157 = vrot.lane.b32.xlu0 %v1146_v55, %s3835_s17  ;;  %1095 = vrot.lane.b32.xlu1 %v1084_v56, %s3835_s17 }
 0x26d   :  { %v832_v57 = vpop.f32.mrb[8].mxu1 }
 0x26e   :  { %v833_v58 = vadd.f32 %v4446_v18, %v832_v57  ;;  %v3073_v59 = vpop.f32.mrb[9].mxu1 }
 0x270   :  { %v856_v62 = vmax.f32 %v833_v58, 0.0  ;;  %v1182_v63 = vld [vmem:[#allocation7 + $0x8] sm:$0xff]  ;;  %v1181_v0 = vld [vmem:[#allocation7] sm:$0xff] }
 0x271   :  { %v897_v1 = vld [vmem:[#allocation6 + $0x90] ss:$2 sm:$0xff]  ;;  %1352 = vmatprep.mubr.f32.mxu1 %v1182_v63  ;;  %v919_v4 = vld [vmem:[#allocation6 + $0x91] ss:$2 sm:$0xff] }
 0x272   :  { %878 = vst.msk [vmem:[#allocation6 + $0xa0] sm:$0xff] %vm857_vm4, %v856_v62  ;;  %1353 = vmatmul.mubr.f32.vlgmr.msra.gmra.mrb[10].mxu1 %v1181_v0  ;;  %v931_v18 = vmax.f32 %v897_v1, %v919_v4  ;;  %v1186_v4 = vld [vmem:[#allocation7 + $0x28] sm:$0xff] }
 0x273   :  { %3153 = vmatpush3.bf16.msra.mxu1 %v4641_v3  ;;  %v1249_v3 = vld [vmem:[%s5055_s3 + $0x130] sm:$0xff]  ;;  %s3837_s3 = smov [#allocation2]  }
 0x274   :  { %v1147_v7 = vrot.slane %v931_v18, 7  ;;  %1179 = vst.msk [vmem:[#allocation7 + $0xd0] sm:$0xff] %vm857_vm4, %v931_v18  ;;  %v1085_v8 = vrot.slane %v931_v18, 5  ;;  %3155 = vmatprep.subr.bf16.mxu1 %v3154_v2  ;;  %v1123_v9 = vrot.slane %v931_v18, 6  ;;  %v1060_v10 = vrot.slane %v931_v18, 4  ;;  %v1189_v18 = vld [vmem:[#allocation7 + $0x40] sm:$0xff] }
 0x275   :  { %v3162_v24 = vpack.c.bf16 %v1250_v16, %v1249_v3  ;;  %s114_s29 = sshll.u32 %s3837_s3, 4  ;;  %s115_s29 = int_to_ptr.vmem [resolvable:$true] %s114_s29 }
 0x276   :  { %v1148_v12 = vsel %vm1139_vm9, %v1145_v39, %v1147_v7  ;;  %v1086_v13 = vsel %vm1077_vm10, %v1083_v40, %v1085_v8  ;;  %v1124_v14 = vsel %vm1115_vm11, %v1121_v41, %v1123_v9  ;;  %v1061_v15 = vsel %vm662_vm2, %v1058_v42, %v1060_v10  ;;  %1075 = vst.msk [vmem:[#allocation7 + $0xd8] sm:$0xf] %vm1074_vm13, %v1060_v10 }
 0x277   :  { %1159 = vrot.lane.b32.xlu0 %v1148_v12, %s3835_s17  ;;  %1097 = vrot.lane.b32.xlu1 %v1086_v13, %s3835_s17  ;;  %1137 = vst.msk [vmem:[#allocation7 + $0xc8] sm:$0xff] %vm857_vm4, %v1124_v14  ;;  %1073 = vst.msk [vmem:[#allocation7 + $0xc0] sm:$0xff] %vm857_vm4, %v1061_v15  ;;  %vm974_vm2 = vcmask 1046016  }
 0x278   :  { %v1012_v17 = vpop.permute.xlu0 %1011  ;;  %v957_v19 = vpop.permute.xlu1 %956  ;;  %3157 = vmatpush3.bf16.msra.mxu1 %v3154_v2  ;;  %v1183_v2 = vld [vmem:[#allocation7 + $0x10] sm:$0xff] }
 0x279   :  { %v899_v20 = vld [vmem:[#allocation6 + $0xa0] ss:$2 sm:$0xf]  ;;  %v921_v21 = vld [vmem:[#allocation6 + $0xa1] ss:$2 sm:$0xf]  ;;  %3159 = vmatprep.subr.bf16.mxu1 %v3158_v11 }
 0x27a   :  { %1025 = vst.msk [vmem:[#allocation7 + $0x20] sm:$0xff] %vm969_vm12, %v1012_v17  ;;  %971 = vst.msk [vmem:[#allocation7 + $0x18] sm:$0xff] %vm969_vm12, %v957_v19  ;;  %v932_v23 = vmax.f32 %v899_v20, %v921_v21 }
 0x27b   :  { %v1207_v10 = vld [vmem:[#allocation7 + $0xd0] sm:$0xff] }
 0x27c   :  { %v1149_v22 = vrot.slane %v932_v23, 7  ;;  %v1087_v25 = vrot.slane %v932_v23, 5  ;;  %v1125_v26 = vrot.slane %v932_v23, 6  ;;  %1180 = vst.msk [vmem:[#allocation7 + $0xe8] sm:$0xf] %vm1074_vm13, %v932_v23  ;;  %3161 = vmatpush3.bf16.msra.mxu1 %v3158_v11 }
 0x27d   :  { %3163 = vmatprep.subr.bf16.mxu1 %v3162_v24 }
 0x27e   :  { %v1150_v27 = vsel %vm1139_vm9, %v1147_v7, %v1149_v22  ;;  %v1088_v28 = vsel %vm1077_vm10, %v1085_v8, %v1087_v25  ;;  %v1126_v29 = vsel %vm1115_vm11, %v1123_v9, %v1125_v26  ;;  %v1198_v7 = vld [vmem:[#allocation7 + $0x88] sm:$0xff]  ;;  %v1201_v8 = vld [vmem:[#allocation7 + $0xa0] sm:$0xff]  ;;  %v1204_v9 = vld [vmem:[#allocation7 + $0xb8] sm:$0xff] }
 0x27f   :  { %1161 = vrot.lane.b32.xlu0 %v1150_v27, %s3835_s17  ;;  %1099 = vrot.lane.b32.xlu1 %v1088_v28, %s3835_s17  ;;  %1138 = vst.msk [vmem:[#allocation7 + $0xe0] sm:$0xf] %vm1074_vm13, %v1126_v29 }
 0x280   :  { %3165 = vmatpush3.bf16.msra.mxu1 %v3162_v24 }
 0x281   :  { %v1185_v30 = vld [vmem:[#allocation7 + $0x20] sm:$0xff]  ;;  %v1184_v31 = vld [vmem:[#allocation7 + $0x18] sm:$0xff] }
 0x282   :  { %1357 = vmatprep.mubr.f32.mxu1 %v1185_v30 }
 0x283   :  { %1358 = vmatmul.mubr.f32.gmra.mrb[12].mxu1 %v1184_v31  ;;  %v1210_v11 = vld [vmem:[#allocation7 + $0xe8] sm:$0xf] }
 0x288   :  { %v1014_v32 = vpop.permute.xlu0 %1013  ;;  %v959_v33 = vpop.permute.xlu1 %958 }
 0x289   :  { %1026 = vst.msk [vmem:[#allocation7 + $0x38] sm:$0xff] %vm969_vm12, %v1014_v32  ;;  %972 = vst.msk [vmem:[#allocation7 + $0x30] sm:$0xff] %vm969_vm12, %v959_v33 }
 0x290   :  { %v1188_v34 = vld [vmem:[#allocation7 + $0x38] sm:$0xff]  ;;  %v1187_v35 = vld [vmem:[#allocation7 + $0x30] sm:$0xff] }
 0x291   :  { %1362 = vmatprep.mubr.f32.mxu1 %v1188_v34 }
 0x292   :  { %1363 = vmatmul.mubr.f32.gmra.mrb[14].mxu1 %v1187_v35 }
 0x297   :  { %v963_v36 = vpop.permute.xlu0 %962 }
 0x298   :  { %975 = vst.msk [vmem:[#allocation7 + $0x60] sm:$0x3f] %vm974_vm2, %v963_v36  ;;  %v961_v37 = vpop.permute.xlu1 %960 }
 0x299   :  { %973 = vst.msk [vmem:[#allocation7 + $0x48] sm:$0xff] %vm969_vm12, %v961_v37 }
 0x29b   :  { %v1016_v38 = vpop.permute.xlu0 %1015 }
 0x29c   :  { %1027 = vst.msk [vmem:[#allocation7 + $0x50] sm:$0xff] %vm969_vm12, %v1016_v38 }
 0x2a0   :  { %v1190_v40 = vld [vmem:[#allocation7 + $0x48] sm:$0xff] }
 0x2a3   :  { %v1191_v39 = vld [vmem:[#allocation7 + $0x50] sm:$0xff] }
 0x2a4   :  { %1367 = vmatprep.mubr.f32.mxu1 %v1191_v39 }
 0x2a5   :  { %1368 = vmatmul.mubr.f32.gmra.mrb[16].mxu1 %v1190_v40 }
 0x2a7   :  { %v1152_v41 = vpop.permute.xlu1 %1151 }
 0x2a8   :  { %1169 = vst.msk [vmem:[#allocation7 + $0x68] sm:$0xc0] %vm1107_vm14, %v1152_v41  ;;  %v1018_v42 = vpop.permute.xlu0 %1017  ;;  %v2835_v41 = vld [vmem:[#allocation15] ss:$0 sm:$0xff] }
 0x2a9   :  { %1028 = vst.msk [vmem:[#allocation7 + $0x68] sm:$0x3f] %vm974_vm2, %v1018_v42 }
 0x2ab   :  { %v1090_v43 = vpop.permute.xlu1 %1089 }
 0x2ac   :  { %1108 = vst.msk [vmem:[#allocation7 + $0x60] sm:$0xc0] %vm1107_vm14, %v1090_v43 }
 0x2b0   :  { %v1194_v44 = vld [vmem:[#allocation7 + $0x68] sm:$0xff] }
 0x2b1   :  { %1372 = vmatprep.mubr.f32.mxu1 %v1194_v44 }
 0x2b3   :  { %v1193_v45 = vld [vmem:[#allocation7 + $0x60] sm:$0xff] }
 0x2b4   :  { %1373 = vmatmul.mubr.f32.gmra.mrb[18].mxu1 %v1193_v45 }
 0x2b8   :  { %v1154_v46 = vpop.permute.xlu0 %1153  ;;  %v1092_v47 = vpop.permute.xlu1 %1091 }
 0x2b9   :  { %1170 = vst.msk [vmem:[#allocation7 + $0x80] sm:$0xff] %vm969_vm12, %v1154_v46  ;;  %1109 = vst.msk [vmem:[#allocation7 + $0x78] sm:$0xff] %vm969_vm12, %v1092_v47 }
 0x2c0   :  { %v1197_v48 = vld [vmem:[#allocation7 + $0x80] sm:$0xff]  ;;  %v1196_v49 = vld [vmem:[#allocation7 + $0x78] sm:$0xff] }
 0x2c1   :  { %1377 = vmatprep.mubr.f32.mxu1 %v1197_v48 }
 0x2c2   :  { %1378 = vmatmul.mubr.f32.gmra.mrb[20].mxu1 %v1196_v49 }
 0x2d8   :  { %v1156_v50 = vpop.permute.xlu0 %1155  ;;  %v1094_v51 = vpop.permute.xlu1 %1093 }
 0x2d9   :  { %1171 = vst.msk [vmem:[#allocation7 + $0x98] sm:$0xff] %vm969_vm12, %v1156_v50  ;;  %1110 = vst.msk [vmem:[#allocation7 + $0x90] sm:$0xff] %vm969_vm12, %v1094_v51 }
 0x2dc   :  { %v1158_v52 = vpop.permute.xlu0 %1157  ;;  %v1096_v53 = vpop.permute.xlu1 %1095 }
 0x2dd   :  { %1172 = vst.msk [vmem:[#allocation7 + $0xb0] sm:$0xff] %vm969_vm12, %v1158_v52  ;;  %1111 = vst.msk [vmem:[#allocation7 + $0xa8] sm:$0xff] %vm969_vm12, %v1096_v53 }
 0x2e0   :  { %v1200_v54 = vld [vmem:[#allocation7 + $0x98] sm:$0xff]  ;;  %v1199_v55 = vld [vmem:[#allocation7 + $0x90] sm:$0xff] }
 0x2e1   :  { %1382 = vmatprep.mubr.f32.mxu1 %v1200_v54 }
 0x2e2   :  { %1383 = vmatmul.mubr.f32.gmra.mrb[22].mxu1 %v1199_v55 }
 0x2e4   :  { %v1203_v56 = vld [vmem:[#allocation7 + $0xb0] sm:$0xff]  ;;  %v1202_v57 = vld [vmem:[#allocation7 + $0xa8] sm:$0xff] }
 0x2e5   :  { %1387 = vmatprep.mubr.f32.mxu1 %v1203_v56 }
 0x2e6   :  { %1388 = vmatmul.mubr.f32.gmra.mrb[24].mxu1 %v1202_v57 }
 0x2e9   :  { %v1160_v58 = vpop.permute.xlu0 %1159  ;;  %v1098_v59 = vpop.permute.xlu1 %1097 }
 0x2ea   :  { %1173 = vst.msk [vmem:[#allocation7 + $0xc8] sm:$0xff] %vm969_vm12, %v1160_v58  ;;  %1112 = vst.msk [vmem:[#allocation7 + $0xc0] sm:$0xff] %vm969_vm12, %v1098_v59 }
 0x2f1   :  { %v1162_v60 = vpop.permute.xlu0 %1161  ;;  %v1100_v61 = vpop.permute.xlu1 %1099  ;;  %v1206_v62 = vld [vmem:[#allocation7 + $0xc8] sm:$0xff]  ;;  %v1205_v63 = vld [vmem:[#allocation7 + $0xc0] sm:$0xff] }
 0x2f2   :  { %1174 = vst.msk [vmem:[#allocation7 + $0xe0] sm:$0xf] %vm1113_vm15, %v1162_v60  ;;  %1114 = vst.msk [vmem:[#allocation7 + $0xd8] sm:$0xf] %vm1113_vm15, %v1100_v61  ;;  %1392 = vmatprep.mubr.f32.mxu1 %v1206_v62 }
 0x2f3   :  { %1393 = vmatmul.mubr.f32.gmra.mrb[26].mxu1 %v1205_v63 }
 0x2f9   :  { %v1209_v0 = vld [vmem:[#allocation7 + $0xe0] sm:$0xf]  ;;  %v1208_v1 = vld [vmem:[#allocation7 + $0xd8] sm:$0xf] }
 0x2fa   :  { %1397 = vmatprep.mubr.f32.mxu1 %v1209_v0 }
 0x2fb   :  { %1398 = vmatmul.mubr.f32.gmra.mrb[28].mxu1 %v1208_v1 }
 0x2fc   :  { %3090 = vmatprep.mubr.msk.f32.mxu1 %vm857_vm4, %v1183_v2 }
 0x2ff   :  { %3091 = vmatmul.mubr.msk.f32.vlgmr.msra.gmra.mrb[30].mxu1 %vm857_vm4, %v1186_v4 }
 0x300   :  { %3093 = vmatprep.mubr.msk.f32.mxu1 %vm857_vm4, %v1189_v18 }
 0x303   :  { %3094 = vmatmul.mubr.msk.f32.gmra.mrb[32].mxu1 %vm857_vm4, %v1192_v5 }
 0x304   :  { %3096 = vmatprep.mubr.msk.f32.mxu1 %vm857_vm4, %v1195_v6 }
 0x307   :  { %3097 = vmatmul.mubr.msk.f32.gmra.mrb[34].mxu1 %vm857_vm4, %v1198_v7 }
 0x308   :  { %3099 = vmatprep.mubr.msk.f32.mxu1 %vm857_vm4, %v1201_v8  ;;  %v3836_v8 = vmov 1983009808  }
 0x30b   :  { %3100 = vmatmul.mubr.msk.f32.gmra.mrb[36].mxu1 %vm857_vm4, %v1204_v9  ;;  %v1576_v9 = vunpack.c.l.s4 %v3836_v8 }
 0x30c   :  { %3102 = vmatprep.mubr.msk.f32.mxu1 %vm857_vm4, %v1207_v10  ;;  %v1578_v10 = vlaneseq }
 0x30f   :  { %3103 = vmatmul.mubr.msk.f32.gmra.mrb[38].mxu1 %vm857_vm4, %v1210_v11 }
 0x345   :  { %v2912_v12 = vpop.f32.mrb[10].mxu1 }
 0x346   :  { %v2913_v13 = vpop.f32.mrb[11].mxu1 }
 0x347   :  { %v2914_v14 = vadd.f32 %v2913_v13, %v2912_v12 }
 0x349   :  { %v1355_v45 = vadd.f32 %v2914_v14, %v2835_v41 }
 0x356   :  { %v2915_v15 = vpop.f32.mrb[12].mxu1 }
 0x357   :  { %v2916_v3 = vpop.f32.mrb[13].mxu1 }
 0x358   :  { %v2917_v16 = vadd.f32 %v2916_v3, %v2915_v15 }
 0x35a   :  { %v1360_v43 = vadd.f32 %v2917_v16, %v2835_v41 }
 0x365   :  { %v2918_v17 = vpop.f32.mrb[14].mxu1 }
 0x366   :  { %v2919_v19 = vpop.f32.mrb[15].mxu1 }
 0x367   :  { %v2920_v20 = vadd.f32 %v2919_v19, %v2918_v17 }
 0x369   :  { %v1365_v53 = vadd.f32 %v2920_v20, %v2835_v41 }
 0x378   :  { %v2921_v21 = vpop.f32.mrb[16].mxu1 }
 0x379   :  { %v2922_v23 = vpop.f32.mrb[17].mxu1 }
 0x37a   :  { %v2923_v24 = vadd.f32 %v2922_v23, %v2921_v21 }
 0x37c   :  { %v1370_v50 = vadd.f32 %v2923_v24, %v2835_v41 }
 0x387   :  { %v2924_v22 = vpop.f32.mrb[18].mxu1 }
 0x388   :  { %v2925_v25 = vpop.f32.mrb[19].mxu1 }
 0x389   :  { %v2926_v26 = vadd.f32 %v2925_v25, %v2924_v22  ;;  %v1577_v22 = vunpack.c.0.s8 %v1576_v9  ;;  %v4760_v25 = vshrl.u32 %v1578_v10, 7 }
 0x38b   :  { %v1375_v61 = vadd.f32 %v2926_v26, %v2835_v41 }
 0x395   :  { %v2927_v27 = vpop.f32.mrb[20].mxu1 }
 0x396   :  { %v2928_v28 = vpop.f32.mrb[21].mxu1 }
 0x397   :  { %v2929_v29 = vadd.f32 %v2928_v28, %v2927_v27 }
 0x399   :  { %v1380_v58 = vadd.f32 %v2929_v29, %v2835_v41 }
 0x3b5   :  { %v2930_v30 = vpop.f32.mrb[22].mxu1 }
 0x3b6   :  { %v2931_v31 = vpop.f32.mrb[23].mxu1 }
 0x3b7   :  { %v2932_v32 = vadd.f32 %v2931_v31, %v2930_v30 }
 0x3b9   :  { %v2933_v33 = vpop.f32.mrb[24].mxu1  ;;  %v1385_v5 = vadd.f32 %v2932_v32, %v2835_v41  ;;  %v4767_v32 = vsub.s32 %v1577_v22, %v4760_v25 }
 0x3ba   :  { %v2934_v34 = vpop.f32.mrb[25].mxu1 }
 0x3bb   :  { %v2935_v35 = vadd.f32 %v2934_v34, %v2933_v33 }
 0x3bd   :  { %v1390_v2 = vadd.f32 %v2935_v35, %v2835_v41 }
 0x3c6   :  { %v2936_v36 = vpop.f32.mrb[26].mxu1 }
 0x3c7   :  { %v2937_v37 = vpop.f32.mrb[27].mxu1 }
 0x3c8   :  { %v2938_v38 = vadd.f32 %v2937_v37, %v2936_v36 }
 0x3ca   :  { %v1395_v17 = vadd.f32 %v2938_v38, %v2835_v41 }
 0x3ce   :  { %v2939_v39 = vpop.f32.mrb[28].mxu1 }
 0x3cf   :  { %v2940_v40 = vpop.f32.mrb[29].mxu1 }
 0x3d0   :  { %v2941_v42 = vadd.f32 %v2940_v40, %v2939_v39 }
 0x3d2   :  { %v3092_v44 = vpop.f32.mrb[30].mxu1  ;;  %v1400_v15 = vadd.f32 %v2941_v42, %v2835_v41 }
 0x3d3   :  { %v1475_v46 = vadd.f32 %v3092_v44, %v1360_v43  ;;  %v1469_v47 = vpop.f32.mrb[31].mxu1 }
 0x3d4   :  { %v1470_v48 = vadd.f32 %v1469_v47, %v1355_v45 }
 0x3d5   :  { %v1519_v49 = vmax.f32 %v1475_v46, 0.0 }
 0x3d6   :  { %v1518_v51 = vmax.f32 %v1470_v48, 0.0  ;;  %v3095_v52 = vpop.f32.mrb[32].mxu1 }
 0x3d7   :  { %1529 = vst.msk [vmem:[#allocation8 + $0x8] sm:$0xff] %vm857_vm4, %v1519_v49  ;;  %v1485_v54 = vadd.f32 %v3095_v52, %v1370_v50  ;;  %v1479_v55 = vpop.f32.mrb[33].mxu1 }
 0x3d8   :  { %1528 = vst.msk [vmem:[#allocation8] sm:$0xff] %vm857_vm4, %v1518_v51  ;;  %v1480_v56 = vadd.f32 %v1479_v55, %v1365_v53 }
 0x3d9   :  { %v1521_v57 = vmax.f32 %v1485_v54, 0.0 }
 0x3da   :  { %v1520_v59 = vmax.f32 %v1480_v56, 0.0  ;;  %v3098_v60 = vpop.f32.mrb[34].mxu1 }
 0x3db   :  { %1531 = vst.msk [vmem:[#allocation8 + $0x18] sm:$0xff] %vm857_vm4, %v1521_v57  ;;  %v1495_v62 = vadd.f32 %v3098_v60, %v1380_v58  ;;  %v1489_v63 = vpop.f32.mrb[35].mxu1 }
 0x3dc   :  { %1530 = vst.msk [vmem:[#allocation8 + $0x10] sm:$0xff] %vm857_vm4, %v1520_v59  ;;  %v1490_v0 = vadd.f32 %v1489_v63, %v1375_v61 }
 0x3dd   :  { %v1523_v1 = vmax.f32 %v1495_v62, 0.0 }
 0x3de   :  { %v1522_v4 = vmax.f32 %v1490_v0, 0.0  ;;  %v3101_v18 = vpop.f32.mrb[36].mxu1 }
 0x3df   :  { %1533 = vst.msk [vmem:[#allocation8 + $0x28] sm:$0xff] %vm857_vm4, %v1523_v1  ;;  %v1505_v6 = vadd.f32 %v3101_v18, %v1390_v2  ;;  %v1499_v7 = vpop.f32.mrb[37].mxu1  ;;  %v1538_v11 = vld [vmem:[#allocation8] ss:$2 sm:$0xff]  ;;  %v1548_v12 = vld [vmem:[#allocation8 + $0x1] ss:$2 sm:$0xff] }
 0x3e0   :  { %1532 = vst.msk [vmem:[#allocation8 + $0x20] sm:$0xff] %vm857_vm4, %v1522_v4  ;;  %v1500_v13 = vadd.f32 %v1499_v7, %v1385_v5  ;;  %v1557_v19 = vmax.f32 %v1538_v11, %v1548_v12 }
 0x3e1   :  { %v1525_v14 = vmax.f32 %v1505_v6, 0.0 }
 0x3e2   :  { %v1524_v3 = vmax.f32 %v1500_v13, 0.0  ;;  %v3104_v16 = vpop.f32.mrb[38].mxu1  ;;  %v1593_v33 = vrot.slane %v1557_v19, 3  ;;  %v1569_v35 = vrot.slane %v1557_v19, 1  ;;  %v1638_v36 = vrot.slane %v1557_v19, 7 }
 0x3e3   :  { %v1540_v20 = vld [vmem:[#allocation8 + $0x10] ss:$2 sm:$0xff]  ;;  %v1550_v21 = vld [vmem:[#allocation8 + $0x11] ss:$2 sm:$0xff]  ;;  %1535 = vst.msk [vmem:[#allocation8 + $0x38] sm:$0xff] %vm857_vm4, %v1525_v14  ;;  %v1515_v23 = vadd.f32 %v3104_v16, %v1400_v15  ;;  %v1509_v24 = vpop.f32.mrb[39].mxu1 }
 0x3e4   :  { %1534 = vst.msk [vmem:[#allocation8 + $0x30] sm:$0xff] %vm857_vm4, %v1524_v3  ;;  %v1510_v26 = vadd.f32 %v1509_v24, %v1395_v17  ;;  %v4763_v27 = vmax.f32 %v1540_v20, %v1550_v21  ;;  %v1616_v37 = vrot.slane %v1557_v19, 5  ;;  %v1587_v39 = vrot.slane %v1557_v19, 2 }
 0x3e5   :  { %v1527_v28 = vmax.f32 %v1515_v23, 0.0  ;;  %v1634_v40 = vrot.slane %v1557_v19, 6  ;;  %v1610_v41 = vrot.slane %v1557_v19, 4 }
 0x3e6   :  { %v1526_v29 = vmax.f32 %v1510_v26, 0.0  ;;  %v1683_v38 = vrot.slane %v4763_v27, 3  ;;  %v1660_v44 = vrot.slane %v4763_v27, 1  ;;  %v1728_v18 = vrot.slane %v4763_v27, 7 }
 0x3e7   :  { %v1542_v30 = vld [vmem:[#allocation8 + $0x20] ss:$2 sm:$0xff]  ;;  %v1552_v31 = vld [vmem:[#allocation8 + $0x21] ss:$2 sm:$0xff]  ;;  %1537 = vst.msk [vmem:[#allocation8 + $0x48] sm:$0xf] %vm1074_vm13, %v1527_v28 }
 0x3e8   :  { %1536 = vst.msk [vmem:[#allocation8 + $0x40] sm:$0xff] %vm857_vm4, %v1526_v29  ;;  %v4770_v34 = vmax.f32 %v1542_v30, %v1552_v31  ;;  %v1706_v8 = vrot.slane %v4763_v27, 5  ;;  %v1677_v14 = vrot.slane %v4763_v27, 2  ;;  %v1724_v15 = vrot.slane %v4763_v27, 6 }
 0x3e9   :  { %v1700_v3 = vrot.slane %v4763_v27, 4 }
 0x3ea   :  { %v1595_v42 = vrot.slane %v4770_v34, 5  ;;  %v1571_v43 = vrot.slane %v4770_v34, 3  ;;  %v1589_v45 = vrot.slane %v4770_v34, 4  ;;  %v1563_v48 = vrot.slane %v4770_v34, 2 }
 0x3eb   :  { %v1544_v46 = vld [vmem:[#allocation8 + $0x30] ss:$2 sm:$0xff]  ;;  %v1554_v47 = vld [vmem:[#allocation8 + $0x31] ss:$2 sm:$0xff]  ;;  %v1612_v49 = vrot.slane %v4770_v34, 6 }
 0x3ec   :  { %v1560_v50 = vmax.f32 %v1544_v46, %v1554_v47  ;;  %v1597_v51 = vsel %vm1139_vm9, %v1593_v33, %v1595_v42  ;;  %v1573_v52 = vsel %vm1139_vm9, %v1569_v35, %v1571_v43  ;;  %v1591_v53 = vsel %vm1139_vm9, %v1587_v39, %v1589_v45 }
 0x3ed   :  { %v1605_v54 = vrot.slane %v1597_v51, %v4767_v32  ;;  %v1581_v55 = vrot.slane %v1573_v52, %v4767_v32  ;;  %1592 = vst.msk [vmem:[#allocation9 + $0x2] sm:$0x3] %vm1566_vm0, %v1591_v53  ;;  %v1565_v56 = vsel %vm1139_vm9, %v1557_v19, %v1563_v48  ;;  %v1614_v57 = vsel %vm1139_vm9, %v1610_v41, %v1612_v49 }
 0x3ee   :  { %v1640_v58 = vrot.slane %v1560_v50, 1  ;;  %v1619_v59 = vrot.slane %v1560_v50, 7  ;;  %v1685_v60 = vrot.slane %v1560_v50, 5  ;;  %v1662_v61 = vrot.slane %v1560_v50, 3  ;;  %1567 = vst.msk [vmem:[#allocation9] sm:$0x3] %vm1566_vm0, %v1565_v56 }
 0x3ef   :  { %1615 = vst.msk [vmem:[#allocation9 + $0x4] sm:$0x3] %vm1566_vm0, %v1614_v57  ;;  %1606 = vrot.lane.b32.xlu1 %v1605_v54, %s3835_s17  ;;  %1582 = vrot.lane.b32.xlu0 %v1581_v55, %s3835_s17  ;;  %v1546_v62 = vld [vmem:[#allocation8 + $0x40] ss:$2 sm:$0x3f]  ;;  %v1636_v0 = vsel %vm1139_vm9, %v1634_v40, %v1560_v50  ;;  %v1679_v10 = vrot.slane %v1560_v50, 4 }
 0x3f0   :  { %v1556_v63 = vld [vmem:[#allocation8 + $0x41] ss:$2 sm:$0x3f]  ;;  %v1642_v1 = vsel %vm1139_vm9, %v1638_v36, %v1640_v58  ;;  %v1621_v2 = vsel %vm1139_vm9, %v1616_v37, %v1619_v59  ;;  %v4797_v4 = vsel %vm1139_vm9, %v1683_v38, %v1685_v60  ;;  %1637 = vst.msk [vmem:[#allocation9 + $0x6] sm:$0x3] %vm1566_vm0, %v1636_v0  ;;  %v1664_v7 = vsel %vm1139_vm9, %v1660_v44, %v1662_v61 }
 0x3f1   :  { %v1650_v5 = vrot.slane %v1642_v1, %v4767_v32  ;;  %v1629_v6 = vrot.slane %v1621_v2, %v4767_v32  ;;  %v4805_v9 = vmax.f32 %v1546_v62, %v1556_v63  ;;  %v1655_v11 = vrot.slane %v1560_v50, 2 }
 0x3f2   :  { %v1702_v12 = vrot.slane %v1560_v50, 6  ;;  %v1695_v13 = vrot.slane %v4797_v4, %v4767_v32  ;;  %v1672_v16 = vrot.slane %v1664_v7, %v4767_v32  ;;  %v1681_v21 = vsel %vm1139_vm9, %v1677_v14, %v1679_v10 }
 0x3f3   :  { %1651 = vrot.lane.b32.xlu1 %v1650_v5, %s3835_s17  ;;  %1630 = vrot.lane.b32.xlu0 %v1629_v6, %s3835_s17  ;;  %v1730_v17 = vrot.slane %v4805_v9, 1  ;;  %v1709_v19 = vrot.slane %v4805_v9, 7  ;;  %v1766_v20 = vrot.slane %v4805_v9, 4  ;;  %v1657_v23 = vsel %vm1139_vm9, %v4763_v27, %v1655_v11 }
 0x3f4   :  { %v1726_v24 = vsel %vm1139_vm9, %v1724_v15, %v4805_v9  ;;  %v1704_v22 = vsel %vm1139_vm9, %v1700_v3, %v1702_v12 }
 0x3f5   :  { %3748 = shalt.err (!%p3745_p8)  }
 0x3f6   :  { %s3749_s22 = scalar_lea.vmem %s115_s29, 38912  ;;  %p3754_p10 = scmp.lt.s32.totalorder %s115_s29, %s115_s29 }
 0x3f7   :  { %p3750_p9 = scmp.ne.s32.totalorder %s115_s29, %s3749_s22  ;;  %p3755_p11 = scmp.lt.s32.totalorder %s3749_s22, %s3749_s22 }
 0x3f9   :  { %p3756_p12 = por %p3755_p11, %p3754_p10 }
 0x3fb   :  { %p3757_p13 = pnand %p3756_p12, %p3750_p9 }
 0x3fd   :  { %3760 = shalt.err (!%p3757_p13)  }
 0x3fe   :  { %117 = dma.hbm_to_vmem [thread:$0]  %s5057_s5, 38912, %s115_s29, [#allocation4]  ;;  %v1732_v26 = vsel %vm1139_vm9, %v1728_v18, %v1730_v17  ;;  %v1711_v27 = vsel %vm1139_vm9, %v1706_v8, %v1709_v19  ;;  %v1751_v28 = vrot.slane %v4805_v9, 3  ;;  %v1768_v29 = vsel %vm1139_vm9, %v1563_v48, %v1766_v20  ;;  %1682 = vst.msk [vmem:[#allocation9 + $0xa] sm:$0x3] %vm1566_vm0, %v1681_v21 }
 0x3ff   :  { %1658 = vst.msk [vmem:[#allocation9 + $0x8] sm:$0x3] %vm1566_vm0, %v1657_v23  ;;  %1727 = vst.msk [vmem:[#allocation9 + $0xe] sm:$0x3] %vm1566_vm0, %v1726_v24  ;;  %s3761_s25 = scalar_lea.hbm %s5059_s7, 8192 }
 0x400   :  { %1705 = vst.msk [vmem:[#allocation9 + $0xc] sm:$0x3] %vm1566_vm0, %v1704_v22  ;;  %p3762_p0 = scmp.ne.s32.totalorder %s5059_s7, %s3761_s25  ;;  %p3765_p1 = scmp.lt.u32.totalorder %s3761_s25, %s5059_s7 }
 0x402   :  { %p3767_p2 = pnand %p3765_p1, %p3762_p0 }
 0x404   :  { %3770 = shalt.err (!%p3767_p2)  }
 0x405   :  { %s3771_s8 = scalar_lea.vmem %s4818_s10, 8192  ;;  %p3776_p4 = scmp.lt.s32.totalorder %s4818_s10, %s4818_s10 }
 0x406   :  { %p3772_p3 = scmp.ne.s32.totalorder %s4818_s10, %s3771_s8  ;;  %p3777_p5 = scmp.lt.s32.totalorder %s3771_s8, %s3771_s8 }
 0x408   :  { %p3778_p6 = por %p3777_p5, %p3776_p4 }
 0x40a   :  { %p3779_p7 = pnand %p3778_p6, %p3772_p3 }
 0x40c   :  { %3782 = shalt.err (!%p3779_p7)  }
 0x40d   :  { %129 = dma.hbm_to_vmem [thread:$0]  %s5059_s7, 8192, %s4818_s10, [#allocation4 + $0x1]  ;;  %1696 = vrot.lane.b32.xlu1 %v1695_v13, %s3835_s17  ;;  %1673 = vrot.lane.b32.xlu0 %v1672_v16, %s3835_s17  ;;  %1769 = vst.msk [vmem:[#allocation9 + $0x12] sm:$0x3] %vm1566_vm0, %v1768_v29  ;;  %v1745_v30 = vrot.slane %v4805_v9, 2  ;;  %v1749_v31 = vrot.slane %v4770_v34, 1  ;;  %v1740_v33 = vrot.slane %v1732_v26, %v4767_v32  ;;  %v1719_v35 = vrot.slane %v1711_v27, %v4767_v32 }
 0x40e   :  { %vm1585_vm3 = vcmask 1041920  }
 0x40f   :  { %v1747_v36 = vsel %vm1139_vm9, %v4770_v34, %v1745_v30  ;;  %v1753_v37 = vsel %vm1139_vm9, %v1749_v31, %v1751_v28 }
 0x410   :  { %1748 = vst.msk [vmem:[#allocation9 + $0x10] sm:$0x3] %vm1566_vm0, %v1747_v36  ;;  %v1761_v38 = vrot.slane %v1753_v37, %v4767_v32 }
 0x411   :  { %1741 = vrot.lane.b32.xlu1 %v1740_v33, %s3835_s17  ;;  %1720 = vrot.lane.b32.xlu0 %v1719_v35, %s3835_s17 }
 0x415   :  { %1762 = vrot.lane.b32.xlu0 %v1761_v38, %s3835_s17 }
 0x461   :  { %v1607_v39 = vpop.permute.xlu1 %1606  ;;  %v1583_v40 = vpop.permute.xlu0 %1582 }
 0x462   :  { %1609 = vst.msk [vmem:[#allocation9 + $0x2] sm:$0x3] %vm1585_vm3, %v1607_v39  ;;  %1586 = vst.msk [vmem:[#allocation9] sm:$0x3] %vm1585_vm3, %v1583_v40 }
 0x465   :  { %v1652_v34 = vpop.permute.xlu1 %1651  ;;  %v1631_v41 = vpop.permute.xlu0 %1630 }
 0x466   :  { %1654 = vst.msk [vmem:[#allocation9 + $0x6] sm:$0x3] %vm1585_vm3, %v1652_v34  ;;  %1633 = vst.msk [vmem:[#allocation9 + $0x4] sm:$0x3] %vm1585_vm3, %v1631_v41 }
 0x47f   :  { %v1697_v42 = vpop.permute.xlu1 %1696  ;;  %v1674_v43 = vpop.permute.xlu0 %1673 }
 0x480   :  { %1699 = vst.msk [vmem:[#allocation9 + $0xa] sm:$0x3] %vm1585_vm3, %v1697_v42  ;;  %1676 = vst.msk [vmem:[#allocation9 + $0x8] sm:$0x3] %vm1585_vm3, %v1674_v43 }
 0x483   :  { %v1742_v44 = vpop.permute.xlu1 %1741  ;;  %v1721_v45 = vpop.permute.xlu0 %1720 }
 0x484   :  { %1744 = vst.msk [vmem:[#allocation9 + $0xe] sm:$0x3] %vm1585_vm3, %v1742_v44  ;;  %1723 = vst.msk [vmem:[#allocation9 + $0xc] sm:$0x3] %vm1585_vm3, %v1721_v45 }
 0x487   :  { %v1763_v46 = vpop.permute.xlu0 %1762 }
 0x488   :  { %1765 = vst.msk [vmem:[#allocation9 + $0x10] sm:$0x3] %vm1585_vm3, %v1763_v46 }
 0x489   :  { %3813 = dma.done.wait [#allocation4], 38912 }
 0x48a   :  { %3814 = vsyncadd [#allocation4], 4294928384  ;;  %v1842_v47 = vld [vmem:[#allocation2 + $0x208] sm:$0xff]  ;;  %v1844_v48 = vld [vmem:[#allocation2 + $0x218] sm:$0xff] }
 0x48b   :  { %v1841_v49 = vld [vmem:[#allocation2 + $0x200] sm:$0xff]  ;;  %v3230_v50 = vpack.c.bf16 %v1844_v48, %v1842_v47  ;;  %v1843_v51 = vld [vmem:[#allocation2 + $0x210] sm:$0xff]  ;;  %v1846_v52 = vld [vmem:[#allocation2 + $0x228] sm:$0xff] }
 0x48c   :  { %v1848_v53 = vld [vmem:[#allocation2 + $0x238] sm:$0xff]  ;;  %v3232_v54 = vpack.c.bf16 %v1843_v51, %v1841_v49  ;;  %v1845_v56 = vld [vmem:[#allocation2 + $0x220] sm:$0xff]  ;;  %v1847_v57 = vld [vmem:[#allocation2 + $0x230] sm:$0xff] }
 0x48d   :  { %v3234_v55 = vpack.c.bf16 %v1848_v53, %v1846_v52  ;;  %v1850_v58 = vld [vmem:[#allocation2 + $0x248] sm:$0xff]  ;;  %3231 = vmatprep.subr.bf16.mxu0 %v3230_v50  ;;  %v1852_v59 = vld [vmem:[#allocation2 + $0x258] sm:$0xff]  ;;  %v3236_v60 = vpack.c.bf16 %v1847_v57, %v1845_v56  ;;  %v1849_v62 = vld [vmem:[#allocation2 + $0x240] sm:$0xff] }
 0x48e   :  { %3233 = vmatpush1.bf16.msra.mxu0 %v3232_v54  ;;  %v3238_v61 = vpack.c.bf16 %v1852_v59, %v1850_v58  ;;  %v1851_v63 = vld [vmem:[#allocation2 + $0x250] sm:$0xff]  ;;  %v1854_v0 = vld [vmem:[#allocation2 + $0x268] sm:$0xff]  ;;  %v1856_v1 = vld [vmem:[#allocation2 + $0x278] sm:$0xff] }
 0x48f   :  { %3235 = vmatprep.subr.bf16.mxu0 %v3234_v55  ;;  %v3240_v2 = vpack.c.bf16 %v1851_v63, %v1849_v62  ;;  %v3242_v4 = vpack.c.bf16 %v1856_v1, %v1854_v0  ;;  %v1853_v18 = vld [vmem:[#allocation2 + $0x260] sm:$0xff]  ;;  %v1855_v5 = vld [vmem:[#allocation2 + $0x270] sm:$0xff]  ;;  %v1858_v6 = vld [vmem:[#allocation2 + $0x288] sm:$0xff] }
 0x490   :  { %v1860_v7 = vld [vmem:[#allocation2 + $0x298] sm:$0xff]  ;;  %v3244_v8 = vpack.c.bf16 %v1855_v5, %v1853_v18  ;;  %v1857_v10 = vld [vmem:[#allocation2 + $0x280] sm:$0xff]  ;;  %v1859_v11 = vld [vmem:[#allocation2 + $0x290] sm:$0xff] }
 0x491   :  { %v3246_v9 = vpack.c.bf16 %v1860_v7, %v1858_v6  ;;  %v1862_v12 = vld [vmem:[#allocation2 + $0x2a8] sm:$0xff]  ;;  %v1864_v13 = vld [vmem:[#allocation2 + $0x2b8] sm:$0xff]  ;;  %v3248_v14 = vpack.c.bf16 %v1859_v11, %v1857_v10  ;;  %v1861_v3 = vld [vmem:[#allocation2 + $0x2a0] sm:$0xff] }
 0x492   :  { %3237 = vmatpush1.bf16.msra.mxu0 %v3236_v60  ;;  %v3250_v15 = vpack.c.bf16 %v1864_v13, %v1862_v12  ;;  %v1863_v16 = vld [vmem:[#allocation2 + $0x2b0] sm:$0xff]  ;;  %v1866_v17 = vld [vmem:[#allocation2 + $0x2c8] sm:$0xff]  ;;  %v1868_v19 = vld [vmem:[#allocation2 + $0x2d8] sm:$0xff] }
 0x493   :  { %3239 = vmatprep.subr.bf16.mxu0 %v3238_v61  ;;  %v3252_v20 = vpack.c.bf16 %v1863_v16, %v1861_v3  ;;  %v3254_v21 = vpack.c.bf16 %v1868_v19, %v1866_v17  ;;  %v1865_v23 = vld [vmem:[#allocation2 + $0x2c0] sm:$0xff]  ;;  %v1867_v24 = vld [vmem:[#allocation2 + $0x2d0] sm:$0xff]  ;;  %v1870_v26 = vld [vmem:[#allocation2 + $0x2e8] sm:$0xff] }
 0x494   :  { %v4889_v22 = vld [vmem:[#allocation9] sm:$0xff]  ;;  %v1872_v27 = vld [vmem:[#allocation2 + $0x2f8] sm:$0xff]  ;;  %v3256_v29 = vpack.c.bf16 %v1867_v24, %v1865_v23  ;;  %v1869_v33 = vld [vmem:[#allocation2 + $0x2e0] sm:$0xff] }
 0x495   :  { %v2096_v28 = vcombine.high %v4889_v22, %v4889_v22  ;;  %v3258_v31 = vpack.c.bf16 %v1872_v27, %v1870_v26  ;;  %v1871_v35 = vld [vmem:[#allocation2 + $0x2f0] sm:$0xff]  ;;  %v1874_v36 = vld [vmem:[#allocation2 + $0x308] sm:$0xff]  ;;  %v1876_v37 = vld [vmem:[#allocation2 + $0x318] sm:$0xff] }
 0x496   :  { %3241 = vmatpush1.bf16.msra.mxu0 %v3240_v2  ;;  %v3260_v39 = vpack.c.bf16 %v1871_v35, %v1869_v33  ;;  %v3262_v40 = vpack.c.bf16 %v1876_v37, %v1874_v36  ;;  %v1873_v34 = vld [vmem:[#allocation2 + $0x300] sm:$0xff]  ;;  %v1875_v41 = vld [vmem:[#allocation2 + $0x310] sm:$0xff]  ;;  %v1878_v42 = vld [vmem:[#allocation2 + $0x328] sm:$0xff] }
 0x497   :  { %3243 = vmatprep.subr.bf16.mxu0 %v3242_v4  ;;  %v4894_v30 = vrot.slane %v2096_v28, %v4767_v32  ;;  %v1880_v43 = vld [vmem:[#allocation2 + $0x338] sm:$0xff]  ;;  %v3264_v44 = vpack.c.bf16 %v1875_v41, %v1873_v34  ;;  %v1877_v46 = vld [vmem:[#allocation2 + $0x320] sm:$0xff]  ;;  %v1879_v47 = vld [vmem:[#allocation2 + $0x330] sm:$0xff] }
 0x498   :  { %v3266_v45 = vpack.c.bf16 %v1880_v43, %v1878_v42  ;;  %v1882_v48 = vld [vmem:[#allocation2 + $0x348] sm:$0xff]  ;;  %v1884_v49 = vld [vmem:[#allocation2 + $0x358] sm:$0xff]  ;;  %v3268_v50 = vpack.c.bf16 %v1879_v47, %v1877_v46  ;;  %v1881_v52 = vld [vmem:[#allocation2 + $0x340] sm:$0xff] }
 0x499   :  { %v2112_v38 = vcombine.high %v4894_v30, %v4894_v30  ;;  %v3270_v51 = vpack.c.bf16 %v1884_v49, %v1882_v48  ;;  %v1883_v53 = vld [vmem:[#allocation2 + $0x350] sm:$0xff]  ;;  %v1886_v54 = vld [vmem:[#allocation2 + $0x368] sm:$0xff]  ;;  %v1888_v55 = vld [vmem:[#allocation2 + $0x378] sm:$0xff] }
 0x49a   :  { %3245 = vmatpush1.bf16.msra.mxu0 %v3244_v8  ;;  %v3272_v56 = vpack.c.bf16 %v1883_v53, %v1881_v52  ;;  %v3274_v57 = vpack.c.bf16 %v1888_v55, %v1886_v54  ;;  %v1885_v58 = vld [vmem:[#allocation2 + $0x360] sm:$0xff]  ;;  %v1887_v59 = vld [vmem:[#allocation2 + $0x370] sm:$0xff]  ;;  %v1890_v60 = vld [vmem:[#allocation2 + $0x388] sm:$0xff] }
 0x49b   :  { %3247 = vmatprep.subr.bf16.mxu0 %v3246_v9  ;;  %2284 = vmatprep.mubr.f32.mxu0 %v2112_v38  ;;  %v1892_v61 = vld [vmem:[#allocation2 + $0x398] sm:$0xff]  ;;  %v3276_v62 = vpack.c.bf16 %v1887_v59, %v1885_v58  ;;  %v1889_v0 = vld [vmem:[#allocation2 + $0x380] sm:$0xff]  ;;  %v1891_v1 = vld [vmem:[#allocation2 + $0x390] sm:$0xff] }
 0x49c   :  { %v3278_v63 = vpack.c.bf16 %v1892_v61, %v1890_v60  ;;  %v1894_v2 = vld [vmem:[#allocation2 + $0x3a8] sm:$0xff]  ;;  %v1896_v4 = vld [vmem:[#allocation2 + $0x3b8] sm:$0xff]  ;;  %v3280_v18 = vpack.c.bf16 %v1891_v1, %v1889_v0  ;;  %v1893_v6 = vld [vmem:[#allocation2 + $0x3a0] sm:$0xff] }
 0x49d   :  { %v3282_v5 = vpack.c.bf16 %v1896_v4, %v1894_v2  ;;  %v1895_v7 = vld [vmem:[#allocation2 + $0x3b0] sm:$0xff]  ;;  %v1898_v8 = vld [vmem:[#allocation2 + $0x3c8] sm:$0xff]  ;;  %v1900_v9 = vld [vmem:[#allocation2 + $0x3d8] sm:$0xff] }
 0x49e   :  { %3249 = vmatpush1.bf16.msra.mxu0 %v3248_v14  ;;  %v3284_v10 = vpack.c.bf16 %v1895_v7, %v1893_v6  ;;  %v3286_v11 = vpack.c.bf16 %v1900_v9, %v1898_v8  ;;  %v1897_v12 = vld [vmem:[#allocation2 + $0x3c0] sm:$0xff]  ;;  %v1899_v13 = vld [vmem:[#allocation2 + $0x3d0] sm:$0xff]  ;;  %v1902_v14 = vld [vmem:[#allocation2 + $0x3e8] sm:$0xff] }
 0x49f   :  { %3251 = vmatprep.subr.bf16.mxu0 %v3250_v15  ;;  %v1904_v15 = vld [vmem:[#allocation2 + $0x3f8] sm:$0xff]  ;;  %v3288_v3 = vpack.c.bf16 %v1899_v13, %v1897_v12  ;;  %v1901_v17 = vld [vmem:[#allocation2 + $0x3e0] sm:$0xff]  ;;  %v1903_v19 = vld [vmem:[#allocation2 + $0x3f0] sm:$0xff] }
 0x4a0   :  { %v3290_v16 = vpack.c.bf16 %v1904_v15, %v1902_v14  ;;  %v1908_v23 = vld [vmem:[#allocation2 + $0x418] sm:$0xff]  ;;  %v1778_v24 = vld [vmem:[#allocation2 + $0x8] sm:$0xff]  ;;  %v3292_v27 = vpack.c.bf16 %v1903_v19, %v1901_v17  ;;  %v1905_v28 = vld [vmem:[#allocation2 + $0x400] sm:$0xff] }
 0x4a1   :  { %v1780_v26 = vld [vmem:[#allocation2 + $0x18] sm:$0xff]  ;;  %v1777_v33 = vld [vmem:[#allocation2] sm:$0xff]  ;;  %v1779_v35 = vld [vmem:[#allocation2 + $0x10] sm:$0xff] }
 0x4a2   :  { %3253 = vmatpush1.bf16.msra.mxu0 %v3252_v20  ;;  %v4898_v20 = vld [vmem:[#allocation9 + $0x8] sm:$0xff]  ;;  %v1907_v37 = vld [vmem:[#allocation2 + $0x410] sm:$0xff]  ;;  %v3168_v38 = vpack.c.bf16 %v1779_v35, %v1777_v33  ;;  %v1910_v34 = vld [vmem:[#allocation2 + $0x428] sm:$0xff] }
 0x4a3   :  { %3255 = vmatprep.subr.bf16.mxu0 %v3254_v21  ;;  %v1906_v21 = vld [vmem:[#allocation2 + $0x408] sm:$0xff]  ;;  %v1912_v41 = vld [vmem:[#allocation2 + $0x438] sm:$0xff]  ;;  %v1781_v43 = vld [vmem:[#allocation2 + $0x20] sm:$0xff] }
 0x4a4   :  { %v3294_v36 = vpack.c.bf16 %v1908_v23, %v1906_v21  ;;  %v1909_v46 = vld [vmem:[#allocation2 + $0x420] sm:$0xff]  ;;  %v1786_v49 = vld [vmem:[#allocation2 + $0x48] sm:$0xff]  ;;  %v1911_v52 = vld [vmem:[#allocation2 + $0x430] sm:$0xff] }
 0x4a5   :  { %v1785_v54 = vld [vmem:[#allocation2 + $0x40] sm:$0xff]  ;;  %v1787_v55 = vld [vmem:[#allocation2 + $0x50] sm:$0xff]  ;;  %v1790_v58 = vld [vmem:[#allocation2 + $0x68] sm:$0xff]  ;;  %v3300_v61 = vpack.c.bf16 %v1911_v52, %v1909_v46 }
 0x4a6   :  { %3257 = vmatpush1.bf16.msra.mxu0 %v3256_v29  ;;  %v4902_v29 = vrot.slane %v4898_v20, %v4767_v32  ;;  %v3176_v59 = vpack.c.bf16 %v1787_v55, %v1785_v54  ;;  %v1792_v60 = vld [vmem:[#allocation2 + $0x78] sm:$0xff]  ;;  %v1789_v0 = vld [vmem:[#allocation2 + $0x60] sm:$0xff]  ;;  %v1791_v1 = vld [vmem:[#allocation2 + $0x70] sm:$0xff] }
 0x4a7   :  { %3259 = vmatprep.subr.bf16.mxu0 %v3258_v31  ;;  %v3166_v31 = vpack.c.bf16 %v1780_v26, %v1778_v24  ;;  %v1915_v4 = vld [vmem:[#allocation2 + $0x450] sm:$0xff]  ;;  %v1918_v6 = vld [vmem:[#allocation2 + $0x468] sm:$0xff]  ;;  %v1920_v7 = vld [vmem:[#allocation2 + $0x478] sm:$0xff] }
 0x4a8   :  { %v2128_v47 = vcombine.high %v4902_v29, %v4902_v29  ;;  %v1917_v9 = vld [vmem:[#allocation2 + $0x460] sm:$0xff]  ;;  %v1795_v12 = vld [vmem:[#allocation2 + $0x90] sm:$0xff]  ;;  %v3306_v13 = vpack.c.bf16 %v1920_v7, %v1918_v6  ;;  %v1798_v15 = vld [vmem:[#allocation2 + $0xa8] sm:$0xff] }
 0x4a9   :  { %3167 = vmatprep.subr.bf16.mxu1 %v3166_v31  ;;  %v1919_v14 = vld [vmem:[#allocation2 + $0x470] sm:$0xff]  ;;  %v1924_v17 = vld [vmem:[#allocation2 + $0x498] sm:$0xff]  ;;  %v1921_v23 = vld [vmem:[#allocation2 + $0x480] sm:$0xff] }
 0x4aa   :  { %3261 = vmatpush1.bf16.msra.mxu0 %v3260_v39  ;;  %v1782_v39 = vld [vmem:[#allocation2 + $0x28] sm:$0xff]  ;;  %3169 = vmatpush1.bf16.msra.mxu1 %v3168_v38  ;;  %v3308_v21 = vpack.c.bf16 %v1919_v14, %v1917_v9  ;;  %v1797_v26 = vld [vmem:[#allocation2 + $0xa0] sm:$0xff]  ;;  %v1923_v31 = vld [vmem:[#allocation2 + $0x490] sm:$0xff] }
 0x4ab   :  { %3263 = vmatprep.subr.bf16.mxu0 %v3262_v40  ;;  %v1784_v40 = vld [vmem:[#allocation2 + $0x38] sm:$0xff]  ;;  %v1802_v33 = vld [vmem:[#allocation2 + $0xc8] sm:$0xff]  ;;  %v1807_v54 = vld [vmem:[#allocation2 + $0xf0] sm:$0xff] }
 0x4ac   :  { %v3170_v42 = vpack.c.bf16 %v1784_v40, %v1782_v39  ;;  %v1804_v35 = vld [vmem:[#allocation2 + $0xd8] sm:$0xff]  ;;  %v3312_v39 = vpack.c.bf16 %v1923_v31, %v1921_v23  ;;  %v1925_v40 = vld [vmem:[#allocation2 + $0x4a0] sm:$0xff]  ;;  %v1938_v7 = vld [vmem:[#allocation2 + $0x508] sm:$0xff] }
 0x4ad   :  { %v1808_v46 = vld [vmem:[#allocation2 + $0xf8] sm:$0xff] }
 0x4ae   :  { %3265 = vmatpush1.bf16.msra.mxu0 %v3264_v44  ;;  %v1783_v44 = vld [vmem:[#allocation2 + $0x30] sm:$0xff]  ;;  %3171 = vmatprep.subr.bf16.mxu1 %v3170_v42  ;;  %v1816_v6 = vld [vmem:[#allocation2 + $0x138] sm:$0xff] }
 0x4af   :  { %3267 = vmatprep.subr.bf16.mxu0 %v3266_v45  ;;  %v3296_v45 = vpack.c.bf16 %v1907_v37, %v1905_v28  ;;  %v3172_v48 = vpack.c.bf16 %v1783_v44, %v1781_v43  ;;  %v1928_v37 = vld [vmem:[#allocation2 + $0x4b8] sm:$0xff]  ;;  %v1803_v42 = vld [vmem:[#allocation2 + $0xd0] sm:$0xff] }
 0x4b0   :  { %v1927_v44 = vld [vmem:[#allocation2 + $0x4b0] sm:$0xff] }
 0x4b1   :  { %3173 = vmatpush1.bf16.msra.mxu1 %v3172_v48  ;;  %v1932_v48 = vld [vmem:[#allocation2 + $0x4d8] sm:$0xff] }
 0x4b2   :  { %3269 = vmatpush1.bf16.msra.mxu0 %v3268_v50  ;;  %v1788_v50 = vld [vmem:[#allocation2 + $0x58] sm:$0xff] }
 0x4b3   :  { %3271 = vmatprep.subr.bf16.mxu0 %v3270_v51  ;;  %v3298_v51 = vpack.c.bf16 %v1912_v41, %v1910_v34  ;;  %v3174_v53 = vpack.c.bf16 %v1788_v50, %v1786_v49  ;;  %v3190_v34 = vpack.c.bf16 %v1804_v35, %v1802_v33  ;;  %v1801_v41 = vld [vmem:[#allocation2 + $0xc0] sm:$0xff]  ;;  %v3316_v50 = vpack.c.bf16 %v1927_v44, %v1925_v40  ;;  %v1943_v33 = vld [vmem:[#allocation2 + $0x530] sm:$0xff]  ;;  %v1822_v35 = vld [vmem:[#allocation2 + $0x168] sm:$0xff] }
 0x4b4   :  { %v3192_v49 = vpack.c.bf16 %v1803_v42, %v1801_v41  ;;  %v1821_v42 = vld [vmem:[#allocation2 + $0x160] sm:$0xff] }
 0x4b5   :  { %3175 = vmatprep.subr.bf16.mxu1 %v3174_v53  ;;  %v1805_v53 = vld [vmem:[#allocation2 + $0xe0] sm:$0xff] }
 0x4b6   :  { %3273 = vmatpush1.bf16.msra.mxu0 %v3272_v56  ;;  %v1914_v56 = vld [vmem:[#allocation2 + $0x448] sm:$0xff]  ;;  %3177 = vmatpush1.bf16.msra.mxu1 %v3176_v59 }
 0x4b7   :  { %3275 = vmatprep.subr.bf16.mxu0 %v3274_v57  ;;  %v1916_v57 = vld [vmem:[#allocation2 + $0x458] sm:$0xff]  ;;  %v1934_v59 = vld [vmem:[#allocation2 + $0x4e8] sm:$0xff] }
 0x4b8   :  { %v3302_v2 = vpack.c.bf16 %v1916_v57, %v1914_v56  ;;  %v1931_v56 = vld [vmem:[#allocation2 + $0x4d0] sm:$0xff]  ;;  %v1810_v57 = vld [vmem:[#allocation2 + $0x108] sm:$0xff] }
 0x4ba   :  { %3277 = vmatpush1.bf16.msra.mxu0 %v3276_v62  ;;  %v1913_v62 = vld [vmem:[#allocation2 + $0x440] sm:$0xff] }
 0x4bb   :  { %3279 = vmatprep.subr.bf16.mxu0 %v3278_v63  ;;  %v3178_v63 = vpack.c.bf16 %v1792_v60, %v1790_v58  ;;  %v3304_v8 = vpack.c.bf16 %v1915_v4, %v1913_v62  ;;  %v1812_v58 = vld [vmem:[#allocation2 + $0x118] sm:$0xff] }
 0x4bc   :  { %v1936_v60 = vld [vmem:[#allocation2 + $0x4f8] sm:$0xff] }
 0x4bd   :  { %3179 = vmatprep.subr.bf16.mxu1 %v3178_v63  ;;  %v1933_v63 = vld [vmem:[#allocation2 + $0x4e0] sm:$0xff]  ;;  %v3322_v4 = vpack.c.bf16 %v1936_v60, %v1934_v59  ;;  %v1832_v59 = vld [vmem:[#allocation2 + $0x1b8] sm:$0xff]  ;;  %v1954_v60 = vld [vmem:[#allocation2 + $0x588] sm:$0xff] }
 0x4be   :  { %3281 = vmatpush1.bf16.msra.mxu0 %v3280_v18  ;;  %v1794_v18 = vld [vmem:[#allocation2 + $0x88] sm:$0xff] }
 0x4bf   :  { %3283 = vmatprep.subr.bf16.mxu0 %v3282_v5  ;;  %v1796_v5 = vld [vmem:[#allocation2 + $0x98] sm:$0xff] }
 0x4c2   :  { %3285 = vmatpush1.bf16.msra.mxu0 %v3284_v10  ;;  %v3182_v10 = vpack.c.bf16 %v1796_v5, %v1794_v18  ;;  %v1935_v18 = vld [vmem:[#allocation2 + $0x4f0] sm:$0xff]  ;;  %v1814_v5 = vld [vmem:[#allocation2 + $0x128] sm:$0xff] }
 0x4c3   :  { %3287 = vmatprep.subr.bf16.mxu0 %v3286_v11  ;;  %v1793_v11 = vld [vmem:[#allocation2 + $0x80] sm:$0xff]  ;;  %v3324_v9 = vpack.c.bf16 %v1935_v18, %v1933_v63  ;;  %v4909_v63 = vrot.slane %v4889_v22, %v4767_v32  ;;  %v1831_v18 = vld [vmem:[#allocation2 + $0x1b0] sm:$0xff] }
 0x4c4   :  { %v3184_v19 = vpack.c.bf16 %v1795_v12, %v1793_v11  ;;  %v3202_v11 = vpack.c.bf16 %v1816_v6, %v1814_v5  ;;  %v1813_v12 = vld [vmem:[#allocation2 + $0x120] sm:$0xff]  ;;  %v1955_v6 = vld [vmem:[#allocation2 + $0x590] sm:$0xff] }
 0x4c6   :  { %3289 = vmatpush1.bf16.msra.mxu0 %v3288_v3  ;;  %v1800_v3 = vld [vmem:[#allocation2 + $0xb8] sm:$0xff] }
 0x4c7   :  { %3291 = vmatprep.subr.bf16.mxu0 %v3290_v16  ;;  %v1922_v16 = vld [vmem:[#allocation2 + $0x488] sm:$0xff]  ;;  %v3186_v24 = vpack.c.bf16 %v1800_v3, %v1798_v15  ;;  %v1939_v15 = vld [vmem:[#allocation2 + $0x510] sm:$0xff] }
 0x4c8   :  { %v3310_v28 = vpack.c.bf16 %v1924_v17, %v1922_v16  ;;  %v1818_v3 = vld [vmem:[#allocation2 + $0x148] sm:$0xff]  ;;  %v1820_v16 = vld [vmem:[#allocation2 + $0x158] sm:$0xff] }
 0x4c9   :  { %v1942_v17 = vld [vmem:[#allocation2 + $0x528] sm:$0xff] }
 0x4ca   :  { %3293 = vmatpush1.bf16.msra.mxu0 %v3292_v27  ;;  %v1799_v27 = vld [vmem:[#allocation2 + $0xb0] sm:$0xff] }
 0x4cb   :  { %3295 = vmatprep.subr.bf16.mxu0 %v3294_v36  ;;  %v1926_v36 = vld [vmem:[#allocation2 + $0x4a8] sm:$0xff]  ;;  %v3188_v38 = vpack.c.bf16 %v1799_v27, %v1797_v26  ;;  %v3206_v26 = vpack.c.bf16 %v1820_v16, %v1818_v3  ;;  %v1817_v27 = vld [vmem:[#allocation2 + $0x140] sm:$0xff]  ;;  %v1959_v16 = vld [vmem:[#allocation2 + $0x5b0] sm:$0xff] }
 0x4cc   :  { %v3314_v43 = vpack.c.bf16 %v1928_v37, %v1926_v36  ;;  %v1824_v36 = vld [vmem:[#allocation2 + $0x178] sm:$0xff]  ;;  %v1946_v37 = vld [vmem:[#allocation2 + $0x548] sm:$0xff] }
 0x4cd   :  { %2285 = vmatmul.mubr.f32.vlgmr.msra.gmra.mrb[32].mxu0 %v4894_v30  ;;  %v3180_v30 = vpack.c.bf16 %v1791_v1, %v1789_v0  ;;  %v3198_v0 = vpack.c.bf16 %v1812_v58, %v1810_v57  ;;  %v1809_v1 = vld [vmem:[#allocation2 + $0x100] sm:$0xff]  ;;  %v3210_v41 = vpack.c.bf16 %v1824_v36, %v1822_v35  ;;  %v1951_v57 = vld [vmem:[#allocation2 + $0x570] sm:$0xff]  ;;  %v1830_v58 = vld [vmem:[#allocation2 + $0x1a8] sm:$0xff] }
 0x4ce   :  { %3297 = vmatpush1.bf16.msra.mxu0 %v3296_v45  ;;  %2355 = vmatprep.mubr.f32.mxu0 %v2128_v47  ;;  %v1806_v45 = vld [vmem:[#allocation2 + $0xe8] sm:$0xff]  ;;  %v1961_v35 = vld [vmem:[#allocation2 + $0x5c0] sm:$0xff]  ;;  %v1963_v36 = vld [vmem:[#allocation2 + $0x5d0] sm:$0xff] }
 0x4cf   :  { %3299 = vmatprep.subr.bf16.mxu0 %v3298_v51  ;;  %3181 = vmatpush1.bf16.msra.mxu1 %v3180_v30  ;;  %v1930_v47 = vld [vmem:[#allocation2 + $0x4c8] sm:$0xff]  ;;  %v1929_v51 = vld [vmem:[#allocation2 + $0x4c0] sm:$0xff]  ;;  %v3194_v52 = vpack.c.bf16 %v1808_v46, %v1806_v45  ;;  %v1940_v30 = vld [vmem:[#allocation2 + $0x518] sm:$0xff] }
 0x4d0   :  { %3183 = vmatprep.subr.bf16.mxu1 %v3182_v10  ;;  %v3318_v55 = vpack.c.bf16 %v1932_v48, %v1930_v47  ;;  %v3320_v62 = vpack.c.bf16 %v1931_v56, %v1929_v51  ;;  %v1937_v10 = vld [vmem:[#allocation2 + $0x500] sm:$0xff]  ;;  %v3326_v14 = vpack.c.bf16 %v1940_v30, %v1938_v7  ;;  %v1947_v45 = vld [vmem:[#allocation2 + $0x550] sm:$0xff]  ;;  %v1826_v46 = vld [vmem:[#allocation2 + $0x188] sm:$0xff] }
 0x4d1   :  { %v3328_v23 = vpack.c.bf16 %v1939_v15, %v1937_v10  ;;  %v1828_v47 = vld [vmem:[#allocation2 + $0x198] sm:$0xff]  ;;  %v1950_v48 = vld [vmem:[#allocation2 + $0x568] sm:$0xff]  ;;  %v1835_v15 = vld [vmem:[#allocation2 + $0x1d0] sm:$0xff] }
 0x4d2   :  { %3301 = vmatpush1.bf16.msra.mxu0 %v3300_v61  ;;  %v3196_v61 = vpack.c.bf16 %v1807_v54, %v1805_v53  ;;  %v3214_v53 = vpack.c.bf16 %v1828_v47, %v1826_v46  ;;  %v1825_v54 = vld [vmem:[#allocation2 + $0x180] sm:$0xff]  ;;  %v1834_v7 = vld [vmem:[#allocation2 + $0x1c8] sm:$0xff]  ;;  %v1836_v30 = vld [vmem:[#allocation2 + $0x1d8] sm:$0xff] }
 0x4d3   :  { %3303 = vmatprep.subr.bf16.mxu0 %v3302_v2  ;;  %3185 = vmatpush1.bf16.msra.mxu1 %v3184_v19  ;;  %v1811_v2 = vld [vmem:[#allocation2 + $0x110] sm:$0xff]  ;;  %v1944_v19 = vld [vmem:[#allocation2 + $0x538] sm:$0xff] }
 0x4d4   :  { %3187 = vmatprep.subr.bf16.mxu1 %v3186_v24  ;;  %v1941_v24 = vld [vmem:[#allocation2 + $0x520] sm:$0xff]  ;;  %v3330_v31 = vpack.c.bf16 %v1944_v19, %v1942_v17  ;;  %v1960_v10 = vld [vmem:[#allocation2 + $0x5b8] sm:$0xff]  ;;  %v1838_v17 = vld [vmem:[#allocation2 + $0x1e8] sm:$0xff] }
 0x4d5   :  { %v3332_v40 = vpack.c.bf16 %v1943_v33, %v1941_v24  ;;  %v1840_v19 = vld [vmem:[#allocation2 + $0x1f8] sm:$0xff] }
 0x4d6   :  { %3305 = vmatpush1.bf16.msra.mxu0 %v3304_v8  ;;  %v3200_v8 = vpack.c.bf16 %v1811_v2, %v1809_v1  ;;  %v1953_v1 = vld [vmem:[#allocation2 + $0x580] sm:$0xff]  ;;  %v3218_v2 = vpack.c.bf16 %v1832_v59, %v1830_v58 }
 0x4d7   :  { %3307 = vmatprep.subr.bf16.mxu0 %v3306_v13  ;;  %3189 = vmatpush1.bf16.msra.mxu1 %v3188_v38  ;;  %v1815_v13 = vld [vmem:[#allocation2 + $0x130] sm:$0xff]  ;;  %v1948_v38 = vld [vmem:[#allocation2 + $0x558] sm:$0xff] }
 0x4d8   :  { %3191 = vmatprep.subr.bf16.mxu1 %v3190_v34  ;;  %v1945_v34 = vld [vmem:[#allocation2 + $0x540] sm:$0xff]  ;;  %v3334_v44 = vpack.c.bf16 %v1948_v38, %v1946_v37  ;;  %v1966_v37 = vld [vmem:[#allocation2 + $0x5e8] sm:$0xff]  ;;  %v1968_v38 = vld [vmem:[#allocation2 + $0x5f8] sm:$0xff] }
 0x4d9   :  { %v3336_v51 = vpack.c.bf16 %v1947_v45, %v1945_v34  ;;  %v2113_v34 = vcombine.high %v4898_v20, %v4898_v20  ;;  %v1972_v45 = vld [vmem:[#allocation2 + $0x618] sm:$0xff] }
 0x4da   :  { %3309 = vmatpush1.bf16.msra.mxu0 %v3308_v21  ;;  %v3204_v21 = vpack.c.bf16 %v1815_v13, %v1813_v12  ;;  %v1957_v12 = vld [vmem:[#allocation2 + $0x5a0] sm:$0xff]  ;;  %v3222_v13 = vpack.c.bf16 %v1836_v30, %v1834_v7  ;;  %v1987_v30 = vld [vmem:[#allocation2 + $0x690] sm:$0xff] }
 0x4db   :  { %3311 = vmatprep.subr.bf16.mxu0 %v3310_v28  ;;  %3193 = vmatpush1.bf16.msra.mxu1 %v3192_v49  ;;  %v1819_v28 = vld [vmem:[#allocation2 + $0x150] sm:$0xff]  ;;  %v1952_v49 = vld [vmem:[#allocation2 + $0x578] sm:$0xff]  ;;  %v4916_v47 = vrot.slane %v2113_v34, %v4767_v32  ;;  %v1985_v7 = vld [vmem:[#allocation2 + $0x680] sm:$0xff] }
 0x4dc   :  { %3195 = vmatprep.subr.bf16.mxu1 %v3194_v52  ;;  %v1949_v52 = vld [vmem:[#allocation2 + $0x560] sm:$0xff]  ;;  %v3338_v56 = vpack.c.bf16 %v1952_v49, %v1950_v48  ;;  %v1980_v32 = vld [vmem:[#allocation2 + $0x658] sm:$0xff] }
 0x4dd   :  { %v1969_v49 = vld [vmem:[#allocation2 + $0x600] sm:$0xff] }
 0x4de   :  { %3313 = vmatpush1.bf16.msra.mxu0 %v3312_v39  ;;  %v3208_v39 = vpack.c.bf16 %v1819_v28, %v1817_v27  ;;  %v3226_v27 = vpack.c.bf16 %v1840_v19, %v1838_v17  ;;  %v1837_v28 = vld [vmem:[#allocation2 + $0x1e0] sm:$0xff]  ;;  %v1995_v17 = vld [vmem:[#allocation2 + $0x6d0] sm:$0xff]  ;;  %v1998_v19 = vld [vmem:[#allocation2 + $0x6e8] sm:$0xff] }
 0x4df   :  { %3315 = vmatprep.subr.bf16.mxu0 %v3314_v43  ;;  %3197 = vmatpush1.bf16.msra.mxu1 %v3196_v61  ;;  %v1823_v43 = vld [vmem:[#allocation2 + $0x170] sm:$0xff]  ;;  %v1956_v61 = vld [vmem:[#allocation2 + $0x598] sm:$0xff] }
 0x4e0   :  { %3199 = vmatprep.subr.bf16.mxu1 %v3198_v0  ;;  %v3340_v0 = vpack.c.bf16 %v1951_v57, %v1949_v52  ;;  %v3342_v5 = vpack.c.bf16 %v1956_v61, %v1954_v60  ;;  %v1976_v52 = vld [vmem:[#allocation2 + $0x638] sm:$0xff]  ;;  %v1978_v57 = vld [vmem:[#allocation2 + $0x648] sm:$0xff]  ;;  %v1977_v60 = vld [vmem:[#allocation2 + $0x640] sm:$0xff] }
 0x4e1   :  { %v3366_v59 = vpack.c.bf16 %v1980_v32, %v1978_v57  ;;  %v1979_v61 = vld [vmem:[#allocation2 + $0x650] sm:$0xff] }
 0x4e2   :  { %3317 = vmatpush1.bf16.msra.mxu0 %v3316_v50  ;;  %v3212_v50 = vpack.c.bf16 %v1823_v43, %v1821_v42  ;;  %v1965_v42 = vld [vmem:[#allocation2 + $0x5e0] sm:$0xff]  ;;  %v1967_v43 = vld [vmem:[#allocation2 + $0x5f0] sm:$0xff] }
 0x4e3   :  { %3319 = vmatprep.subr.bf16.mxu0 %v3318_v55  ;;  %3201 = vmatpush1.bf16.msra.mxu1 %v3200_v8  ;;  %v1827_v55 = vld [vmem:[#allocation2 + $0x190] sm:$0xff]  ;;  %v2111_v8 = vcombine.high %v4909_v63, %v4909_v63  ;;  %v3356_v46 = vpack.c.bf16 %v1967_v43, %v1965_v42  ;;  %v2010_v43 = vld [vmem:[#allocation2 + $0x748] sm:$0xff] }
 0x4e4   :  { %3203 = vmatprep.subr.bf16.mxu1 %v3202_v11  ;;  %v3344_v11 = vpack.c.bf16 %v1955_v6, %v1953_v1  ;;  %v2007_v42 = vld [vmem:[#allocation2 + $0x730] sm:$0xff] }
 0x4e5   :  { %2213 = vmatprep.mubr.f32.mxu1 %v2111_v8  ;;  %v1990_v8 = vld [vmem:[#allocation2 + $0x6a8] sm:$0xff] }
 0x4e6   :  { %3321 = vmatpush1.bf16.msra.mxu0 %v3320_v62  ;;  %v3216_v62 = vpack.c.bf16 %v1827_v55, %v1825_v54  ;;  %v1973_v55 = vld [vmem:[#allocation2 + $0x620] sm:$0xff] }
 0x4e7   :  { %3323 = vmatprep.subr.bf16.mxu0 %v3322_v4  ;;  %3205 = vmatpush1.bf16.msra.mxu1 %v3204_v21  ;;  %v1829_v4 = vld [vmem:[#allocation2 + $0x1a0] sm:$0xff]  ;;  %v1962_v21 = vld [vmem:[#allocation2 + $0x5c8] sm:$0xff] }
 0x4e8   :  { %3207 = vmatprep.subr.bf16.mxu1 %v3206_v26  ;;  %v3220_v22 = vpack.c.bf16 %v1831_v18, %v1829_v4  ;;  %v3348_v26 = vpack.c.bf16 %v1959_v16, %v1957_v12  ;;  %v1983_v4 = vld [vmem:[#allocation2 + $0x670] sm:$0xff]  ;;  %v1986_v18 = vld [vmem:[#allocation2 + $0x688] sm:$0xff]  ;;  %v1993_v16 = vld [vmem:[#allocation2 + $0x6c0] sm:$0xff] }
 0x4e9   :  { %v1991_v12 = vld [vmem:[#allocation2 + $0x6b0] sm:$0xff] }
 0x4ea   :  { %3325 = vmatpush1.bf16.msra.mxu0 %v3324_v9  ;;  %v1958_v9 = vld [vmem:[#allocation2 + $0x5a8] sm:$0xff] }
 0x4eb   :  { %3327 = vmatprep.subr.bf16.mxu0 %v3326_v14  ;;  %3209 = vmatpush1.bf16.msra.mxu1 %v3208_v39  ;;  %v1833_v14 = vld [vmem:[#allocation2 + $0x1c0] sm:$0xff]  ;;  %v3346_v3 = vpack.c.bf16 %v1960_v10, %v1958_v9  ;;  %v1992_v9 = vld [vmem:[#allocation2 + $0x6b8] sm:$0xff]  ;;  %v3376_v10 = vpack.c.bf16 %v1987_v30, %v1985_v7  ;;  %v2030_v7 = vld [vmem:[#allocation2 + $0x7e8] sm:$0xff] }
 0x4ec   :  { %3211 = vmatprep.subr.bf16.mxu1 %v3210_v41  ;;  %v3224_v24 = vpack.c.bf16 %v1835_v15, %v1833_v14  ;;  %v3354_v41 = vpack.c.bf16 %v1968_v38, %v1966_v37  ;;  %v1996_v14 = vld [vmem:[#allocation2 + $0x6d8] sm:$0xff]  ;;  %v2003_v37 = vld [vmem:[#allocation2 + $0x710] sm:$0xff]  ;;  %v2006_v38 = vld [vmem:[#allocation2 + $0x728] sm:$0xff] }
 0x4ed   :  { %v2032_v30 = vld [vmem:[#allocation2 + $0x7f8] sm:$0xff] }
 0x4ee   :  { %3329 = vmatpush1.bf16.msra.mxu0 %v3328_v23  ;;  %v1964_v23 = vld [vmem:[#allocation2 + $0x5d8] sm:$0xff] }
 0x4ef   :  { %3331 = vmatprep.subr.bf16.mxu0 %v3330_v31  ;;  %3213 = vmatpush1.bf16.msra.mxu1 %v3212_v50  ;;  %v1839_v31 = vld [vmem:[#allocation2 + $0x1f0] sm:$0xff]  ;;  %v3350_v33 = vpack.c.bf16 %v1964_v23, %v1962_v21  ;;  %v2000_v21 = vld [vmem:[#allocation2 + $0x6f8] sm:$0xff]  ;;  %v3384_v23 = vpack.c.bf16 %v1995_v17, %v1993_v16  ;;  %v4922_v16 = vld.sshfl [vmem:[#allocation9 + $0x10] sm:$0x33 pattern:$0x76325410] }
 0x4f0   :  { %3215 = vmatprep.subr.bf16.mxu1 %v3214_v53  ;;  %v3228_v39 = vpack.c.bf16 %v1839_v31, %v1837_v28  ;;  %v1971_v50 = vld [vmem:[#allocation2 + $0x610] sm:$0xff]  ;;  %v2129_v53 = vcombine.high %v4916_v47, %v4916_v47  ;;  %v2002_v28 = vld [vmem:[#allocation2 + $0x708] sm:$0xff]  ;;  %v2004_v31 = vld [vmem:[#allocation2 + $0x718] sm:$0xff] }
 0x4f1   :  { %v3360_v20 = vpack.c.bf16 %v1971_v50, %v1969_v49  ;;  %v2011_v49 = vld [vmem:[#allocation2 + $0x750] sm:$0xff]  ;;  %v2014_v50 = vld [vmem:[#allocation2 + $0x768] sm:$0xff] }
 0x4f2   :  { %3333 = vmatpush1.bf16.msra.mxu0 %v3332_v40  ;;  %v3352_v40 = vpack.c.bf16 %v1963_v36, %v1961_v35  ;;  %v3390_v35 = vpack.c.bf16 %v2004_v31, %v2002_v28  ;;  %v2001_v36 = vld [vmem:[#allocation2 + $0x700] sm:$0xff]  ;;  %v2038_v17 = vld [vmem:[#allocation2 + $0x828] sm:$0xff]  ;;  %v2044_v31 = vld [vmem:[#allocation2 + $0x858] sm:$0xff] }
 0x4f3   :  { %3335 = vmatprep.subr.bf16.mxu0 %v3334_v44  ;;  %3217 = vmatpush1.bf16.msra.mxu1 %v3216_v62  ;;  %v1970_v44 = vld [vmem:[#allocation2 + $0x608] sm:$0xff] }
 0x4f4   :  { %3219 = vmatprep.subr.bf16.mxu1 %v3218_v2  ;;  %v3358_v48 = vpack.c.bf16 %v1972_v45, %v1970_v44  ;;  %v1982_v62 = vld [vmem:[#allocation2 + $0x668] sm:$0xff]  ;;  %v1981_v2 = vld [vmem:[#allocation2 + $0x660] sm:$0xff]  ;;  %v2012_v44 = vld [vmem:[#allocation2 + $0x758] sm:$0xff] }
 0x4f5   :  { %v3372_v6 = vpack.c.bf16 %v1983_v4, %v1981_v2  ;;  %v2026_v2 = vld [vmem:[#allocation2 + $0x7c8] sm:$0xff]  ;;  %v2028_v4 = vld [vmem:[#allocation2 + $0x7d8] sm:$0xff] }
 0x4f6   :  { %3337 = vmatpush1.bf16.msra.mxu0 %v3336_v51  ;;  %v1974_v51 = vld [vmem:[#allocation2 + $0x628] sm:$0xff] }
 0x4f7   :  { %3339 = vmatprep.subr.bf16.mxu0 %v3338_v56  ;;  %3221 = vmatpush1.bf16.msra.mxu1 %v3220_v22  ;;  %v3362_v54 = vpack.c.bf16 %v1976_v52, %v1974_v51  ;;  %v1975_v56 = vld [vmem:[#allocation2 + $0x630] sm:$0xff]  ;;  %v3378_v22 = vpack.c.bf16 %v1992_v9, %v1990_v8  ;;  %v2016_v51 = vld [vmem:[#allocation2 + $0x778] sm:$0xff]  ;;  %v3418_v9 = vpack.c.bf16 %v2032_v30, %v2030_v7  ;;  %v2042_v28 = vld [vmem:[#allocation2 + $0x848] sm:$0xff] }
 0x4f8   :  { %3223 = vmatprep.subr.bf16.mxu1 %v3222_v13  ;;  %v3364_v58 = vpack.c.bf16 %v1975_v56, %v1973_v55  ;;  %v1994_v13 = vld [vmem:[#allocation2 + $0x6c8] sm:$0xff]  ;;  %v2020_v56 = vld [vmem:[#allocation2 + $0x798] sm:$0xff] }
 0x4f9   :  { %v2018_v55 = vld [vmem:[#allocation2 + $0x788] sm:$0xff]  ;;  %v2072_v7 = vld [vmem:[#allocation2 + $0x938] sm:$0xff] }
 0x4fa   :  { %3341 = vmatpush1.bf16.msra.mxu0 %v3340_v0  ;;  %v3368_v0 = vpack.c.bf16 %v1979_v61, %v1977_v60  ;;  %v3406_v32 = vpack.c.bf16 %v2020_v56, %v2018_v55  ;;  %v2022_v60 = vld [vmem:[#allocation2 + $0x7a8] sm:$0xff]  ;;  %v2024_v61 = vld [vmem:[#allocation2 + $0x7b8] sm:$0xff] }
 0x4fb   :  { %3343 = vmatprep.subr.bf16.mxu0 %v3342_v5  ;;  %3225 = vmatpush1.bf16.msra.mxu1 %v3224_v24  ;;  %v1988_v5 = vld [vmem:[#allocation2 + $0x698] sm:$0xff]  ;;  %v3386_v24 = vpack.c.bf16 %v2000_v21, %v1998_v19 }
 0x4fc   :  { %3227 = vmatprep.subr.bf16.mxu1 %v3226_v27  ;;  %v1999_v27 = vld [vmem:[#allocation2 + $0x6f0] sm:$0xff]  ;;  %v2040_v19 = vld [vmem:[#allocation2 + $0x838] sm:$0xff] }
 0x4fd   :  { %v2060_v55 = vld [vmem:[#allocation2 + $0x8d8] sm:$0xff] }
 0x4fe   :  { %3345 = vmatpush1.bf16.msra.mxu0 %v3344_v11  ;;  %v1989_v11 = vld [vmem:[#allocation2 + $0x6a0] sm:$0xff] }
 0x4ff   :  { %3347 = vmatprep.subr.bf16.mxu0 %v3346_v3  ;;  %3229 = vmatpush1.bf16.msra.mxu1 %v3228_v39  ;;  %v3380_v15 = vpack.c.bf16 %v1991_v12, %v1989_v11  ;;  %v3382_v3 = vpack.c.bf16 %v1996_v14, %v1994_v13  ;;  %v2008_v39 = vld [vmem:[#allocation2 + $0x738] sm:$0xff]  ;;  %v2034_v11 = vld [vmem:[#allocation2 + $0x808] sm:$0xff] }
 0x500   :  { %v3394_v34 = vpack.c.bf16 %v2008_v39, %v2006_v38  ;;  %v2036_v12 = vld [vmem:[#allocation2 + $0x818] sm:$0xff]  ;;  %v2046_v38 = vld [vmem:[#allocation2 + $0x868] sm:$0xff] }
 0x501   :  { %v3422_v14 = vpack.c.bf16 %v2036_v12, %v2034_v11  ;;  %v2048_v39 = vld [vmem:[#allocation2 + $0x878] sm:$0xff] }
 0x502   :  { %3349 = vmatpush1.bf16.msra.mxu0 %v3348_v26  ;;  %2214 = vmatmul.mubr.f32.vlgmr.msra.gmra.mrb[40].mxu1 %v4909_v63  ;;  %v1984_v63 = vld [vmem:[#allocation2 + $0x678] sm:$0xff]  ;;  %v1997_v26 = vld [vmem:[#allocation2 + $0x6e0] sm:$0xff] }
 0x503   :  { %3351 = vmatprep.subr.bf16.mxu0 %v3350_v33  ;;  %v3370_v1 = vpack.c.bf16 %v1984_v63, %v1982_v62  ;;  %v3388_v33 = vpack.c.bf16 %v1999_v27, %v1997_v26  ;;  %v3410_v63 = vpack.c.bf16 %v2024_v61, %v2022_v60  ;;  %v2037_v26 = vld [vmem:[#allocation2 + $0x820] sm:$0xff]  ;;  %v2039_v27 = vld [vmem:[#allocation2 + $0x830] sm:$0xff]  ;;  %v2064_v60 = vld [vmem:[#allocation2 + $0x8f8] sm:$0xff] }
 0x504   :  { %v2076_v11 = vld [vmem:[#allocation2 + $0x958] sm:$0xff] }
 0x506   :  { %3353 = vmatpush1.bf16.msra.mxu0 %v3352_v40  ;;  %v3392_v40 = vpack.c.bf16 %v2003_v37, %v2001_v36  ;;  %v2041_v36 = vld [vmem:[#allocation2 + $0x840] sm:$0xff]  ;;  %v2043_v37 = vld [vmem:[#allocation2 + $0x850] sm:$0xff] }
 0x507   :  { %3355 = vmatprep.subr.bf16.mxu0 %v3354_v41  ;;  %v2005_v41 = vld [vmem:[#allocation2 + $0x720] sm:$0xff] }
 0x508   :  { %v3396_v45 = vpack.c.bf16 %v2007_v42, %v2005_v41  ;;  %v2045_v41 = vld [vmem:[#allocation2 + $0x860] sm:$0xff]  ;;  %v2047_v42 = vld [vmem:[#allocation2 + $0x870] sm:$0xff] }
 0x50a   :  { %3357 = vmatpush1.bf16.msra.mxu0 %v3356_v46  ;;  %v3398_v46 = vpack.c.bf16 %v2012_v44, %v2010_v43  ;;  %v2050_v43 = vld [vmem:[#allocation2 + $0x888] sm:$0xff]  ;;  %v2052_v44 = vld [vmem:[#allocation2 + $0x898] sm:$0xff] }
 0x50b   :  { %3359 = vmatprep.subr.bf16.mxu0 %v3358_v48  ;;  %v2009_v48 = vld [vmem:[#allocation2 + $0x740] sm:$0xff] }
 0x50c   :  { %v3400_v52 = vpack.c.bf16 %v2011_v49, %v2009_v48  ;;  %v2051_v48 = vld [vmem:[#allocation2 + $0x890] sm:$0xff]  ;;  %v2054_v49 = vld [vmem:[#allocation2 + $0x8a8] sm:$0xff] }
 0x50d   :  { %2356 = vmatmul.mubr.f32.vlgmr.msra.gmra.mrb[32].mxu0 %v4902_v29  ;;  %v3374_v29 = vpack.c.bf16 %v1988_v5, %v1986_v18  ;;  %v3414_v5 = vpack.c.bf16 %v2028_v4, %v2026_v2  ;;  %v2068_v2 = vld [vmem:[#allocation2 + $0x918] sm:$0xff] }
 0x50e   :  { %3361 = vmatpush1.bf16.msra.mxu0 %v3360_v20  ;;  %2426 = vmatprep.mubr.f32.mxu0 %v2129_v53  ;;  %v3402_v20 = vpack.c.bf16 %v2016_v51, %v2014_v50  ;;  %v2013_v53 = vld [vmem:[#allocation2 + $0x760] sm:$0xff]  ;;  %v2056_v50 = vld [vmem:[#allocation2 + $0x8b8] sm:$0xff] }
 0x50f   :  { %3363 = vmatprep.subr.bf16.mxu0 %v3362_v54  ;;  %v2015_v54 = vld [vmem:[#allocation2 + $0x770] sm:$0xff] }
 0x510   :  { %v3404_v57 = vpack.c.bf16 %v2015_v54, %v2013_v53  ;;  %v2055_v53 = vld [vmem:[#allocation2 + $0x8b0] sm:$0xff]  ;;  %v2058_v54 = vld [vmem:[#allocation2 + $0x8c8] sm:$0xff] }
 0x512   :  { %3365 = vmatpush1.bf16.msra.mxu0 %v3364_v58  ;;  %v2017_v58 = vld [vmem:[#allocation2 + $0x780] sm:$0xff] }
 0x513   :  { %3367 = vmatprep.subr.bf16.mxu0 %v3366_v59  ;;  %v2019_v59 = vld [vmem:[#allocation2 + $0x790] sm:$0xff] }
 0x514   :  { %v3408_v62 = vpack.c.bf16 %v2019_v59, %v2017_v58  ;;  %v2059_v58 = vld [vmem:[#allocation2 + $0x8d0] sm:$0xff]  ;;  %v2062_v59 = vld [vmem:[#allocation2 + $0x8e8] sm:$0xff] }
 0x516   :  { %3369 = vmatpush1.bf16.msra.mxu0 %v3368_v0  ;;  %v2021_v0 = vld [vmem:[#allocation2 + $0x7a0] sm:$0xff] }
 0x517   :  { %3371 = vmatprep.subr.bf16.mxu0 %v3370_v1  ;;  %v2023_v1 = vld [vmem:[#allocation2 + $0x7b0] sm:$0xff] }
 0x518   :  { %v3412_v18 = vpack.c.bf16 %v2023_v1, %v2021_v0  ;;  %v2063_v0 = vld [vmem:[#allocation2 + $0x8f0] sm:$0xff]  ;;  %v2066_v1 = vld [vmem:[#allocation2 + $0x908] sm:$0xff] }
 0x51a   :  { %3373 = vmatpush1.bf16.msra.mxu0 %v3372_v6  ;;  %v2025_v6 = vld [vmem:[#allocation2 + $0x7c0] sm:$0xff] }
 0x51b   :  { %3375 = vmatprep.subr.bf16.mxu0 %v3374_v29  ;;  %v2027_v29 = vld [vmem:[#allocation2 + $0x7d0] sm:$0xff] }
 0x51c   :  { %v3416_v8 = vpack.c.bf16 %v2027_v29, %v2025_v6  ;;  %v2067_v6 = vld [vmem:[#allocation2 + $0x910] sm:$0xff]  ;;  %v2070_v29 = vld [vmem:[#allocation2 + $0x928] sm:$0xff] }
 0x51e   :  { %3377 = vmatpush1.bf16.msra.mxu0 %v3376_v10  ;;  %v2029_v10 = vld [vmem:[#allocation2 + $0x7e0] sm:$0xff] }
 0x51f   :  { %3379 = vmatprep.subr.bf16.mxu0 %v3378_v22  ;;  %v2031_v22 = vld [vmem:[#allocation2 + $0x7f0] sm:$0xff] }
 0x520   :  { %v3420_v13 = vpack.c.bf16 %v2031_v22, %v2029_v10  ;;  %v2071_v10 = vld [vmem:[#allocation2 + $0x930] sm:$0xff]  ;;  %v2074_v22 = vld [vmem:[#allocation2 + $0x948] sm:$0xff] }
 0x522   :  { %3381 = vmatpush1.bf16.msra.mxu0 %v3380_v15  ;;  %v2033_v15 = vld [vmem:[#allocation2 + $0x800] sm:$0xff] }
 0x523   :  { %3383 = vmatprep.subr.bf16.mxu0 %v3382_v3  ;;  %v2035_v3 = vld [vmem:[#allocation2 + $0x810] sm:$0xff] }
 0x524   :  { %v3424_v21 = vpack.c.bf16 %v2035_v3, %v2033_v15  ;;  %v2075_v15 = vld [vmem:[#allocation2 + $0x950] sm:$0xff]  ;;  %v2078_v3 = vld [vmem:[#allocation2 + $0x968] sm:$0xff] }
 0x526   :  { %3385 = vmatpush1.bf16.msra.mxu0 %v3384_v23  ;;  %v2137_v23 = vcombine.high %v4922_v16, %v4922_v16 }
 0x527   :  { %3387 = vmatprep.subr.bf16.mxu0 %v3386_v24  ;;  %v3426_v24 = vpack.c.bf16 %v2040_v19, %v2038_v17  ;;  %v2080_v17 = vld [vmem:[#allocation2 + $0x978] sm:$0xff] }
 0x52a   :  { %3389 = vmatpush1.bf16.msra.mxu0 %v3388_v33  ;;  %v3428_v33 = vpack.c.bf16 %v2039_v27, %v2037_v26 }
 0x52b   :  { %3391 = vmatprep.subr.bf16.mxu0 %v3390_v35  ;;  %v3430_v35 = vpack.c.bf16 %v2044_v31, %v2042_v28  ;;  %v2085_v31 = vsub.s32 0, %v4760_v25 }
 0x52e   :  { %3393 = vmatpush1.bf16.msra.mxu0 %v3392_v40  ;;  %v3432_v40 = vpack.c.bf16 %v2043_v37, %v2041_v36 }
 0x52f   :  { %3395 = vmatprep.subr.bf16.mxu0 %v3394_v34  ;;  %v3434_v34 = vpack.c.bf16 %v2048_v39, %v2046_v38 }
 0x532   :  { %3397 = vmatpush1.bf16.msra.mxu0 %v3396_v45  ;;  %v3438_v45 = vpack.c.bf16 %v2052_v44, %v2050_v43 }
 0x533   :  { %3399 = vmatprep.subr.bf16.mxu0 %v3398_v46  ;;  %v2049_v46 = vld [vmem:[#allocation2 + $0x880] sm:$0xff] }
 0x534   :  { %v3440_v51 = vpack.c.bf16 %v2051_v48, %v2049_v46 }
 0x536   :  { %3401 = vmatpush1.bf16.msra.mxu0 %v3400_v52  ;;  %v3442_v52 = vpack.c.bf16 %v2056_v50, %v2054_v49 }
 0x537   :  { %3403 = vmatprep.subr.bf16.mxu0 %v3402_v20  ;;  %v2053_v20 = vld [vmem:[#allocation2 + $0x8a0] sm:$0xff] }
 0x538   :  { %v3444_v56 = vpack.c.bf16 %v2055_v53, %v2053_v20 }
 0x53a   :  { %3405 = vmatpush1.bf16.msra.mxu0 %v3404_v57  ;;  %v3446_v57 = vpack.c.bf16 %v2060_v55, %v2058_v54 }
 0x53b   :  { %3407 = vmatprep.subr.bf16.mxu0 %v3406_v32  ;;  %v2057_v32 = vld [vmem:[#allocation2 + $0x8c0] sm:$0xff] }
 0x53c   :  { %v3448_v61 = vpack.c.bf16 %v2059_v58, %v2057_v32 }
 0x53e   :  { %3409 = vmatpush1.bf16.msra.mxu0 %v3408_v62  ;;  %v3450_v62 = vpack.c.bf16 %v2064_v60, %v2062_v59 }
 0x53f   :  { %3411 = vmatprep.subr.bf16.mxu0 %v3410_v63  ;;  %v2061_v63 = vld [vmem:[#allocation2 + $0x8e0] sm:$0xff] }
 0x540   :  { %v3452_v4 = vpack.c.bf16 %v2063_v0, %v2061_v63 }
 0x542   :  { %3413 = vmatpush1.bf16.msra.mxu0 %v3412_v18  ;;  %v3454_v18 = vpack.c.bf16 %v2068_v2, %v2066_v1 }
 0x543   :  { %3415 = vmatprep.subr.bf16.mxu0 %v3414_v5  ;;  %v2065_v5 = vld [vmem:[#allocation2 + $0x900] sm:$0xff] }
 0x544   :  { %v3456_v30 = vpack.c.bf16 %v2067_v6, %v2065_v5 }
 0x546   :  { %3417 = vmatpush1.bf16.msra.mxu0 %v3416_v8  ;;  %v3458_v8 = vpack.c.bf16 %v2072_v7, %v2070_v29 }
 0x547   :  { %3419 = vmatprep.subr.bf16.mxu0 %v3418_v9  ;;  %v2069_v9 = vld [vmem:[#allocation2 + $0x920] sm:$0xff] }
 0x548   :  { %v3460_v12 = vpack.c.bf16 %v2071_v10, %v2069_v9 }
 0x54a   :  { %3421 = vmatpush1.bf16.msra.mxu0 %v3420_v13  ;;  %v3462_v13 = vpack.c.bf16 %v2076_v11, %v2074_v22 }
 0x54b   :  { %3423 = vmatprep.subr.bf16.mxu0 %v3422_v14  ;;  %v2073_v14 = vld [vmem:[#allocation2 + $0x940] sm:$0xff] }
 0x54c   :  { %v3464_v19 = vpack.c.bf16 %v2075_v15, %v2073_v14 }
 0x54d   :  { %2427 = vmatmul.mubr.f32.vlgmr.msra.gmra.mrb[32].mxu0 %v4916_v47  ;;  %v3436_v47 = vpack.c.bf16 %v2047_v42, %v2045_v41 }
 0x54e   :  { %3425 = vmatpush1.bf16.msra.mxu0 %v3424_v21  ;;  %2847 = vmatprep.mubr.msk.f32.mxu0 %vm857_vm4, %v2137_v23  ;;  %v3466_v21 = vpack.c.bf16 %v2080_v17, %v2078_v3  ;;  %v2077_v23 = vld [vmem:[#allocation2 + $0x960] sm:$0xff] }
 0x54f   :  { %3427 = vmatprep.subr.bf16.mxu0 %v3426_v24  ;;  %v2079_v24 = vld [vmem:[#allocation2 + $0x970] sm:$0xff] }
 0x550   :  { %v3468_v26 = vpack.c.bf16 %v2079_v24, %v2077_v23 }
 0x552   :  { %3429 = vmatpush1.bf16.msra.mxu0 %v3428_v33  ;;  %v2081_v33 = vld [vmem:[#allocation16] sm:$0x3] }
 0x553   :  { %3431 = vmatprep.subr.bf16.mxu0 %v3430_v35  ;;  %v2089_v35 = vsub.s32 1, %v4760_v25  ;;  %v2086_v36 = vrot.slane %v2081_v33, %v2085_v31 }
 0x555   :  { %v2090_v37 = vrot.slane %v2081_v33, %v2089_v35 }
 0x556   :  { %3433 = vmatpush1.bf16.msra.mxu0 %v3432_v40 }
 0x557   :  { %3435 = vmatprep.subr.bf16.mxu0 %v3434_v34 }
 0x55a   :  { %3437 = vmatpush1.bf16.msra.mxu0 %v3436_v47 }
 0x55b   :  { %3439 = vmatprep.subr.bf16.mxu0 %v3438_v45 }
 0x55e   :  { %3441 = vmatpush1.bf16.msra.mxu0 %v3440_v51 }
 0x55f   :  { %3443 = vmatprep.subr.bf16.mxu0 %v3442_v52 }
 0x562   :  { %3445 = vmatpush1.bf16.msra.mxu0 %v3444_v56 }
 0x563   :  { %3447 = vmatprep.subr.bf16.mxu0 %v3446_v57 }
 0x566   :  { %3449 = vmatpush1.bf16.msra.mxu0 %v3448_v61 }
 0x567   :  { %3451 = vmatprep.subr.bf16.mxu0 %v3450_v62 }
 0x56a   :  { %3453 = vmatpush1.bf16.msra.mxu0 %v3452_v4 }
 0x56b   :  { %3455 = vmatprep.subr.bf16.mxu0 %v3454_v18 }
 0x56e   :  { %3457 = vmatpush1.bf16.msra.mxu0 %v3456_v30 }
 0x56f   :  { %3459 = vmatprep.subr.bf16.mxu0 %v3458_v8 }
 0x572   :  { %3461 = vmatpush1.bf16.msra.mxu0 %v3460_v12 }
 0x573   :  { %3463 = vmatprep.subr.bf16.mxu0 %v3462_v13 }
 0x576   :  { %3465 = vmatpush1.bf16.msra.mxu0 %v3464_v19 }
 0x577   :  { %3467 = vmatprep.subr.bf16.mxu0 %v3466_v21 }
 0x57a   :  { %3469 = vmatpush1.bf16.msra.mxu0 %v3468_v26 }
 0x57d   :  { %2498 = vmatmul.mubr.f32.vlgmr.msra.gmra.mrb[32].mxu0 %v4922_v16 }
 0x5d5   :  { %v2215_v27 = vpop.f32.mrb[40].mxu1 }
 0x5d6   :  { %v2217_v28 = vpop.f32.mrb[41].mxu1  ;;  %v2216_v38 = vadd.f32 %v2215_v27, %v2086_v36 }
 0x5d7   :  { %v2218_v39 = vadd.f32 %v2217_v28, %v2090_v37 }
 0x650   :  { %v2499_v40 = vpop.f32.mrb[32].mxu0 }
 0x651   :  { %v4935_v34 = vadd.f32 %v2499_v40, %v2216_v38  ;;  %v2501_v41 = vpop.f32.mrb[33].mxu0 }
 0x652   :  { %v3577_v16 = vadd.f32 %v2501_v41, %v2218_v39 }
 0x653   :  { %v2504_v42 = vmax.f32 %v4935_v34, 0.0 }
 0x654   :  { %v2505_v43 = vmax.f32 %v3577_v16, 0.0 }
 0x655   :  { %3815 = dma.done.wait [#allocation4 + $0x1], 8192 }
 0x656   :  { %3816 = vsyncadd [#allocation4 + $0x1], 4294959104  ;;  %2650 = vmatprep.mubr.f32.mxu1 %v2505_v43  ;;  %v2511_v44 = vld [vmem:[#allocation3 + $0x8] sm:$0xff]  ;;  %v2513_v47 = vld [vmem:[#allocation3 + $0x18] sm:$0xff]  ;;  %vm2768_vm4 = vcmask 123904  }
 0x657   :  { %v2510_v45 = vld [vmem:[#allocation3] sm:$0xff]  ;;  %v3470_v46 = vpack.c.bf16 %v2513_v47, %v2511_v44  ;;  %v2512_v48 = vld [vmem:[#allocation3 + $0x10] sm:$0xff]  ;;  %v2515_v49 = vld [vmem:[#allocation3 + $0x28] sm:$0xff] }
 0x658   :  { %v2517_v50 = vld [vmem:[#allocation3 + $0x38] sm:$0xff]  ;;  %v3472_v51 = vpack.c.bf16 %v2512_v48, %v2510_v45  ;;  %v2514_v20 = vld [vmem:[#allocation3 + $0x20] sm:$0xff]  ;;  %v2516_v53 = vld [vmem:[#allocation3 + $0x30] sm:$0xff] }
 0x659   :  { %v3474_v52 = vpack.c.bf16 %v2517_v50, %v2515_v49  ;;  %v2519_v54 = vld [vmem:[#allocation3 + $0x48] sm:$0xff]  ;;  %3471 = vmatprep.subr.bf16.mxu1 %v3470_v46  ;;  %v2521_v55 = vld [vmem:[#allocation3 + $0x58] sm:$0xff]  ;;  %v3476_v56 = vpack.c.bf16 %v2516_v53, %v2514_v20  ;;  %v2518_v32 = vld [vmem:[#allocation3 + $0x40] sm:$0xff] }
 0x65a   :  { %3473 = vmatpush1.bf16.msra.mxu1 %v3472_v51  ;;  %v3478_v57 = vpack.c.bf16 %v2521_v55, %v2519_v54  ;;  %v2520_v58 = vld [vmem:[#allocation3 + $0x50] sm:$0xff]  ;;  %v2523_v59 = vld [vmem:[#allocation3 + $0x68] sm:$0xff]  ;;  %v2525_v60 = vld [vmem:[#allocation3 + $0x78] sm:$0xff] }
 0x65b   :  { %3475 = vmatprep.subr.bf16.mxu1 %v3474_v52  ;;  %v3480_v61 = vpack.c.bf16 %v2520_v58, %v2518_v32  ;;  %v3482_v62 = vpack.c.bf16 %v2525_v60, %v2523_v59  ;;  %v2522_v63 = vld [vmem:[#allocation3 + $0x60] sm:$0xff]  ;;  %v2524_v0 = vld [vmem:[#allocation3 + $0x70] sm:$0xff]  ;;  %v2527_v1 = vld [vmem:[#allocation3 + $0x88] sm:$0xff] }
 0x65c   :  { %v2529_v2 = vld [vmem:[#allocation3 + $0x98] sm:$0xff]  ;;  %v3484_v4 = vpack.c.bf16 %v2524_v0, %v2522_v63  ;;  %v2526_v5 = vld [vmem:[#allocation3 + $0x80] sm:$0xff]  ;;  %v2528_v6 = vld [vmem:[#allocation3 + $0x90] sm:$0xff] }
 0x65d   :  { %v3486_v18 = vpack.c.bf16 %v2529_v2, %v2527_v1  ;;  %v2531_v29 = vld [vmem:[#allocation3 + $0xa8] sm:$0xff]  ;;  %v2533_v7 = vld [vmem:[#allocation3 + $0xb8] sm:$0xff]  ;;  %v3488_v30 = vpack.c.bf16 %v2528_v6, %v2526_v5  ;;  %v2530_v9 = vld [vmem:[#allocation3 + $0xa0] sm:$0xff] }
 0x65e   :  { %3477 = vmatpush1.bf16.msra.mxu1 %v3476_v56  ;;  %v3490_v8 = vpack.c.bf16 %v2533_v7, %v2531_v29  ;;  %v2532_v10 = vld [vmem:[#allocation3 + $0xb0] sm:$0xff]  ;;  %v2535_v22 = vld [vmem:[#allocation3 + $0xc8] sm:$0xff]  ;;  %v2537_v11 = vld [vmem:[#allocation3 + $0xd8] sm:$0xff] }
 0x65f   :  { %3479 = vmatprep.subr.bf16.mxu1 %v3478_v57  ;;  %v3492_v12 = vpack.c.bf16 %v2532_v10, %v2530_v9  ;;  %v3494_v13 = vpack.c.bf16 %v2537_v11, %v2535_v22  ;;  %v2534_v14 = vld [vmem:[#allocation3 + $0xc0] sm:$0xff]  ;;  %v2536_v15 = vld [vmem:[#allocation3 + $0xd0] sm:$0xff]  ;;  %v2539_v3 = vld [vmem:[#allocation3 + $0xe8] sm:$0xff] }
 0x660   :  { %v2541_v17 = vld [vmem:[#allocation3 + $0xf8] sm:$0xff]  ;;  %v3496_v19 = vpack.c.bf16 %v2536_v15, %v2534_v14  ;;  %v2538_v23 = vld [vmem:[#allocation3 + $0xe0] sm:$0xff]  ;;  %v2540_v24 = vld [vmem:[#allocation3 + $0xf0] sm:$0xff] }
 0x661   :  { %v3498_v21 = vpack.c.bf16 %v2541_v17, %v2539_v3  ;;  %v2543_v26 = vld [vmem:[#allocation3 + $0x108] sm:$0xff]  ;;  %v2545_v27 = vld [vmem:[#allocation3 + $0x118] sm:$0xff]  ;;  %v3500_v28 = vpack.c.bf16 %v2540_v24, %v2538_v23  ;;  %v2542_v36 = vld [vmem:[#allocation3 + $0x100] sm:$0xff] }
 0x662   :  { %3481 = vmatpush1.bf16.msra.mxu1 %v3480_v61  ;;  %v3502_v33 = vpack.c.bf16 %v2545_v27, %v2543_v26  ;;  %v2544_v37 = vld [vmem:[#allocation3 + $0x110] sm:$0xff]  ;;  %v2547_v38 = vld [vmem:[#allocation3 + $0x128] sm:$0xff]  ;;  %v2549_v39 = vld [vmem:[#allocation3 + $0x138] sm:$0xff] }
 0x663   :  { %3483 = vmatprep.subr.bf16.mxu1 %v3482_v62  ;;  %v3504_v40 = vpack.c.bf16 %v2544_v37, %v2542_v36  ;;  %v3506_v41 = vpack.c.bf16 %v2549_v39, %v2547_v38  ;;  %v2546_v16 = vld [vmem:[#allocation3 + $0x120] sm:$0xff]  ;;  %v2548_v43 = vld [vmem:[#allocation3 + $0x130] sm:$0xff]  ;;  %v2551_v44 = vld [vmem:[#allocation3 + $0x148] sm:$0xff] }
 0x664   :  { %v2553_v47 = vld [vmem:[#allocation3 + $0x158] sm:$0xff]  ;;  %v3508_v45 = vpack.c.bf16 %v2548_v43, %v2546_v16  ;;  %v2550_v48 = vld [vmem:[#allocation3 + $0x140] sm:$0xff]  ;;  %v2552_v49 = vld [vmem:[#allocation3 + $0x150] sm:$0xff] }
 0x665   :  { %v3510_v46 = vpack.c.bf16 %v2553_v47, %v2551_v44  ;;  %v2555_v50 = vld [vmem:[#allocation3 + $0x168] sm:$0xff]  ;;  %v2557_v51 = vld [vmem:[#allocation3 + $0x178] sm:$0xff]  ;;  %v3512_v52 = vpack.c.bf16 %v2552_v49, %v2550_v48  ;;  %v2554_v53 = vld [vmem:[#allocation3 + $0x160] sm:$0xff] }
 0x666   :  { %3485 = vmatpush1.bf16.msra.mxu1 %v3484_v4  ;;  %v3514_v20 = vpack.c.bf16 %v2557_v51, %v2555_v50  ;;  %v2556_v54 = vld [vmem:[#allocation3 + $0x170] sm:$0xff]  ;;  %v2559_v55 = vld [vmem:[#allocation3 + $0x188] sm:$0xff]  ;;  %v2561_v56 = vld [vmem:[#allocation3 + $0x198] sm:$0xff] }
 0x667   :  { %3487 = vmatprep.subr.bf16.mxu1 %v3486_v18  ;;  %v3516_v57 = vpack.c.bf16 %v2556_v54, %v2554_v53  ;;  %v3518_v32 = vpack.c.bf16 %v2561_v56, %v2559_v55  ;;  %v2558_v58 = vld [vmem:[#allocation3 + $0x180] sm:$0xff]  ;;  %v2560_v59 = vld [vmem:[#allocation3 + $0x190] sm:$0xff]  ;;  %v2563_v60 = vld [vmem:[#allocation3 + $0x1a8] sm:$0xff] }
 0x668   :  { %v2565_v61 = vld [vmem:[#allocation3 + $0x1b8] sm:$0xff]  ;;  %v3520_v62 = vpack.c.bf16 %v2560_v59, %v2558_v58  ;;  %v2562_v0 = vld [vmem:[#allocation3 + $0x1a0] sm:$0xff]  ;;  %v2564_v1 = vld [vmem:[#allocation3 + $0x1b0] sm:$0xff] }
 0x669   :  { %v3522_v63 = vpack.c.bf16 %v2565_v61, %v2563_v60  ;;  %v2567_v2 = vld [vmem:[#allocation3 + $0x1c8] sm:$0xff]  ;;  %v2569_v4 = vld [vmem:[#allocation3 + $0x1d8] sm:$0xff]  ;;  %v3524_v18 = vpack.c.bf16 %v2564_v1, %v2562_v0  ;;  %v2566_v6 = vld [vmem:[#allocation3 + $0x1c0] sm:$0xff] }
 0x66a   :  { %3489 = vmatpush1.bf16.msra.mxu1 %v3488_v30  ;;  %v3526_v5 = vpack.c.bf16 %v2569_v4, %v2567_v2  ;;  %v2568_v29 = vld [vmem:[#allocation3 + $0x1d0] sm:$0xff]  ;;  %v2571_v7 = vld [vmem:[#allocation3 + $0x1e8] sm:$0xff]  ;;  %v2573_v30 = vld [vmem:[#allocation3 + $0x1f8] sm:$0xff] }
 0x66b   :  { %3491 = vmatprep.subr.bf16.mxu1 %v3490_v8  ;;  %v3528_v8 = vpack.c.bf16 %v2568_v29, %v2566_v6  ;;  %v3530_v9 = vpack.c.bf16 %v2573_v30, %v2571_v7  ;;  %v2570_v10 = vld [vmem:[#allocation3 + $0x1e0] sm:$0xff]  ;;  %v2572_v22 = vld [vmem:[#allocation3 + $0x1f0] sm:$0xff]  ;;  %v2660_v3 = vld [vmem:[%s5061_s9 + $0x8] sm:$0xff] }
 0x66c   :  { %v2675_v11 = vld [vmem:[%s5061_s9 + $0x80] sm:$0xff]  ;;  %v2677_v17 = vld [vmem:[%s5061_s9 + $0x90] sm:$0xff]  ;;  %v2662_v26 = vld [vmem:[%s5061_s9 + $0x18] sm:$0xff] }
 0x66d   :  { %v2659_v15 = vld [vmem:[%s5061_s9] sm:$0xff]  ;;  %v2661_v24 = vld [vmem:[%s5061_s9 + $0x10] sm:$0xff]  ;;  %v2664_v38 = vld [vmem:[%s5061_s9 + $0x28] sm:$0xff] }
 0x66e   :  { %3493 = vmatpush1.bf16.msra.mxu1 %v3492_v12  ;;  %v2676_v12 = vld [vmem:[%s5061_s9 + $0x88] sm:$0xff]  ;;  %v2679_v27 = vld [vmem:[%s5061_s9 + $0xa0] sm:$0xff]  ;;  %v2681_v39 = vld [vmem:[%s5061_s9 + $0xb0] sm:$0xff] }
 0x66f   :  { %3495 = vmatprep.subr.bf16.mxu1 %v3494_v13  ;;  %v3532_v13 = vpack.c.bf16 %v2572_v22, %v2570_v10  ;;  %v3534_v14 = vpack.c.bf16 %v2676_v12, %v2675_v11  ;;  %v2663_v37 = vld [vmem:[%s5061_s9 + $0x20] sm:$0xff]  ;;  %v2682_v34 = vld [vmem:[%s5061_s9 + $0xb8] sm:$0xff]  ;;  %v2684_v44 = vld [vmem:[%s5061_s9 + $0xc8] sm:$0xff] }
 0x670   :  { %v2666_v16 = vld [vmem:[%s5061_s9 + $0x38] sm:$0xff]  ;;  %v2683_v43 = vld [vmem:[%s5061_s9 + $0xc0] sm:$0xff]  ;;  %v2668_v48 = vld [vmem:[%s5061_s9 + $0x48] sm:$0xff] }
 0x671   :  { %v2685_v49 = vld [vmem:[%s5061_s9 + $0xd0] sm:$0xff]  ;;  %v2686_v50 = vld [vmem:[%s5061_s9 + $0xd8] sm:$0xff]  ;;  %v2687_v54 = vld [vmem:[%s5061_s9 + $0xe0] sm:$0xff] }
 0x672   :  { %3497 = vmatpush1.bf16.msra.mxu1 %v3496_v19  ;;  %v2678_v19 = vld [vmem:[%s5061_s9 + $0x98] sm:$0xff]  ;;  %v2688_v55 = vld [vmem:[%s5061_s9 + $0xe8] sm:$0xff]  ;;  %v2689_v60 = vld [vmem:[%s5061_s9 + $0xf0] sm:$0xff] }
 0x673   :  { %3499 = vmatprep.subr.bf16.mxu1 %v3498_v21  ;;  %v3536_v21 = vpack.c.bf16 %v2660_v3, %v2659_v15  ;;  %v3538_v23 = vpack.c.bf16 %v2678_v19, %v2677_v17  ;;  %v2670_v53 = vld [vmem:[%s5061_s9 + $0x58] sm:$0xff]  ;;  %v2672_v58 = vld [vmem:[%s5061_s9 + $0x68] sm:$0xff] }
 0x674   :  { %v2690_v61 = vld [vmem:[%s5061_s9 + $0xf8] sm:$0xff] }
 0x675   :  { %v2674_v0 = vld [vmem:[%s5061_s9 + $0x78] sm:$0xff] }
 0x676   :  { %3501 = vmatpush1.bf16.msra.mxu1 %v3500_v28  ;;  %v2680_v28 = vld [vmem:[%s5061_s9 + $0xa8] sm:$0xff]  ;;  %v2574_v2 = vld [vmem:[#allocation18] sm:$0x3]  ;;  %v2848_v10 = vld [vmem:[#allocation19] ss:$0 sm:$0xff] }
 0x677   :  { %3503 = vmatprep.subr.bf16.mxu1 %v3502_v33  ;;  %v3540_v33 = vpack.c.bf16 %v2662_v26, %v2661_v24  ;;  %v3542_v36 = vpack.c.bf16 %v2680_v28, %v2679_v27  ;;  %v2579_v4 = vrot.slane %v2574_v2, %v2085_v31 }
 0x67a   :  { %3505 = vmatpush1.bf16.msra.mxu1 %v3504_v40  ;;  %v3546_v40 = vpack.c.bf16 %v2682_v34, %v2681_v39 }
 0x67b   :  { %3507 = vmatprep.subr.bf16.mxu1 %v3506_v41  ;;  %v2665_v41 = vld [vmem:[%s5061_s9 + $0x30] sm:$0xff] }
 0x67c   :  { %v3548_v47 = vpack.c.bf16 %v2666_v16, %v2665_v41 }
 0x67e   :  { %3509 = vmatpush1.bf16.msra.mxu1 %v3508_v45  ;;  %v3550_v45 = vpack.c.bf16 %v2684_v44, %v2683_v43 }
 0x67f   :  { %3511 = vmatprep.subr.bf16.mxu1 %v3510_v46  ;;  %v2667_v46 = vld [vmem:[%s5061_s9 + $0x40] sm:$0xff] }
 0x680   :  { %v3552_v51 = vpack.c.bf16 %v2668_v48, %v2667_v46 }
 0x682   :  { %3513 = vmatpush1.bf16.msra.mxu1 %v3512_v52  ;;  %v3554_v52 = vpack.c.bf16 %v2686_v50, %v2685_v49 }
 0x683   :  { %3515 = vmatprep.subr.bf16.mxu1 %v3514_v20  ;;  %v2669_v20 = vld [vmem:[%s5061_s9 + $0x50] sm:$0xff] }
 0x684   :  { %v3556_v56 = vpack.c.bf16 %v2670_v53, %v2669_v20 }
 0x686   :  { %3517 = vmatpush1.bf16.msra.mxu1 %v3516_v57  ;;  %v3558_v57 = vpack.c.bf16 %v2688_v55, %v2687_v54 }
 0x687   :  { %3519 = vmatprep.subr.bf16.mxu1 %v3518_v32  ;;  %v2671_v32 = vld [vmem:[%s5061_s9 + $0x60] sm:$0xff] }
 0x688   :  { %v3560_v59 = vpack.c.bf16 %v2672_v58, %v2671_v32 }
 0x68a   :  { %3521 = vmatpush1.bf16.msra.mxu1 %v3520_v62  ;;  %v3562_v62 = vpack.c.bf16 %v2690_v61, %v2689_v60 }
 0x68b   :  { %3523 = vmatprep.subr.bf16.mxu1 %v3522_v63  ;;  %v2673_v63 = vld [vmem:[%s5061_s9 + $0x70] sm:$0xff]  ;;  %s3839_s9 = smov [#allocation21]  }
 0x68c   :  { %v3564_v1 = vpack.c.bf16 %v2674_v0, %v2673_v63  ;;  %s2776_s29 = sshll.u32 %s3839_s9, 4  ;;  %s2777_s29 = int_to_ptr.vmem [resolvable:$true] %s2776_s29 }
 0x68d   :  { %s3783_s30 = scalar_lea.vmem %s2777_s29, 32  ;;  %p3788_p9 = scmp.lt.s32.totalorder %s2777_s29, %s2777_s29 }
 0x68e   :  { %3525 = vmatpush1.bf16.msra.mxu1 %v3524_v18  ;;  %v2583_v18 = vrot.slane %v2574_v2, %v2089_v35  ;;  %p3784_p8 = scmp.ne.s32.totalorder %s2777_s29, %s3783_s30  ;;  %p3789_p10 = scmp.lt.s32.totalorder %s3783_s30, %s3783_s30 }
 0x68f   :  { %3527 = vmatprep.subr.bf16.mxu1 %v3526_v5 }
 0x690   :  { %p3790_p11 = por %p3789_p10, %p3788_p9 }
 0x692   :  { %3529 = vmatpush1.bf16.msra.mxu1 %v3528_v8  ;;  %p3791_p12 = pnand %p3790_p11, %p3784_p8 }
 0x693   :  { %3531 = vmatprep.subr.bf16.mxu1 %v3530_v9 }
 0x696   :  { %3533 = vmatpush1.bf16.msra.mxu1 %v3532_v13 }
 0x697   :  { %3535 = vmatprep.subr.bf16.mxu1 %v3534_v14 }
 0x699   :  { %2651 = vmatmul.mubr.f32.vlgmr.msra.gmra.mrb[42].mxu1 %v2504_v42  ;;  %v3544_v42 = vpack.c.bf16 %v2664_v38, %v2663_v37 }
 0x69a   :  { %3537 = vmatpush3.bf16.msra.mxu1 %v3536_v21 }
 0x69b   :  { %3539 = vmatprep.subr.bf16.mxu1 %v3538_v23 }
 0x69e   :  { %3541 = vmatpush3.bf16.msra.mxu1 %v3540_v33 }
 0x69f   :  { %3543 = vmatprep.subr.bf16.mxu1 %v3542_v36 }
 0x6a2   :  { %3545 = vmatpush3.bf16.msra.mxu1 %v3544_v42 }
 0x6a3   :  { %3547 = vmatprep.subr.bf16.mxu1 %v3546_v40 }
 0x6a6   :  { %3549 = vmatpush3.bf16.msra.mxu1 %v3548_v47 }
 0x6a7   :  { %3551 = vmatprep.subr.bf16.mxu1 %v3550_v45 }
 0x6aa   :  { %3553 = vmatpush3.bf16.msra.mxu1 %v3552_v51 }
 0x6ab   :  { %3555 = vmatprep.subr.bf16.mxu1 %v3554_v52 }
 0x6ae   :  { %3557 = vmatpush3.bf16.msra.mxu1 %v3556_v56 }
 0x6af   :  { %3559 = vmatprep.subr.bf16.mxu1 %v3558_v57 }
 0x6b2   :  { %3561 = vmatpush3.bf16.msra.mxu1 %v3560_v59 }
 0x6b3   :  { %3563 = vmatprep.subr.bf16.mxu1 %v3562_v62 }
 0x6b6   :  { %3565 = vmatpush3.bf16.msra.mxu1 %v3564_v1 }
 0x76c   :  { %v2652_v5 = vpop.f32.mrb[42].mxu1 }
 0x76d   :  { %v2653_v6 = vadd.f32 %v2652_v5, %v2579_v4  ;;  %v2654_v29 = vpop.f32.mrb[43].mxu1 }
 0x76e   :  { %v2655_v7 = vadd.f32 %v2654_v29, %v2583_v18 }
 0x76f   :  { %v2657_v8 = vmax.f32 %v2653_v6, 0.0 }
 0x770   :  { %v2658_v30 = vmax.f32 %v2655_v7, 0.0 }
 0x772   :  { %2762 = vmatprep.mubr.f32.mxu1 %v2658_v30 }
 0x773   :  { %2763 = vmatmul.mubr.f32.vlgmr.msra.gmra.mrb[44].mxu1 %v2657_v8 }
 0x846   :  { %v2992_v9 = vpop.f32.mrb[44].mxu1 }
 0x847   :  { %v2993_v22 = vpop.f32.mrb[45].mxu1 }
 0x848   :  { %v2994_v11 = vadd.f32 %v2993_v22, %v2992_v9 }
 0x84a   :  { %v2765_v12 = vadd.f32 %v2994_v11, %v2848_v10 }
 0x84c   :  { %2769 = vst.msk [vmem:[#allocation21] sm:$0x3] %vm2768_vm4, %v2765_v12 }
 0x84d   :  { %3794 = shalt.err (!%p3791_p12)
}
 0x84e   :  { %s3795_s13 = scalar_lea.hbm %s5063_s11, 32 }
 0x84f   :  { %p3796_p13 = scmp.ne.s32.totalorder %s5063_s11, %s3795_s13  ;;  %p3799_p0 = scmp.lt.u32.totalorder %s3795_s13, %s5063_s11 }
 0x851   :  { %p3801_p1 = pnand %p3799_p0, %p3796_p13 }
 0x853   :  { %3804 = shalt.err (!%p3801_p1)
}
 0x854   :  { %2779 = dma.vmem_to_hbm [thread:$0]  %s2777_s29, 32, %s5063_s11, [#allocation12]  }
 0x855   :  { %3817 = dma.done.wait [#allocation12], 32  }
 0x856   :  { %3818 = vsyncadd [#allocation12], 4294967264 }
 0x857   :  { %2783 = vsyncpa [#allocation11], 1 }
 0x858   :  { %2784 = vsyncpa [#allocation14], 1 }
 0x859   :  { %2785 = vsyncpa [#allocation17], 1 }
 0x85a   :  { %2786 = vsyncpa [#allocation20], 1 }
 0x85b   :  { %2787 = vsyncpa [#allocation12], 1 }
 0x85c   :  { %2788 = vsyncmov [#allocation4] }
 0x85f   :  { %s2789_s2 = vpop.sfrf %2788 }
 0x860   :  { %p2849_p2 = scmp.ne.s32.totalorder %s2789_s2, 0 }
 0x862   :  { %2793 = shalt.err (%p2849_p2)  }
 0x863   :  { %2795 = vsyncmov [#allocation4 + $0x1] }
 0x866   :  { %s2796_s18 = vpop.sfrf %2795 }
 0x867   :  { %p2850_p3 = scmp.ne.s32.totalorder %s2796_s18, 0 }
 0x869   :  { %2800 = shalt.err (%p2850_p3)  }

</bundles_post_ra>
